<compile_context>
chip_gen: v7x
topology: tpu7x:2x2x1
jax: 0.10.0
libtpu: 0.0.40
codegen_flags: <defaults>
</compile_context>

<pallas_src>
import jax
import jax.numpy as jnp
from jax import lax
from jax.experimental import pallas as pl
from jax.experimental.pallas import tpu as pltpu

_SELU_ALPHA = 1.6732632423543772
_SELU_SCALE = 1.0507009873554805


def _selu(x):
    return _SELU_SCALE * jnp.where(x > 0, x, _SELU_ALPHA * (jnp.exp(x) - 1.0))


# ---------------------------------------------------------------------------
# Fused kernel (one batch tile of nb samples)
# ---------------------------------------------------------------------------
def _fused_kernel(x_ref, w1_ref, b1_ref, cmask_ref, w2_ref, b2_ref,
                  fc1w_ref, fc1b_ref, fc2w_ref, fc2b_ref,
                  o_ref, a_ref, p2_ref, a2_ref):
    """x_ref   : (14, nb, 120) bf16, rows rr = a1-row-1, lanes (y_local in 0..3, xcol in 0..29)
    w1_ref  : (120, 512) bf16, output lanes ((pi,pj) pooling candidate, c in 0..15, k in 0..7)
    a_ref   : (16*nb, 128) bf16 scratch = zero-padded a1 rows, lanes (c, k)
    p2_ref  : (14*nb, 384) bf16 scratch = conv2 im2col rows (pi, oi2, n), lanes (dy, c, k)
    w2_ref  : (384, 256) bf16, output lanes (pj, oj2(+pad), co)
    a2_ref  : (nb, 896) f32 scratch, lanes (oi2, oj2(+pad), co)
    """
    nb = o_ref.shape[0]

    # ----- stage 1: conv1 -> maxpool 2x2 -> selu (pool candidates = lane groups)
    w1 = w1_ref[...]
    b1 = b1_ref[...]                       # (1, 128) conv1 bias tiled over c
    cm = cmask_ref[...]                    # (1, 128) zeroes a1pad border columns
    zblk = jnp.zeros((nb, 128), jnp.bfloat16)
    a_ref[0:nb, :] = zblk                  # a1pad top border row
    a_ref[15 * nb:16 * nb, :] = zblk       # a1pad bottom border row
    for rr in range(14):
        y = jnp.dot(x_ref[rr], w1, preferred_element_type=jnp.float32)   # (nb, 512)
        m = jnp.maximum(jnp.maximum(y[:, 0:128], y[:, 128:256]),
                        jnp.maximum(y[:, 256:384], y[:, 384:512]))
        a_ref[(rr + 1) * nb:(rr + 2) * nb, :] = (_selu(m + b1) * cm).astype(jnp.bfloat16)

    # ----- stage 2: conv2 -> maxpool 2x2 -> selu
    # im2col: 42 aligned (nb,128) copies (full a1pad rows), then ONE matmul.
    for pi in range(2):
        for oi in range(7):
            d0 = (pi * 7 + oi) * nb
            for dy in range(3):
                s0 = (2 * oi + pi + dy) * nb
                p2_ref[d0:d0 + nb, dy * 128:(dy + 1) * 128] = a_ref[s0:s0 + nb, :]
    y2 = jnp.dot(p2_ref[...], w2_ref[...],
                 preferred_element_type=jnp.float32)             # (14nb, 256)
    b2 = b2_ref[...]                                             # (1, 128)
    for oi in range(7):
        t = jnp.maximum(y2[oi * nb:(oi + 1) * nb, :],
                        y2[(7 + oi) * nb:(8 + oi) * nb, :])      # max over pi (rows)
        t = jnp.maximum(t[:, 0:128], t[:, 128:256])              # max over pj (lanes)
        a2_ref[:, oi * 128:(oi + 1) * 128] = _selu(t + b2)

    # ----- head: fc1 -> selu -> fc2 -> log_softmax (f32, 128-lane padded)
    h = _selu(jnp.dot(a2_ref[...], fc1w_ref[...],
                      preferred_element_type=jnp.float32) + fc1b_ref[...])
    logits = (jnp.dot(h, fc2w_ref[...], preferred_element_type=jnp.float32)
              + fc2b_ref[...])                                   # (nb, 128)
    real = logits[:, 0:10]
    mx = jnp.max(real, axis=-1, keepdims=True)
    lse = jnp.log(jnp.sum(jnp.exp(real - mx), axis=-1, keepdims=True))
    o_ref[...] = logits - (mx + lse)       # lane-dense store; cols >=10 are junk


# ---------------------------------------------------------------------------
# Host-side prep: compact stage-1 slab + block-structured weights
# ---------------------------------------------------------------------------
def _pick_nb(n):
    if n >= 256:
        return 128
    return min(128, max(16, ((n + 31) // 32) * 16))   # aim for >=2 grid steps


def _stage1_lhs(x, n_pad):
    """x: (n, 28, 28) -> (14, n_pad, 120) bf16: rows rr, lanes (y_local, xpad col)."""
    n = x.shape[0]
    xt = jnp.transpose(x.astype(jnp.bfloat16), (1, 0, 2))        # (28, n, 28)
    xp = jnp.pad(xt, ((1, 1), (0, n_pad - n), (1, 1)))           # (30, n_pad, 30)
    parts = [lax.slice(xp, (yl, 0, 0), (yl + 27, n_pad, 30), (2, 1, 1))
             for yl in range(4)]                                 # each (14, n_pad, 30)
    return jnp.concatenate(parts, axis=-1)                       # (14, n_pad, 120)


def _prep_weights(params):
    f32 = jnp.float32
    # conv1 -> W1 (120, 512): rows (y_local, xcol), cols (pi, pj, c, k)
    w1t = jnp.transpose(params["conv1_w"].astype(f32)[:, 0], (1, 2, 0))   # (3,3,8)
    rows30 = jnp.arange(30)
    c_idx = jnp.arange(16)
    W1 = jnp.zeros((4, 30, 2, 2, 16, 8), f32)
    for pi in range(2):
        for pj in range(2):
            for dy in range(3):
                for dx in range(3):
                    cols = 2 * c_idx + pj + dx - 2               # target xpad column per c
                    B = (rows30[:, None] == cols[None, :]).astype(f32)    # (30, 16)
                    W1 = W1.at[pi + dy, :, pi, pj, :, :].add(
                        B[:, :, None] * w1t[dy, dx][None, None, :])
    w1big = W1.reshape(120, 512).astype(jnp.bfloat16)
    b1t = jnp.tile(params["conv1_b"].astype(f32), 16).reshape(1, 128)
    cmask = (jnp.ones((128,), f32).at[0:8].set(0.0)
             .at[120:128].set(0.0).reshape(1, 128))              # zero a1pad cols 0 and 15

    # conv2 -> W2 (384, 256): rows (dy, c, ci), cols (pj, oj2(+pad), co)
    w2t = jnp.transpose(params["conv2_w"].astype(f32), (2, 3, 1, 0))      # (3,3,8,16)
    oj = jnp.arange(7)
    W2 = jnp.zeros((3, 16, 8, 2, 8, 16), f32)
    for pj in range(2):
        for dy in range(3):
            for dx in range(3):
                B = (jnp.arange(16)[:, None] == (2 * oj + pj + dx)[None, :]).astype(f32)
                W2 = W2.at[dy, :, :, pj, 0:7, :].add(
                    B[:, None, :, None] * w2t[dy, dx][None, :, None, :])
    w2big = W2.reshape(384, 256).astype(jnp.bfloat16)
    b2t = jnp.pad(jnp.tile(params["conv2_b"].astype(f32), 7), (0, 16)).reshape(1, 128)

    # fc1: rows ordered (oi2, oj2(8, last is pad), co), output padded to 128 lanes
    fc1w = params["fc1_w"].astype(f32).reshape(64, 16, 7, 7)              # (j, co, oi2, oj2)
    fc1wp = jnp.transpose(fc1w, (2, 3, 1, 0))                             # (oi2, oj2, co, j)
    fc1wp = jnp.pad(fc1wp, ((0, 0), (0, 1), (0, 0), (0, 0))).reshape(896, 64)
    fc1wp = jnp.pad(fc1wp, ((0, 0), (0, 64)))                             # (896, 128)
    fc1bp = jnp.pad(params["fc1_b"].astype(f32), (0, 64)).reshape(1, 128)

    # fc2: (128, 128), rows >=64 and cols >=10 are zero
    fc2wp = jnp.zeros((128, 128), f32).at[0:64, 0:10].set(
        params["fc2_w"].astype(f32).T)
    fc2bp = jnp.zeros((1, 128), f32).at[0, 0:10].set(params["fc2_b"].astype(f32))
    return w1big, b1t, cmask, w2big, b2t, fc1wp, fc1bp, fc2wp, fc2bp


# ---------------------------------------------------------------------------
# Forward pass
# ---------------------------------------------------------------------------
@jax.jit
def net_forward(x_nchw, params):
    n = x_nchw.shape[0]
    nb = _pick_nb(n)
    n_pad = -(-n // nb) * nb
    nt = n_pad // nb

    x = x_nchw[:, 0, :, :].astype(jnp.float32)                   # (n, 28, 28)
    lhs1 = _stage1_lhs(x, n_pad)                                 # (14, n_pad, 120) bf16
    (w1big, b1t, cmask, w2big, b2t,
     fc1wp, fc1bp, fc2wp, fc2bp) = _prep_weights(params)

    out = pl.pallas_call(
        _fused_kernel,
        out_shape=jax.ShapeDtypeStruct((n_pad, 128), jnp.float32),
        grid=(nt,),
        in_specs=[
            pl.BlockSpec((14, nb, 120), lambda i: (0, i, 0)),    # batch-tiled stage-1 slab
            pl.BlockSpec((120, 512), lambda i: (0, 0)),          # conv1 weight (resident)
            pl.BlockSpec((1, 128), lambda i: (0, 0)),            # conv1 bias (tiled)
            pl.BlockSpec((1, 128), lambda i: (0, 0)),            # a1pad column mask
            pl.BlockSpec((384, 256), lambda i: (0, 0)),          # conv2 weight (resident)
            pl.BlockSpec((1, 128), lambda i: (0, 0)),            # conv2 bias (tiled)
            pl.BlockSpec((896, 128), lambda i: (0, 0)),          # fc1 (lane-padded)
            pl.BlockSpec((1, 128), lambda i: (0, 0)),
            pl.BlockSpec((128, 128), lambda i: (0, 0)),          # fc2 (lane-padded)
            pl.BlockSpec((1, 128), lambda i: (0, 0)),
        ],
        out_specs=pl.BlockSpec((nb, 128), lambda i: (i, 0)),
        scratch_shapes=[
            pltpu.VMEM((16 * nb, 128), jnp.bfloat16),            # zero-padded a1 (A slab)
            pltpu.VMEM((14 * nb, 384), jnp.bfloat16),            # conv2 im2col slab
            pltpu.VMEM((nb, 896), jnp.float32),                  # flattened a2 slab
        ],
        compiler_params=pltpu.CompilerParams(
            dimension_semantics=("parallel",),
            vmem_limit_bytes=40 * 1024 * 1024,
        ),
    )(lhs1, w1big, b1t, cmask, w2big, b2t, fc1wp, fc1bp, fc2wp, fc2bp)
    return out[:n, :10]                                          # (N, 10) log-probs


# ---------------------------------------------------------------------------
# Pure-JAX reference (self-check) and deterministic params
# ---------------------------------------------------------------------------
def _reference_forward(x_nchw, params):
    x = jnp.transpose(x_nchw.astype(jnp.float32), (0, 2, 3, 1))

    def stage(x, w, b):
        y = lax.conv_general_dilated(
            x, jnp.transpose(w, (2, 3, 1, 0)), (1, 1), "SAME",
            dimension_numbers=("NHWC", "HWIO", "NHWC")) + b
        n, h, wd, c = y.shape
        y = y.reshape(n, h // 2, 2, wd // 2, 2, c).max(axis=(2, 4))
        return _selu(y)

    a1 = stage(x, params["conv1_w"], params["conv1_b"])
    a2 = stage(a1, params["conv2_w"], params["conv2_b"])
    flat = jnp.transpose(a2, (0, 3, 1, 2)).reshape(x.shape[0], 16 * 7 * 7)
    h = _selu(flat @ params["fc1_w"].T + params["fc1_b"])
    logits = h @ params["fc2_w"].T + params["fc2_b"]
    return jax.nn.log_softmax(logits, axis=-1)


def init_params(key):
    ks = jax.random.split(key, 8)
    f32 = jnp.float32
    return {
        "conv1_w": 0.1 * jax.random.normal(ks[0], (8, 1, 3, 3), f32),
        "conv1_b": 0.1 * jax.random.normal(ks[1], (8,), f32),
        "conv2_w": 0.1 * jax.random.normal(ks[2], (16, 8, 3, 3), f32),
        "conv2_b": 0.1 * jax.random.normal(ks[3], (16,), f32),
        "fc1_w": 0.05 * jax.random.normal(ks[4], (64, 16 * 7 * 7), f32),
        "fc1_b": 0.05 * jax.random.normal(ks[5], (64,), f32),
        "fc2_w": 0.1 * jax.random.normal(ks[6], (10, 64), f32),
        "fc2_b": 0.1 * jax.random.normal(ks[7], (10,), f32),
    }


if __name__ == "__main__":
    key = jax.random.PRNGKey(0)
    k_x, k_p = jax.random.split(key)
    x = jax.random.normal(k_x, (2, 1, 28, 28), jnp.float32)      # MNIST-shaped batch
    params = init_params(k_p)

    out = net_forward(x, params)
    jax.block_until_ready(out)
    assert out.shape == (2, 10)

    ref = _reference_forward(x, params)
    # conv stages feed the MXU in bf16 (f32 accumulate), so allow a bf16-level tolerance.
    assert bool(jnp.allclose(out, ref, rtol=2e-2, atol=2e-2)), (
        "max |diff| = %e" % float(jnp.max(jnp.abs(out - ref))))
    print("KERNEL_OK")
</pallas_src>

<mosaic_0001>
module attributes {stable_mosaic.version = 11 : i64} {
  func.func @_fused_kernel(%arg0: i32, %arg1: memref<14x16x120xbf16, #tpu.memory_space<vmem>>, %arg2: memref<120x512xbf16, #tpu.memory_space<vmem>>, %arg3: memref<1x128xf32, #tpu.memory_space<vmem>>, %arg4: memref<1x128xf32, #tpu.memory_space<vmem>>, %arg5: memref<384x256xbf16, #tpu.memory_space<vmem>>, %arg6: memref<1x128xf32, #tpu.memory_space<vmem>>, %arg7: memref<896x128xf32, #tpu.memory_space<vmem>>, %arg8: memref<1x128xf32, #tpu.memory_space<vmem>>, %arg9: memref<128x128xf32, #tpu.memory_space<vmem>>, %arg10: memref<1x128xf32, #tpu.memory_space<vmem>>, %arg11: memref<16x128xf32, #tpu.memory_space<vmem>>, %arg12: memref<256x128xbf16, #tpu.memory_space<vmem>>, %arg13: memref<224x384xbf16, #tpu.memory_space<vmem>>, %arg14: memref<16x896xf32, #tpu.memory_space<vmem>>) attributes {dimension_semantics = [#tpu.dimension_semantics<parallel>], iteration_bounds = array<i64: 1>, scalar_prefetch = 0 : i64, scratch_operands = 3 : i64, tpu.core_type = #tpu.core_type<tc>, window_params = [{transform_indices = @transform_0, window_bounds = array<i64: 14, 16, 120>}, {pipeline_mode = #tpu.pipeline_mode<synchronous>, transform_indices = @transform_1, window_bounds = array<i64: 120, 512>}, {pipeline_mode = #tpu.pipeline_mode<synchronous>, transform_indices = @transform_2, window_bounds = array<i64: 1, 128>}, {pipeline_mode = #tpu.pipeline_mode<synchronous>, transform_indices = @transform_3, window_bounds = array<i64: 1, 128>}, {pipeline_mode = #tpu.pipeline_mode<synchronous>, transform_indices = @transform_4, window_bounds = array<i64: 384, 256>}, {pipeline_mode = #tpu.pipeline_mode<synchronous>, transform_indices = @transform_5, window_bounds = array<i64: 1, 128>}, {pipeline_mode = #tpu.pipeline_mode<synchronous>, transform_indices = @transform_6, window_bounds = array<i64: 896, 128>}, {pipeline_mode = #tpu.pipeline_mode<synchronous>, transform_indices = @transform_7, window_bounds = array<i64: 1, 128>}, {pipeline_mode = #tpu.pipeline_mode<synchronous>, transform_indices = @transform_8, window_bounds = array<i64: 128, 128>}, {pipeline_mode = #tpu.pipeline_mode<synchronous>, transform_indices = @transform_9, window_bounds = array<i64: 1, 128>}, {transform_indices = @transform_10, window_bounds = array<i64: 16, 128>}]} {
    %c0 = arith.constant 0 : index
    %c0_0 = arith.constant 0 : index
    %0 = vector.load %arg2[%c0, %c0_0] : memref<120x512xbf16, #tpu.memory_space<vmem>>, vector<120x512xbf16>
    %c0_1 = arith.constant 0 : index
    %c0_2 = arith.constant 0 : index
    %1 = vector.load %arg3[%c0_1, %c0_2] : memref<1x128xf32, #tpu.memory_space<vmem>>, vector<1x128xf32>
    %c0_3 = arith.constant 0 : index
    %c0_4 = arith.constant 0 : index
    %2 = vector.load %arg4[%c0_3, %c0_4] : memref<1x128xf32, #tpu.memory_space<vmem>>, vector<1x128xf32>
    %cst = arith.constant 0.000000e+00 : bf16
    %3 = vector.broadcast %cst : bf16 to vector<16x128xbf16>
    %c0_5 = arith.constant 0 : index
    %c0_6 = arith.constant 0 : index
    %4 = vector.load %arg12[%c0_5, %c0_6] : memref<256x128xbf16, #tpu.memory_space<vmem>>, vector<16x128xbf16>
    tpu.vector_store %arg12[%c0_5, %c0_6], %3 {strides = array<i32>} : memref<256x128xbf16, #tpu.memory_space<vmem>>, vector<16x128xbf16>,
    %c240 = arith.constant 240 : index
    %c0_7 = arith.constant 0 : index
    %5 = vector.load %arg12[%c240, %c0_7] : memref<256x128xbf16, #tpu.memory_space<vmem>>, vector<16x128xbf16>
    tpu.vector_store %arg12[%c240, %c0_7], %3 {strides = array<i32>} : memref<256x128xbf16, #tpu.memory_space<vmem>>, vector<16x128xbf16>,
    %c0_8 = arith.constant 0 : index
    %c0_9 = arith.constant 0 : index
    %c0_10 = arith.constant 0 : index
    %6 = vector.load %arg1[%c0_8, %c0_9, %c0_10] : memref<14x16x120xbf16, #tpu.memory_space<vmem>>, vector<1x16x120xbf16>
    %7 = vector.shape_cast %6 : vector<1x16x120xbf16> to vector<16x120xbf16>
    %cst_11 = arith.constant dense<0.000000e+00> : vector<16x512xf32>
    %8 = tpu.matmul %7, %0, %cst_11 {dimension_numbers = #tpu.dot_dimension_numbers<[1], [0], [0], [1], [0, 0, 1, 1], [], []>} : vector<16x120xbf16>, vector<120x512xbf16>, vector<16x512xf32> -> vector<16x512xf32>
    %9 = vector.extract_strided_slice %8 {offsets = [0, 0], sizes = [16, 128], strides = [1, 1]} : vector<16x512xf32> to vector<16x128xf32>
    %10 = vector.extract_strided_slice %8 {offsets = [0, 128], sizes = [16, 128], strides = [1, 1]} : vector<16x512xf32> to vector<16x128xf32>
    %11 = arith.maximumf %9, %10 : vector<16x128xf32>
    %12 = vector.extract_strided_slice %8 {offsets = [0, 256], sizes = [16, 128], strides = [1, 1]} : vector<16x512xf32> to vector<16x128xf32>
    %13 = vector.extract_strided_slice %8 {offsets = [0, 384], sizes = [16, 128], strides = [1, 1]} : vector<16x512xf32> to vector<16x128xf32>
    %14 = arith.maximumf %12, %13 : vector<16x128xf32>
    %15 = arith.maximumf %11, %14 : vector<16x128xf32>
    %16 = vector.broadcast %1 : vector<1x128xf32> to vector<16x128xf32>
    %17 = arith.addf %15, %16 : vector<16x128xf32>
    %cst_12 = arith.constant 0.000000e+00 : f32
    %18 = vector.broadcast %cst_12 : f32 to vector<16x128xf32>
    %19 = arith.cmpf ogt, %17, %18 : vector<16x128xf32>
    %20 = math.exp %17 : vector<16x128xf32>
    %cst_13 = arith.constant 1.000000e+00 : f32
    %21 = vector.broadcast %cst_13 : f32 to vector<16x128xf32>
    %22 = arith.subf %20, %21 : vector<16x128xf32>
    %cst_14 = arith.constant 1.67326319 : f32
    %23 = vector.broadcast %cst_14 : f32 to vector<16x128xf32>
    %24 = arith.mulf %23, %22 : vector<16x128xf32>
    %25 = arith.select %19, %17, %24 : vector<16x128xi1>, vector<16x128xf32>
    %cst_15 = arith.constant 1.05070102 : f32
    %26 = vector.broadcast %cst_15 : f32 to vector<16x128xf32>
    %27 = arith.mulf %26, %25 : vector<16x128xf32>
    %28 = vector.broadcast %2 : vector<1x128xf32> to vector<16x128xf32>
    %29 = arith.mulf %27, %28 : vector<16x128xf32>
    %30 = arith.truncf %29 : vector<16x128xf32> to vector<16x128xbf16>
    %c16 = arith.constant 16 : index
    %c0_16 = arith.constant 0 : index
    %31 = vector.load %arg12[%c16, %c0_16] : memref<256x128xbf16, #tpu.memory_space<vmem>>, vector<16x128xbf16>
    tpu.vector_store %arg12[%c16, %c0_16], %30 {strides = array<i32>} : memref<256x128xbf16, #tpu.memory_space<vmem>>, vector<16x128xbf16>,
    %c1 = arith.constant 1 : index
    %c0_17 = arith.constant 0 : index
    %c0_18 = arith.constant 0 : index
    %32 = vector.load %arg1[%c1, %c0_17, %c0_18] : memref<14x16x120xbf16, #tpu.memory_space<vmem>>, vector<1x16x120xbf16>
    %33 = vector.shape_cast %32 : vector<1x16x120xbf16> to vector<16x120xbf16>
    %cst_19 = arith.constant dense<0.000000e+00> : vector<16x512xf32>
    %34 = tpu.matmul %33, %0, %cst_19 {dimension_numbers = #tpu.dot_dimension_numbers<[1], [0], [0], [1], [0, 0, 1, 1], [], []>} : vector<16x120xbf16>, vector<120x512xbf16>, vector<16x512xf32> -> vector<16x512xf32>
    %35 = vector.extract_strided_slice %34 {offsets = [0, 0], sizes = [16, 128], strides = [1, 1]} : vector<16x512xf32> to vector<16x128xf32>
    %36 = vector.extract_strided_slice %34 {offsets = [0, 128], sizes = [16, 128], strides = [1, 1]} : vector<16x512xf32> to vector<16x128xf32>
    %37 = arith.maximumf %35, %36 : vector<16x128xf32>
    %38 = vector.extract_strided_slice %34 {offsets = [0, 256], sizes = [16, 128], strides = [1, 1]} : vector<16x512xf32> to vector<16x128xf32>
    %39 = vector.extract_strided_slice %34 {offsets = [0, 384], sizes = [16, 128], strides = [1, 1]} : vector<16x512xf32> to vector<16x128xf32>
    %40 = arith.maximumf %38, %39 : vector<16x128xf32>
    %41 = arith.maximumf %37, %40 : vector<16x128xf32>
    %42 = vector.broadcast %1 : vector<1x128xf32> to vector<16x128xf32>
    %43 = arith.addf %41, %42 : vector<16x128xf32>
    %cst_20 = arith.constant 0.000000e+00 : f32
    %44 = vector.broadcast %cst_20 : f32 to vector<16x128xf32>
    %45 = arith.cmpf ogt, %43, %44 : vector<16x128xf32>
    %46 = math.exp %43 : vector<16x128xf32>
    %cst_21 = arith.constant 1.000000e+00 : f32
    %47 = vector.broadcast %cst_21 : f32 to vector<16x128xf32>
    %48 = arith.subf %46, %47 : vector<16x128xf32>
    %cst_22 = arith.constant 1.67326319 : f32
    %49 = vector.broadcast %cst_22 : f32 to vector<16x128xf32>
    %50 = arith.mulf %49, %48 : vector<16x128xf32>
    %51 = arith.select %45, %43, %50 : vector<16x128xi1>, vector<16x128xf32>
    %cst_23 = arith.constant 1.05070102 : f32
    %52 = vector.broadcast %cst_23 : f32 to vector<16x128xf32>
    %53 = arith.mulf %52, %51 : vector<16x128xf32>
    %54 = vector.broadcast %2 : vector<1x128xf32> to vector<16x128xf32>
    %55 = arith.mulf %53, %54 : vector<16x128xf32>
    %56 = arith.truncf %55 : vector<16x128xf32> to vector<16x128xbf16>
    %c32 = arith.constant 32 : index
    %c0_24 = arith.constant 0 : index
    %57 = vector.load %arg12[%c32, %c0_24] : memref<256x128xbf16, #tpu.memory_space<vmem>>, vector<16x128xbf16>
    tpu.vector_store %arg12[%c32, %c0_24], %56 {strides = array<i32>} : memref<256x128xbf16, #tpu.memory_space<vmem>>, vector<16x128xbf16>,
    %c2 = arith.constant 2 : index
    %c0_25 = arith.constant 0 : index
    %c0_26 = arith.constant 0 : index
    %58 = vector.load %arg1[%c2, %c0_25, %c0_26] : memref<14x16x120xbf16, #tpu.memory_space<vmem>>, vector<1x16x120xbf16>
    %59 = vector.shape_cast %58 : vector<1x16x120xbf16> to vector<16x120xbf16>
    %cst_27 = arith.constant dense<0.000000e+00> : vector<16x512xf32>
    %60 = tpu.matmul %59, %0, %cst_27 {dimension_numbers = #tpu.dot_dimension_numbers<[1], [0], [0], [1], [0, 0, 1, 1], [], []>} : vector<16x120xbf16>, vector<120x512xbf16>, vector<16x512xf32> -> vector<16x512xf32>
    %61 = vector.extract_strided_slice %60 {offsets = [0, 0], sizes = [16, 128], strides = [1, 1]} : vector<16x512xf32> to vector<16x128xf32>
    %62 = vector.extract_strided_slice %60 {offsets = [0, 128], sizes = [16, 128], strides = [1, 1]} : vector<16x512xf32> to vector<16x128xf32>
    %63 = arith.maximumf %61, %62 : vector<16x128xf32>
    %64 = vector.extract_strided_slice %60 {offsets = [0, 256], sizes = [16, 128], strides = [1, 1]} : vector<16x512xf32> to vector<16x128xf32>
    %65 = vector.extract_strided_slice %60 {offsets = [0, 384], sizes = [16, 128], strides = [1, 1]} : vector<16x512xf32> to vector<16x128xf32>
    %66 = arith.maximumf %64, %65 : vector<16x128xf32>
    %67 = arith.maximumf %63, %66 : vector<16x128xf32>
    %68 = vector.broadcast %1 : vector<1x128xf32> to vector<16x128xf32>
    %69 = arith.addf %67, %68 : vector<16x128xf32>
    %cst_28 = arith.constant 0.000000e+00 : f32
    %70 = vector.broadcast %cst_28 : f32 to vector<16x128xf32>
    %71 = arith.cmpf ogt, %69, %70 : vector<16x128xf32>
    %72 = math.exp %69 : vector<16x128xf32>
    %cst_29 = arith.constant 1.000000e+00 : f32
    %73 = vector.broadcast %cst_29 : f32 to vector<16x128xf32>
    %74 = arith.subf %72, %73 : vector<16x128xf32>
    %cst_30 = arith.constant 1.67326319 : f32
    %75 = vector.broadcast %cst_30 : f32 to vector<16x128xf32>
    %76 = arith.mulf %75, %74 : vector<16x128xf32>
    %77 = arith.select %71, %69, %76 : vector<16x128xi1>, vector<16x128xf32>
    %cst_31 = arith.constant 1.05070102 : f32
    %78 = vector.broadcast %cst_31 : f32 to vector<16x128xf32>
    %79 = arith.mulf %78, %77 : vector<16x128xf32>
    %80 = vector.broadcast %2 : vector<1x128xf32> to vector<16x128xf32>
    %81 = arith.mulf %79, %80 : vector<16x128xf32>
    %82 = arith.truncf %81 : vector<16x128xf32> to vector<16x128xbf16>
    %c48 = arith.constant 48 : index
    %c0_32 = arith.constant 0 : index
    %83 = vector.load %arg12[%c48, %c0_32] : memref<256x128xbf16, #tpu.memory_space<vmem>>, vector<16x128xbf16>
    tpu.vector_store %arg12[%c48, %c0_32], %82 {strides = array<i32>} : memref<256x128xbf16, #tpu.memory_space<vmem>>, vector<16x128xbf16>,
    %c3 = arith.constant 3 : index
    %c0_33 = arith.constant 0 : index
    %c0_34 = arith.constant 0 : index
    %84 = vector.load %arg1[%c3, %c0_33, %c0_34] : memref<14x16x120xbf16, #tpu.memory_space<vmem>>, vector<1x16x120xbf16>
    %85 = vector.shape_cast %84 : vector<1x16x120xbf16> to vector<16x120xbf16>
    %cst_35 = arith.constant dense<0.000000e+00> : vector<16x512xf32>
    %86 = tpu.matmul %85, %0, %cst_35 {dimension_numbers = #tpu.dot_dimension_numbers<[1], [0], [0], [1], [0, 0, 1, 1], [], []>} : vector<16x120xbf16>, vector<120x512xbf16>, vector<16x512xf32> -> vector<16x512xf32>
    %87 = vector.extract_strided_slice %86 {offsets = [0, 0], sizes = [16, 128], strides = [1, 1]} : vector<16x512xf32> to vector<16x128xf32>
    %88 = vector.extract_strided_slice %86 {offsets = [0, 128], sizes = [16, 128], strides = [1, 1]} : vector<16x512xf32> to vector<16x128xf32>
    %89 = arith.maximumf %87, %88 : vector<16x128xf32>
    %90 = vector.extract_strided_slice %86 {offsets = [0, 256], sizes = [16, 128], strides = [1, 1]} : vector<16x512xf32> to vector<16x128xf32>
    %91 = vector.extract_strided_slice %86 {offsets = [0, 384], sizes = [16, 128], strides = [1, 1]} : vector<16x512xf32> to vector<16x128xf32>
    %92 = arith.maximumf %90, %91 : vector<16x128xf32>
    %93 = arith.maximumf %89, %92 : vector<16x128xf32>
    %94 = vector.broadcast %1 : vector<1x128xf32> to vector<16x128xf32>
    %95 = arith.addf %93, %94 : vector<16x128xf32>
    %cst_36 = arith.constant 0.000000e+00 : f32
    %96 = vector.broadcast %cst_36 : f32 to vector<16x128xf32>
    %97 = arith.cmpf ogt, %95, %96 : vector<16x128xf32>
    %98 = math.exp %95 : vector<16x128xf32>
    %cst_37 = arith.constant 1.000000e+00 : f32
    %99 = vector.broadcast %cst_37 : f32 to vector<16x128xf32>
    %100 = arith.subf %98, %99 : vector<16x128xf32>
    %cst_38 = arith.constant 1.67326319 : f32
    %101 = vector.broadcast %cst_38 : f32 to vector<16x128xf32>
    %102 = arith.mulf %101, %100 : vector<16x128xf32>
    %103 = arith.select %97, %95, %102 : vector<16x128xi1>, vector<16x128xf32>
    %cst_39 = arith.constant 1.05070102 : f32
    %104 = vector.broadcast %cst_39 : f32 to vector<16x128xf32>
    %105 = arith.mulf %104, %103 : vector<16x128xf32>
    %106 = vector.broadcast %2 : vector<1x128xf32> to vector<16x128xf32>
    %107 = arith.mulf %105, %106 : vector<16x128xf32>
    %108 = arith.truncf %107 : vector<16x128xf32> to vector<16x128xbf16>
    %c64 = arith.constant 64 : index
    %c0_40 = arith.constant 0 : index
    %109 = vector.load %arg12[%c64, %c0_40] : memref<256x128xbf16, #tpu.memory_space<vmem>>, vector<16x128xbf16>
    tpu.vector_store %arg12[%c64, %c0_40], %108 {strides = array<i32>} : memref<256x128xbf16, #tpu.memory_space<vmem>>, vector<16x128xbf16>,
    %c4 = arith.constant 4 : index
    %c0_41 = arith.constant 0 : index
    %c0_42 = arith.constant 0 : index
    %110 = vector.load %arg1[%c4, %c0_41, %c0_42] : memref<14x16x120xbf16, #tpu.memory_space<vmem>>, vector<1x16x120xbf16>
    %111 = vector.shape_cast %110 : vector<1x16x120xbf16> to vector<16x120xbf16>
    %cst_43 = arith.constant dense<0.000000e+00> : vector<16x512xf32>
    %112 = tpu.matmul %111, %0, %cst_43 {dimension_numbers = #tpu.dot_dimension_numbers<[1], [0], [0], [1], [0, 0, 1, 1], [], []>} : vector<16x120xbf16>, vector<120x512xbf16>, vector<16x512xf32> -> vector<16x512xf32>
    %113 = vector.extract_strided_slice %112 {offsets = [0, 0], sizes = [16, 128], strides = [1, 1]} : vector<16x512xf32> to vector<16x128xf32>
    %114 = vector.extract_strided_slice %112 {offsets = [0, 128], sizes = [16, 128], strides = [1, 1]} : vector<16x512xf32> to vector<16x128xf32>
    %115 = arith.maximumf %113, %114 : vector<16x128xf32>
    %116 = vector.extract_strided_slice %112 {offsets = [0, 256], sizes = [16, 128], strides = [1, 1]} : vector<16x512xf32> to vector<16x128xf32>
    %117 = vector.extract_strided_slice %112 {offsets = [0, 384], sizes = [16, 128], strides = [1, 1]} : vector<16x512xf32> to vector<16x128xf32>
    %118 = arith.maximumf %116, %117 : vector<16x128xf32>
    %119 = arith.maximumf %115, %118 : vector<16x128xf32>
    %120 = vector.broadcast %1 : vector<1x128xf32> to vector<16x128xf32>
    %121 = arith.addf %119, %120 : vector<16x128xf32>
    %cst_44 = arith.constant 0.000000e+00 : f32
    %122 = vector.broadcast %cst_44 : f32 to vector<16x128xf32>
    %123 = arith.cmpf ogt, %121, %122 : vector<16x128xf32>
    %124 = math.exp %121 : vector<16x128xf32>
    %cst_45 = arith.constant 1.000000e+00 : f32
    %125 = vector.broadcast %cst_45 : f32 to vector<16x128xf32>
    %126 = arith.subf %124, %125 : vector<16x128xf32>
    %cst_46 = arith.constant 1.67326319 : f32
    %127 = vector.broadcast %cst_46 : f32 to vector<16x128xf32>
    %128 = arith.mulf %127, %126 : vector<16x128xf32>
    %129 = arith.select %123, %121, %128 : vector<16x128xi1>, vector<16x128xf32>
    %cst_47 = arith.constant 1.05070102 : f32
    %130 = vector.broadcast %cst_47 : f32 to vector<16x128xf32>
    %131 = arith.mulf %130, %129 : vector<16x128xf32>
    %132 = vector.broadcast %2 : vector<1x128xf32> to vector<16x128xf32>
    %133 = arith.mulf %131, %132 : vector<16x128xf32>
    %134 = arith.truncf %133 : vector<16x128xf32> to vector<16x128xbf16>
    %c80 = arith.constant 80 : index
    %c0_48 = arith.constant 0 : index
    %135 = vector.load %arg12[%c80, %c0_48] : memref<256x128xbf16, #tpu.memory_space<vmem>>, vector<16x128xbf16>
    tpu.vector_store %arg12[%c80, %c0_48], %134 {strides = array<i32>} : memref<256x128xbf16, #tpu.memory_space<vmem>>, vector<16x128xbf16>,
    %c5 = arith.constant 5 : index
    %c0_49 = arith.constant 0 : index
    %c0_50 = arith.constant 0 : index
    %136 = vector.load %arg1[%c5, %c0_49, %c0_50] : memref<14x16x120xbf16, #tpu.memory_space<vmem>>, vector<1x16x120xbf16>
    %137 = vector.shape_cast %136 : vector<1x16x120xbf16> to vector<16x120xbf16>
    %cst_51 = arith.constant dense<0.000000e+00> : vector<16x512xf32>
    %138 = tpu.matmul %137, %0, %cst_51 {dimension_numbers = #tpu.dot_dimension_numbers<[1], [0], [0], [1], [0, 0, 1, 1], [], []>} : vector<16x120xbf16>, vector<120x512xbf16>, vector<16x512xf32> -> vector<16x512xf32>
    %139 = vector.extract_strided_slice %138 {offsets = [0, 0], sizes = [16, 128], strides = [1, 1]} : vector<16x512xf32> to vector<16x128xf32>
    %140 = vector.extract_strided_slice %138 {offsets = [0, 128], sizes = [16, 128], strides = [1, 1]} : vector<16x512xf32> to vector<16x128xf32>
    %141 = arith.maximumf %139, %140 : vector<16x128xf32>
    %142 = vector.extract_strided_slice %138 {offsets = [0, 256], sizes = [16, 128], strides = [1, 1]} : vector<16x512xf32> to vector<16x128xf32>
    %143 = vector.extract_strided_slice %138 {offsets = [0, 384], sizes = [16, 128], strides = [1, 1]} : vector<16x512xf32> to vector<16x128xf32>
    %144 = arith.maximumf %142, %143 : vector<16x128xf32>
    %145 = arith.maximumf %141, %144 : vector<16x128xf32>
    %146 = vector.broadcast %1 : vector<1x128xf32> to vector<16x128xf32>
    %147 = arith.addf %145, %146 : vector<16x128xf32>
    %cst_52 = arith.constant 0.000000e+00 : f32
    %148 = vector.broadcast %cst_52 : f32 to vector<16x128xf32>
    %149 = arith.cmpf ogt, %147, %148 : vector<16x128xf32>
    %150 = math.exp %147 : vector<16x128xf32>
    %cst_53 = arith.constant 1.000000e+00 : f32
    %151 = vector.broadcast %cst_53 : f32 to vector<16x128xf32>
    %152 = arith.subf %150, %151 : vector<16x128xf32>
    %cst_54 = arith.constant 1.67326319 : f32
    %153 = vector.broadcast %cst_54 : f32 to vector<16x128xf32>
    %154 = arith.mulf %153, %152 : vector<16x128xf32>
    %155 = arith.select %149, %147, %154 : vector<16x128xi1>, vector<16x128xf32>
    %cst_55 = arith.constant 1.05070102 : f32
    %156 = vector.broadcast %cst_55 : f32 to vector<16x128xf32>
    %157 = arith.mulf %156, %155 : vector<16x128xf32>
    %158 = vector.broadcast %2 : vector<1x128xf32> to vector<16x128xf32>
    %159 = arith.mulf %157, %158 : vector<16x128xf32>
    %160 = arith.truncf %159 : vector<16x128xf32> to vector<16x128xbf16>
    %c96 = arith.constant 96 : index
    %c0_56 = arith.constant 0 : index
    %161 = vector.load %arg12[%c96, %c0_56] : memref<256x128xbf16, #tpu.memory_space<vmem>>, vector<16x128xbf16>
    tpu.vector_store %arg12[%c96, %c0_56], %160 {strides = array<i32>} : memref<256x128xbf16, #tpu.memory_space<vmem>>, vector<16x128xbf16>,
    %c6 = arith.constant 6 : index
    %c0_57 = arith.constant 0 : index
    %c0_58 = arith.constant 0 : index
    %162 = vector.load %arg1[%c6, %c0_57, %c0_58] : memref<14x16x120xbf16, #tpu.memory_space<vmem>>, vector<1x16x120xbf16>
    %163 = vector.shape_cast %162 : vector<1x16x120xbf16> to vector<16x120xbf16>
    %cst_59 = arith.constant dense<0.000000e+00> : vector<16x512xf32>
    %164 = tpu.matmul %163, %0, %cst_59 {dimension_numbers = #tpu.dot_dimension_numbers<[1], [0], [0], [1], [0, 0, 1, 1], [], []>} : vector<16x120xbf16>, vector<120x512xbf16>, vector<16x512xf32> -> vector<16x512xf32>
    %165 = vector.extract_strided_slice %164 {offsets = [0, 0], sizes = [16, 128], strides = [1, 1]} : vector<16x512xf32> to vector<16x128xf32>
    %166 = vector.extract_strided_slice %164 {offsets = [0, 128], sizes = [16, 128], strides = [1, 1]} : vector<16x512xf32> to vector<16x128xf32>
    %167 = arith.maximumf %165, %166 : vector<16x128xf32>
    %168 = vector.extract_strided_slice %164 {offsets = [0, 256], sizes = [16, 128], strides = [1, 1]} : vector<16x512xf32> to vector<16x128xf32>
    %169 = vector.extract_strided_slice %164 {offsets = [0, 384], sizes = [16, 128], strides = [1, 1]} : vector<16x512xf32> to vector<16x128xf32>
    %170 = arith.maximumf %168, %169 : vector<16x128xf32>
    %171 = arith.maximumf %167, %170 : vector<16x128xf32>
    %172 = vector.broadcast %1 : vector<1x128xf32> to vector<16x128xf32>
    %173 = arith.addf %171, %172 : vector<16x128xf32>
    %cst_60 = arith.constant 0.000000e+00 : f32
    %174 = vector.broadcast %cst_60 : f32 to vector<16x128xf32>
    %175 = arith.cmpf ogt, %173, %174 : vector<16x128xf32>
    %176 = math.exp %173 : vector<16x128xf32>
    %cst_61 = arith.constant 1.000000e+00 : f32
    %177 = vector.broadcast %cst_61 : f32 to vector<16x128xf32>
    %178 = arith.subf %176, %177 : vector<16x128xf32>
    %cst_62 = arith.constant 1.67326319 : f32
    %179 = vector.broadcast %cst_62 : f32 to vector<16x128xf32>
    %180 = arith.mulf %179, %178 : vector<16x128xf32>
    %181 = arith.select %175, %173, %180 : vector<16x128xi1>, vector<16x128xf32>
    %cst_63 = arith.constant 1.05070102 : f32
    %182 = vector.broadcast %cst_63 : f32 to vector<16x128xf32>
    %183 = arith.mulf %182, %181 : vector<16x128xf32>
    %184 = vector.broadcast %2 : vector<1x128xf32> to vector<16x128xf32>
    %185 = arith.mulf %183, %184 : vector<16x128xf32>
    %186 = arith.truncf %185 : vector<16x128xf32> to vector<16x128xbf16>
    %c112 = arith.constant 112 : index
    %c0_64 = arith.constant 0 : index
    %187 = vector.load %arg12[%c112, %c0_64] : memref<256x128xbf16, #tpu.memory_space<vmem>>, vector<16x128xbf16>
    tpu.vector_store %arg12[%c112, %c0_64], %186 {strides = array<i32>} : memref<256x128xbf16, #tpu.memory_space<vmem>>, vector<16x128xbf16>,
    %c7 = arith.constant 7 : index
    %c0_65 = arith.constant 0 : index
    %c0_66 = arith.constant 0 : index
    %188 = vector.load %arg1[%c7, %c0_65, %c0_66] : memref<14x16x120xbf16, #tpu.memory_space<vmem>>, vector<1x16x120xbf16>
    %189 = vector.shape_cast %188 : vector<1x16x120xbf16> to vector<16x120xbf16>
    %cst_67 = arith.constant dense<0.000000e+00> : vector<16x512xf32>
    %190 = tpu.matmul %189, %0, %cst_67 {dimension_numbers = #tpu.dot_dimension_numbers<[1], [0], [0], [1], [0, 0, 1, 1], [], []>} : vector<16x120xbf16>, vector<120x512xbf16>, vector<16x512xf32> -> vector<16x512xf32>
    %191 = vector.extract_strided_slice %190 {offsets = [0, 0], sizes = [16, 128], strides = [1, 1]} : vector<16x512xf32> to vector<16x128xf32>
    %192 = vector.extract_strided_slice %190 {offsets = [0, 128], sizes = [16, 128], strides = [1, 1]} : vector<16x512xf32> to vector<16x128xf32>
    %193 = arith.maximumf %191, %192 : vector<16x128xf32>
    %194 = vector.extract_strided_slice %190 {offsets = [0, 256], sizes = [16, 128], strides = [1, 1]} : vector<16x512xf32> to vector<16x128xf32>
    %195 = vector.extract_strided_slice %190 {offsets = [0, 384], sizes = [16, 128], strides = [1, 1]} : vector<16x512xf32> to vector<16x128xf32>
    %196 = arith.maximumf %194, %195 : vector<16x128xf32>
    %197 = arith.maximumf %193, %196 : vector<16x128xf32>
    %198 = vector.broadcast %1 : vector<1x128xf32> to vector<16x128xf32>
    %199 = arith.addf %197, %198 : vector<16x128xf32>
    %cst_68 = arith.constant 0.000000e+00 : f32
    %200 = vector.broadcast %cst_68 : f32 to vector<16x128xf32>
    %201 = arith.cmpf ogt, %199, %200 : vector<16x128xf32>
    %202 = math.exp %199 : vector<16x128xf32>
    %cst_69 = arith.constant 1.000000e+00 : f32
    %203 = vector.broadcast %cst_69 : f32 to vector<16x128xf32>
    %204 = arith.subf %202, %203 : vector<16x128xf32>
    %cst_70 = arith.constant 1.67326319 : f32
    %205 = vector.broadcast %cst_70 : f32 to vector<16x128xf32>
    %206 = arith.mulf %205, %204 : vector<16x128xf32>
    %207 = arith.select %201, %199, %206 : vector<16x128xi1>, vector<16x128xf32>
    %cst_71 = arith.constant 1.05070102 : f32
    %208 = vector.broadcast %cst_71 : f32 to vector<16x128xf32>
    %209 = arith.mulf %208, %207 : vector<16x128xf32>
    %210 = vector.broadcast %2 : vector<1x128xf32> to vector<16x128xf32>
    %211 = arith.mulf %209, %210 : vector<16x128xf32>
    %212 = arith.truncf %211 : vector<16x128xf32> to vector<16x128xbf16>
    %c128 = arith.constant 128 : index
    %c0_72 = arith.constant 0 : index
    %213 = vector.load %arg12[%c128, %c0_72] : memref<256x128xbf16, #tpu.memory_space<vmem>>, vector<16x128xbf16>
    tpu.vector_store %arg12[%c128, %c0_72], %212 {strides = array<i32>} : memref<256x128xbf16, #tpu.memory_space<vmem>>, vector<16x128xbf16>,
    %c8 = arith.constant 8 : index
    %c0_73 = arith.constant 0 : index
    %c0_74 = arith.constant 0 : index
    %214 = vector.load %arg1[%c8, %c0_73, %c0_74] : memref<14x16x120xbf16, #tpu.memory_space<vmem>>, vector<1x16x120xbf16>
    %215 = vector.shape_cast %214 : vector<1x16x120xbf16> to vector<16x120xbf16>
    %cst_75 = arith.constant dense<0.000000e+00> : vector<16x512xf32>
    %216 = tpu.matmul %215, %0, %cst_75 {dimension_numbers = #tpu.dot_dimension_numbers<[1], [0], [0], [1], [0, 0, 1, 1], [], []>} : vector<16x120xbf16>, vector<120x512xbf16>, vector<16x512xf32> -> vector<16x512xf32>
    %217 = vector.extract_strided_slice %216 {offsets = [0, 0], sizes = [16, 128], strides = [1, 1]} : vector<16x512xf32> to vector<16x128xf32>
    %218 = vector.extract_strided_slice %216 {offsets = [0, 128], sizes = [16, 128], strides = [1, 1]} : vector<16x512xf32> to vector<16x128xf32>
    %219 = arith.maximumf %217, %218 : vector<16x128xf32>
    %220 = vector.extract_strided_slice %216 {offsets = [0, 256], sizes = [16, 128], strides = [1, 1]} : vector<16x512xf32> to vector<16x128xf32>
    %221 = vector.extract_strided_slice %216 {offsets = [0, 384], sizes = [16, 128], strides = [1, 1]} : vector<16x512xf32> to vector<16x128xf32>
    %222 = arith.maximumf %220, %221 : vector<16x128xf32>
    %223 = arith.maximumf %219, %222 : vector<16x128xf32>
    %224 = vector.broadcast %1 : vector<1x128xf32> to vector<16x128xf32>
    %225 = arith.addf %223, %224 : vector<16x128xf32>
    %cst_76 = arith.constant 0.000000e+00 : f32
    %226 = vector.broadcast %cst_76 : f32 to vector<16x128xf32>
    %227 = arith.cmpf ogt, %225, %226 : vector<16x128xf32>
    %228 = math.exp %225 : vector<16x128xf32>
    %cst_77 = arith.constant 1.000000e+00 : f32
    %229 = vector.broadcast %cst_77 : f32 to vector<16x128xf32>
    %230 = arith.subf %228, %229 : vector<16x128xf32>
    %cst_78 = arith.constant 1.67326319 : f32
    %231 = vector.broadcast %cst_78 : f32 to vector<16x128xf32>
    %232 = arith.mulf %231, %230 : vector<16x128xf32>
    %233 = arith.select %227, %225, %232 : vector<16x128xi1>, vector<16x128xf32>
    %cst_79 = arith.constant 1.05070102 : f32
    %234 = vector.broadcast %cst_79 : f32 to vector<16x128xf32>
    %235 = arith.mulf %234, %233 : vector<16x128xf32>
    %236 = vector.broadcast %2 : vector<1x128xf32> to vector<16x128xf32>
    %237 = arith.mulf %235, %236 : vector<16x128xf32>
    %238 = arith.truncf %237 : vector<16x128xf32> to vector<16x128xbf16>
    %c144 = arith.constant 144 : index
    %c0_80 = arith.constant 0 : index
    %239 = vector.load %arg12[%c144, %c0_80] : memref<256x128xbf16, #tpu.memory_space<vmem>>, vector<16x128xbf16>
    tpu.vector_store %arg12[%c144, %c0_80], %238 {strides = array<i32>} : memref<256x128xbf16, #tpu.memory_space<vmem>>, vector<16x128xbf16>,
    %c9 = arith.constant 9 : index
    %c0_81 = arith.constant 0 : index
    %c0_82 = arith.constant 0 : index
    %240 = vector.load %arg1[%c9, %c0_81, %c0_82] : memref<14x16x120xbf16, #tpu.memory_space<vmem>>, vector<1x16x120xbf16>
    %241 = vector.shape_cast %240 : vector<1x16x120xbf16> to vector<16x120xbf16>
    %cst_83 = arith.constant dense<0.000000e+00> : vector<16x512xf32>
    %242 = tpu.matmul %241, %0, %cst_83 {dimension_numbers = #tpu.dot_dimension_numbers<[1], [0], [0], [1], [0, 0, 1, 1], [], []>} : vector<16x120xbf16>, vector<120x512xbf16>, vector<16x512xf32> -> vector<16x512xf32>
    %243 = vector.extract_strided_slice %242 {offsets = [0, 0], sizes = [16, 128], strides = [1, 1]} : vector<16x512xf32> to vector<16x128xf32>
    %244 = vector.extract_strided_slice %242 {offsets = [0, 128], sizes = [16, 128], strides = [1, 1]} : vector<16x512xf32> to vector<16x128xf32>
    %245 = arith.maximumf %243, %244 : vector<16x128xf32>
    %246 = vector.extract_strided_slice %242 {offsets = [0, 256], sizes = [16, 128], strides = [1, 1]} : vector<16x512xf32> to vector<16x128xf32>
    %247 = vector.extract_strided_slice %242 {offsets = [0, 384], sizes = [16, 128], strides = [1, 1]} : vector<16x512xf32> to vector<16x128xf32>
    %248 = arith.maximumf %246, %247 : vector<16x128xf32>
    %249 = arith.maximumf %245, %248 : vector<16x128xf32>
    %250 = vector.broadcast %1 : vector<1x128xf32> to vector<16x128xf32>
    %251 = arith.addf %249, %250 : vector<16x128xf32>
    %cst_84 = arith.constant 0.000000e+00 : f32
    %252 = vector.broadcast %cst_84 : f32 to vector<16x128xf32>
    %253 = arith.cmpf ogt, %251, %252 : vector<16x128xf32>
    %254 = math.exp %251 : vector<16x128xf32>
    %cst_85 = arith.constant 1.000000e+00 : f32
    %255 = vector.broadcast %cst_85 : f32 to vector<16x128xf32>
    %256 = arith.subf %254, %255 : vector<16x128xf32>
    %cst_86 = arith.constant 1.67326319 : f32
    %257 = vector.broadcast %cst_86 : f32 to vector<16x128xf32>
    %258 = arith.mulf %257, %256 : vector<16x128xf32>
    %259 = arith.select %253, %251, %258 : vector<16x128xi1>, vector<16x128xf32>
    %cst_87 = arith.constant 1.05070102 : f32
    %260 = vector.broadcast %cst_87 : f32 to vector<16x128xf32>
    %261 = arith.mulf %260, %259 : vector<16x128xf32>
    %262 = vector.broadcast %2 : vector<1x128xf32> to vector<16x128xf32>
    %263 = arith.mulf %261, %262 : vector<16x128xf32>
    %264 = arith.truncf %263 : vector<16x128xf32> to vector<16x128xbf16>
    %c160 = arith.constant 160 : index
    %c0_88 = arith.constant 0 : index
    %265 = vector.load %arg12[%c160, %c0_88] : memref<256x128xbf16, #tpu.memory_space<vmem>>, vector<16x128xbf16>
    tpu.vector_store %arg12[%c160, %c0_88], %264 {strides = array<i32>} : memref<256x128xbf16, #tpu.memory_space<vmem>>, vector<16x128xbf16>,
    %c10 = arith.constant 10 : index
    %c0_89 = arith.constant 0 : index
    %c0_90 = arith.constant 0 : index
    %266 = vector.load %arg1[%c10, %c0_89, %c0_90] : memref<14x16x120xbf16, #tpu.memory_space<vmem>>, vector<1x16x120xbf16>
    %267 = vector.shape_cast %266 : vector<1x16x120xbf16> to vector<16x120xbf16>
    %cst_91 = arith.constant dense<0.000000e+00> : vector<16x512xf32>
    %268 = tpu.matmul %267, %0, %cst_91 {dimension_numbers = #tpu.dot_dimension_numbers<[1], [0], [0], [1], [0, 0, 1, 1], [], []>} : vector<16x120xbf16>, vector<120x512xbf16>, vector<16x512xf32> -> vector<16x512xf32>
    %269 = vector.extract_strided_slice %268 {offsets = [0, 0], sizes = [16, 128], strides = [1, 1]} : vector<16x512xf32> to vector<16x128xf32>
    %270 = vector.extract_strided_slice %268 {offsets = [0, 128], sizes = [16, 128], strides = [1, 1]} : vector<16x512xf32> to vector<16x128xf32>
    %271 = arith.maximumf %269, %270 : vector<16x128xf32>
    %272 = vector.extract_strided_slice %268 {offsets = [0, 256], sizes = [16, 128], strides = [1, 1]} : vector<16x512xf32> to vector<16x128xf32>
    %273 = vector.extract_strided_slice %268 {offsets = [0, 384], sizes = [16, 128], strides = [1, 1]} : vector<16x512xf32> to vector<16x128xf32>
    %274 = arith.maximumf %272, %273 : vector<16x128xf32>
    %275 = arith.maximumf %271, %274 : vector<16x128xf32>
    %276 = vector.broadcast %1 : vector<1x128xf32> to vector<16x128xf32>
    %277 = arith.addf %275, %276 : vector<16x128xf32>
    %cst_92 = arith.constant 0.000000e+00 : f32
    %278 = vector.broadcast %cst_92 : f32 to vector<16x128xf32>
    %279 = arith.cmpf ogt, %277, %278 : vector<16x128xf32>
    %280 = math.exp %277 : vector<16x128xf32>
    %cst_93 = arith.constant 1.000000e+00 : f32
    %281 = vector.broadcast %cst_93 : f32 to vector<16x128xf32>
    %282 = arith.subf %280, %281 : vector<16x128xf32>
    %cst_94 = arith.constant 1.67326319 : f32
    %283 = vector.broadcast %cst_94 : f32 to vector<16x128xf32>
    %284 = arith.mulf %283, %282 : vector<16x128xf32>
    %285 = arith.select %279, %277, %284 : vector<16x128xi1>, vector<16x128xf32>
    %cst_95 = arith.constant 1.05070102 : f32
    %286 = vector.broadcast %cst_95 : f32 to vector<16x128xf32>
    %287 = arith.mulf %286, %285 : vector<16x128xf32>
    %288 = vector.broadcast %2 : vector<1x128xf32> to vector<16x128xf32>
    %289 = arith.mulf %287, %288 : vector<16x128xf32>
    %290 = arith.truncf %289 : vector<16x128xf32> to vector<16x128xbf16>
    %c176 = arith.constant 176 : index
    %c0_96 = arith.constant 0 : index
    %291 = vector.load %arg12[%c176, %c0_96] : memref<256x128xbf16, #tpu.memory_space<vmem>>, vector<16x128xbf16>
    tpu.vector_store %arg12[%c176, %c0_96], %290 {strides = array<i32>} : memref<256x128xbf16, #tpu.memory_space<vmem>>, vector<16x128xbf16>,
    %c11 = arith.constant 11 : index
    %c0_97 = arith.constant 0 : index
    %c0_98 = arith.constant 0 : index
    %292 = vector.load %arg1[%c11, %c0_97, %c0_98] : memref<14x16x120xbf16, #tpu.memory_space<vmem>>, vector<1x16x120xbf16>
    %293 = vector.shape_cast %292 : vector<1x16x120xbf16> to vector<16x120xbf16>
    %cst_99 = arith.constant dense<0.000000e+00> : vector<16x512xf32>
    %294 = tpu.matmul %293, %0, %cst_99 {dimension_numbers = #tpu.dot_dimension_numbers<[1], [0], [0], [1], [0, 0, 1, 1], [], []>} : vector<16x120xbf16>, vector<120x512xbf16>, vector<16x512xf32> -> vector<16x512xf32>
    %295 = vector.extract_strided_slice %294 {offsets = [0, 0], sizes = [16, 128], strides = [1, 1]} : vector<16x512xf32> to vector<16x128xf32>
    %296 = vector.extract_strided_slice %294 {offsets = [0, 128], sizes = [16, 128], strides = [1, 1]} : vector<16x512xf32> to vector<16x128xf32>
    %297 = arith.maximumf %295, %296 : vector<16x128xf32>
    %298 = vector.extract_strided_slice %294 {offsets = [0, 256], sizes = [16, 128], strides = [1, 1]} : vector<16x512xf32> to vector<16x128xf32>
    %299 = vector.extract_strided_slice %294 {offsets = [0, 384], sizes = [16, 128], strides = [1, 1]} : vector<16x512xf32> to vector<16x128xf32>
    %300 = arith.maximumf %298, %299 : vector<16x128xf32>
    %301 = arith.maximumf %297, %300 : vector<16x128xf32>
    %302 = vector.broadcast %1 : vector<1x128xf32> to vector<16x128xf32>
    %303 = arith.addf %301, %302 : vector<16x128xf32>
    %cst_100 = arith.constant 0.000000e+00 : f32
    %304 = vector.broadcast %cst_100 : f32 to vector<16x128xf32>
    %305 = arith.cmpf ogt, %303, %304 : vector<16x128xf32>
    %306 = math.exp %303 : vector<16x128xf32>
    %cst_101 = arith.constant 1.000000e+00 : f32
    %307 = vector.broadcast %cst_101 : f32 to vector<16x128xf32>
    %308 = arith.subf %306, %307 : vector<16x128xf32>
    %cst_102 = arith.constant 1.67326319 : f32
    %309 = vector.broadcast %cst_102 : f32 to vector<16x128xf32>
    %310 = arith.mulf %309, %308 : vector<16x128xf32>
    %311 = arith.select %305, %303, %310 : vector<16x128xi1>, vector<16x128xf32>
    %cst_103 = arith.constant 1.05070102 : f32
    %312 = vector.broadcast %cst_103 : f32 to vector<16x128xf32>
    %313 = arith.mulf %312, %311 : vector<16x128xf32>
    %314 = vector.broadcast %2 : vector<1x128xf32> to vector<16x128xf32>
    %315 = arith.mulf %313, %314 : vector<16x128xf32>
    %316 = arith.truncf %315 : vector<16x128xf32> to vector<16x128xbf16>
    %c192 = arith.constant 192 : index
    %c0_104 = arith.constant 0 : index
    %317 = vector.load %arg12[%c192, %c0_104] : memref<256x128xbf16, #tpu.memory_space<vmem>>, vector<16x128xbf16>
    tpu.vector_store %arg12[%c192, %c0_104], %316 {strides = array<i32>} : memref<256x128xbf16, #tpu.memory_space<vmem>>, vector<16x128xbf16>,
    %c12 = arith.constant 12 : index
    %c0_105 = arith.constant 0 : index
    %c0_106 = arith.constant 0 : index
    %318 = vector.load %arg1[%c12, %c0_105, %c0_106] : memref<14x16x120xbf16, #tpu.memory_space<vmem>>, vector<1x16x120xbf16>
    %319 = vector.shape_cast %318 : vector<1x16x120xbf16> to vector<16x120xbf16>
    %cst_107 = arith.constant dense<0.000000e+00> : vector<16x512xf32>
    %320 = tpu.matmul %319, %0, %cst_107 {dimension_numbers = #tpu.dot_dimension_numbers<[1], [0], [0], [1], [0, 0, 1, 1], [], []>} : vector<16x120xbf16>, vector<120x512xbf16>, vector<16x512xf32> -> vector<16x512xf32>
    %321 = vector.extract_strided_slice %320 {offsets = [0, 0], sizes = [16, 128], strides = [1, 1]} : vector<16x512xf32> to vector<16x128xf32>
    %322 = vector.extract_strided_slice %320 {offsets = [0, 128], sizes = [16, 128], strides = [1, 1]} : vector<16x512xf32> to vector<16x128xf32>
    %323 = arith.maximumf %321, %322 : vector<16x128xf32>
    %324 = vector.extract_strided_slice %320 {offsets = [0, 256], sizes = [16, 128], strides = [1, 1]} : vector<16x512xf32> to vector<16x128xf32>
    %325 = vector.extract_strided_slice %320 {offsets = [0, 384], sizes = [16, 128], strides = [1, 1]} : vector<16x512xf32> to vector<16x128xf32>
    %326 = arith.maximumf %324, %325 : vector<16x128xf32>
    %327 = arith.maximumf %323, %326 : vector<16x128xf32>
    %328 = vector.broadcast %1 : vector<1x128xf32> to vector<16x128xf32>
    %329 = arith.addf %327, %328 : vector<16x128xf32>
    %cst_108 = arith.constant 0.000000e+00 : f32
    %330 = vector.broadcast %cst_108 : f32 to vector<16x128xf32>
    %331 = arith.cmpf ogt, %329, %330 : vector<16x128xf32>
    %332 = math.exp %329 : vector<16x128xf32>
    %cst_109 = arith.constant 1.000000e+00 : f32
    %333 = vector.broadcast %cst_109 : f32 to vector<16x128xf32>
    %334 = arith.subf %332, %333 : vector<16x128xf32>
    %cst_110 = arith.constant 1.67326319 : f32
    %335 = vector.broadcast %cst_110 : f32 to vector<16x128xf32>
    %336 = arith.mulf %335, %334 : vector<16x128xf32>
    %337 = arith.select %331, %329, %336 : vector<16x128xi1>, vector<16x128xf32>
    %cst_111 = arith.constant 1.05070102 : f32
    %338 = vector.broadcast %cst_111 : f32 to vector<16x128xf32>
    %339 = arith.mulf %338, %337 : vector<16x128xf32>
    %340 = vector.broadcast %2 : vector<1x128xf32> to vector<16x128xf32>
    %341 = arith.mulf %339, %340 : vector<16x128xf32>
    %342 = arith.truncf %341 : vector<16x128xf32> to vector<16x128xbf16>
    %c208 = arith.constant 208 : index
    %c0_112 = arith.constant 0 : index
    %343 = vector.load %arg12[%c208, %c0_112] : memref<256x128xbf16, #tpu.memory_space<vmem>>, vector<16x128xbf16>
    tpu.vector_store %arg12[%c208, %c0_112], %342 {strides = array<i32>} : memref<256x128xbf16, #tpu.memory_space<vmem>>, vector<16x128xbf16>,
    %c13 = arith.constant 13 : index
    %c0_113 = arith.constant 0 : index
    %c0_114 = arith.constant 0 : index
    %344 = vector.load %arg1[%c13, %c0_113, %c0_114] : memref<14x16x120xbf16, #tpu.memory_space<vmem>>, vector<1x16x120xbf16>
    %345 = vector.shape_cast %344 : vector<1x16x120xbf16> to vector<16x120xbf16>
    %cst_115 = arith.constant dense<0.000000e+00> : vector<16x512xf32>
    %346 = tpu.matmul %345, %0, %cst_115 {dimension_numbers = #tpu.dot_dimension_numbers<[1], [0], [0], [1], [0, 0, 1, 1], [], []>} : vector<16x120xbf16>, vector<120x512xbf16>, vector<16x512xf32> -> vector<16x512xf32>
    %347 = vector.extract_strided_slice %346 {offsets = [0, 0], sizes = [16, 128], strides = [1, 1]} : vector<16x512xf32> to vector<16x128xf32>
    %348 = vector.extract_strided_slice %346 {offsets = [0, 128], sizes = [16, 128], strides = [1, 1]} : vector<16x512xf32> to vector<16x128xf32>
    %349 = arith.maximumf %347, %348 : vector<16x128xf32>
    %350 = vector.extract_strided_slice %346 {offsets = [0, 256], sizes = [16, 128], strides = [1, 1]} : vector<16x512xf32> to vector<16x128xf32>
    %351 = vector.extract_strided_slice %346 {offsets = [0, 384], sizes = [16, 128], strides = [1, 1]} : vector<16x512xf32> to vector<16x128xf32>
    %352 = arith.maximumf %350, %351 : vector<16x128xf32>
    %353 = arith.maximumf %349, %352 : vector<16x128xf32>
    %354 = vector.broadcast %1 : vector<1x128xf32> to vector<16x128xf32>
    %355 = arith.addf %353, %354 : vector<16x128xf32>
    %cst_116 = arith.constant 0.000000e+00 : f32
    %356 = vector.broadcast %cst_116 : f32 to vector<16x128xf32>
    %357 = arith.cmpf ogt, %355, %356 : vector<16x128xf32>
    %358 = math.exp %355 : vector<16x128xf32>
    %cst_117 = arith.constant 1.000000e+00 : f32
    %359 = vector.broadcast %cst_117 : f32 to vector<16x128xf32>
    %360 = arith.subf %358, %359 : vector<16x128xf32>
    %cst_118 = arith.constant 1.67326319 : f32
    %361 = vector.broadcast %cst_118 : f32 to vector<16x128xf32>
    %362 = arith.mulf %361, %360 : vector<16x128xf32>
    %363 = arith.select %357, %355, %362 : vector<16x128xi1>, vector<16x128xf32>
    %cst_119 = arith.constant 1.05070102 : f32
    %364 = vector.broadcast %cst_119 : f32 to vector<16x128xf32>
    %365 = arith.mulf %364, %363 : vector<16x128xf32>
    %366 = vector.broadcast %2 : vector<1x128xf32> to vector<16x128xf32>
    %367 = arith.mulf %365, %366 : vector<16x128xf32>
    %368 = arith.truncf %367 : vector<16x128xf32> to vector<16x128xbf16>
    %c224 = arith.constant 224 : index
    %c0_120 = arith.constant 0 : index
    %369 = vector.load %arg12[%c224, %c0_120] : memref<256x128xbf16, #tpu.memory_space<vmem>>, vector<16x128xbf16>
    tpu.vector_store %arg12[%c224, %c0_120], %368 {strides = array<i32>} : memref<256x128xbf16, #tpu.memory_space<vmem>>, vector<16x128xbf16>,
    %c0_121 = arith.constant 0 : index
    %c0_122 = arith.constant 0 : index
    %370 = vector.load %arg12[%c0_121, %c0_122] : memref<256x128xbf16, #tpu.memory_space<vmem>>, vector<16x128xbf16>
    %c0_123 = arith.constant 0 : index
    %c0_124 = arith.constant 0 : index
    %371 = vector.load %arg13[%c0_123, %c0_124] : memref<224x384xbf16, #tpu.memory_space<vmem>>, vector<16x128xbf16>
    tpu.vector_store %arg13[%c0_123, %c0_124], %370 {strides = array<i32>} : memref<224x384xbf16, #tpu.memory_space<vmem>>, vector<16x128xbf16>,
    %c16_125 = arith.constant 16 : index
    %c0_126 = arith.constant 0 : index
    %372 = vector.load %arg12[%c16_125, %c0_126] : memref<256x128xbf16, #tpu.memory_space<vmem>>, vector<16x128xbf16>
    %c0_127 = arith.constant 0 : index
    %c128_128 = arith.constant 128 : index
    %373 = vector.load %arg13[%c0_127, %c128_128] : memref<224x384xbf16, #tpu.memory_space<vmem>>, vector<16x128xbf16>
    tpu.vector_store %arg13[%c0_127, %c128_128], %372 {strides = array<i32>} : memref<224x384xbf16, #tpu.memory_space<vmem>>, vector<16x128xbf16>,
    %c32_129 = arith.constant 32 : index
    %c0_130 = arith.constant 0 : index
    %374 = vector.load %arg12[%c32_129, %c0_130] : memref<256x128xbf16, #tpu.memory_space<vmem>>, vector<16x128xbf16>
    %c0_131 = arith.constant 0 : index
    %c256 = arith.constant 256 : index
    %375 = vector.load %arg13[%c0_131, %c256] : memref<224x384xbf16, #tpu.memory_space<vmem>>, vector<16x128xbf16>
    tpu.vector_store %arg13[%c0_131, %c256], %374 {strides = array<i32>} : memref<224x384xbf16, #tpu.memory_space<vmem>>, vector<16x128xbf16>,
    %c32_132 = arith.constant 32 : index
    %c0_133 = arith.constant 0 : index
    %376 = vector.load %arg12[%c32_132, %c0_133] : memref<256x128xbf16, #tpu.memory_space<vmem>>, vector<16x128xbf16>
    %c16_134 = arith.constant 16 : index
    %c0_135 = arith.constant 0 : index
    %377 = vector.load %arg13[%c16_134, %c0_135] : memref<224x384xbf16, #tpu.memory_space<vmem>>, vector<16x128xbf16>
    tpu.vector_store %arg13[%c16_134, %c0_135], %376 {strides = array<i32>} : memref<224x384xbf16, #tpu.memory_space<vmem>>, vector<16x128xbf16>,
    %c48_136 = arith.constant 48 : index
    %c0_137 = arith.constant 0 : index
    %378 = vector.load %arg12[%c48_136, %c0_137] : memref<256x128xbf16, #tpu.memory_space<vmem>>, vector<16x128xbf16>
    %c16_138 = arith.constant 16 : index
    %c128_139 = arith.constant 128 : index
    %379 = vector.load %arg13[%c16_138, %c128_139] : memref<224x384xbf16, #tpu.memory_space<vmem>>, vector<16x128xbf16>
    tpu.vector_store %arg13[%c16_138, %c128_139], %378 {strides = array<i32>} : memref<224x384xbf16, #tpu.memory_space<vmem>>, vector<16x128xbf16>,
    %c64_140 = arith.constant 64 : index
    %c0_141 = arith.constant 0 : index
    %380 = vector.load %arg12[%c64_140, %c0_141] : memref<256x128xbf16, #tpu.memory_space<vmem>>, vector<16x128xbf16>
    %c16_142 = arith.constant 16 : index
    %c256_143 = arith.constant 256 : index
    %381 = vector.load %arg13[%c16_142, %c256_143] : memref<224x384xbf16, #tpu.memory_space<vmem>>, vector<16x128xbf16>
    tpu.vector_store %arg13[%c16_142, %c256_143], %380 {strides = array<i32>} : memref<224x384xbf16, #tpu.memory_space<vmem>>, vector<16x128xbf16>,
    %c64_144 = arith.constant 64 : index
    %c0_145 = arith.constant 0 : index
    %382 = vector.load %arg12[%c64_144, %c0_145] : memref<256x128xbf16, #tpu.memory_space<vmem>>, vector<16x128xbf16>
    %c32_146 = arith.constant 32 : index
    %c0_147 = arith.constant 0 : index
    %383 = vector.load %arg13[%c32_146, %c0_147] : memref<224x384xbf16, #tpu.memory_space<vmem>>, vector<16x128xbf16>
    tpu.vector_store %arg13[%c32_146, %c0_147], %382 {strides = array<i32>} : memref<224x384xbf16, #tpu.memory_space<vmem>>, vector<16x128xbf16>,
    %c80_148 = arith.constant 80 : index
    %c0_149 = arith.constant 0 : index
    %384 = vector.load %arg12[%c80_148, %c0_149] : memref<256x128xbf16, #tpu.memory_space<vmem>>, vector<16x128xbf16>
    %c32_150 = arith.constant 32 : index
    %c128_151 = arith.constant 128 : index
    %385 = vector.load %arg13[%c32_150, %c128_151] : memref<224x384xbf16, #tpu.memory_space<vmem>>, vector<16x128xbf16>
    tpu.vector_store %arg13[%c32_150, %c128_151], %384 {strides = array<i32>} : memref<224x384xbf16, #tpu.memory_space<vmem>>, vector<16x128xbf16>,
    %c96_152 = arith.constant 96 : index
    %c0_153 = arith.constant 0 : index
    %386 = vector.load %arg12[%c96_152, %c0_153] : memref<256x128xbf16, #tpu.memory_space<vmem>>, vector<16x128xbf16>
    %c32_154 = arith.constant 32 : index
    %c256_155 = arith.constant 256 : index
    %387 = vector.load %arg13[%c32_154, %c256_155] : memref<224x384xbf16, #tpu.memory_space<vmem>>, vector<16x128xbf16>
    tpu.vector_store %arg13[%c32_154, %c256_155], %386 {strides = array<i32>} : memref<224x384xbf16, #tpu.memory_space<vmem>>, vector<16x128xbf16>,
    %c96_156 = arith.constant 96 : index
    %c0_157 = arith.constant 0 : index
    %388 = vector.load %arg12[%c96_156, %c0_157] : memref<256x128xbf16, #tpu.memory_space<vmem>>, vector<16x128xbf16>
    %c48_158 = arith.constant 48 : index
    %c0_159 = arith.constant 0 : index
    %389 = vector.load %arg13[%c48_158, %c0_159] : memref<224x384xbf16, #tpu.memory_space<vmem>>, vector<16x128xbf16>
    tpu.vector_store %arg13[%c48_158, %c0_159], %388 {strides = array<i32>} : memref<224x384xbf16, #tpu.memory_space<vmem>>, vector<16x128xbf16>,
    %c112_160 = arith.constant 112 : index
    %c0_161 = arith.constant 0 : index
    %390 = vector.load %arg12[%c112_160, %c0_161] : memref<256x128xbf16, #tpu.memory_space<vmem>>, vector<16x128xbf16>
    %c48_162 = arith.constant 48 : index
    %c128_163 = arith.constant 128 : index
    %391 = vector.load %arg13[%c48_162, %c128_163] : memref<224x384xbf16, #tpu.memory_space<vmem>>, vector<16x128xbf16>
    tpu.vector_store %arg13[%c48_162, %c128_163], %390 {strides = array<i32>} : memref<224x384xbf16, #tpu.memory_space<vmem>>, vector<16x128xbf16>,
    %c128_164 = arith.constant 128 : index
    %c0_165 = arith.constant 0 : index
    %392 = vector.load %arg12[%c128_164, %c0_165] : memref<256x128xbf16, #tpu.memory_space<vmem>>, vector<16x128xbf16>
    %c48_166 = arith.constant 48 : index
    %c256_167 = arith.constant 256 : index
    %393 = vector.load %arg13[%c48_166, %c256_167] : memref<224x384xbf16, #tpu.memory_space<vmem>>, vector<16x128xbf16>
    tpu.vector_store %arg13[%c48_166, %c256_167], %392 {strides = array<i32>} : memref<224x384xbf16, #tpu.memory_space<vmem>>, vector<16x128xbf16>,
    %c128_168 = arith.constant 128 : index
    %c0_169 = arith.constant 0 : index
    %394 = vector.load %arg12[%c128_168, %c0_169] : memref<256x128xbf16, #tpu.memory_space<vmem>>, vector<16x128xbf16>
    %c64_170 = arith.constant 64 : index
    %c0_171 = arith.constant 0 : index
    %395 = vector.load %arg13[%c64_170, %c0_171] : memref<224x384xbf16, #tpu.memory_space<vmem>>, vector<16x128xbf16>
    tpu.vector_store %arg13[%c64_170, %c0_171], %394 {strides = array<i32>} : memref<224x384xbf16, #tpu.memory_space<vmem>>, vector<16x128xbf16>,
    %c144_172 = arith.constant 144 : index
    %c0_173 = arith.constant 0 : index
    %396 = vector.load %arg12[%c144_172, %c0_173] : memref<256x128xbf16, #tpu.memory_space<vmem>>, vector<16x128xbf16>
    %c64_174 = arith.constant 64 : index
    %c128_175 = arith.constant 128 : index
    %397 = vector.load %arg13[%c64_174, %c128_175] : memref<224x384xbf16, #tpu.memory_space<vmem>>, vector<16x128xbf16>
    tpu.vector_store %arg13[%c64_174, %c128_175], %396 {strides = array<i32>} : memref<224x384xbf16, #tpu.memory_space<vmem>>, vector<16x128xbf16>,
    %c160_176 = arith.constant 160 : index
    %c0_177 = arith.constant 0 : index
    %398 = vector.load %arg12[%c160_176, %c0_177] : memref<256x128xbf16, #tpu.memory_space<vmem>>, vector<16x128xbf16>
    %c64_178 = arith.constant 64 : index
    %c256_179 = arith.constant 256 : index
    %399 = vector.load %arg13[%c64_178, %c256_179] : memref<224x384xbf16, #tpu.memory_space<vmem>>, vector<16x128xbf16>
    tpu.vector_store %arg13[%c64_178, %c256_179], %398 {strides = array<i32>} : memref<224x384xbf16, #tpu.memory_space<vmem>>, vector<16x128xbf16>,
    %c160_180 = arith.constant 160 : index
    %c0_181 = arith.constant 0 : index
    %400 = vector.load %arg12[%c160_180, %c0_181] : memref<256x128xbf16, #tpu.memory_space<vmem>>, vector<16x128xbf16>
    %c80_182 = arith.constant 80 : index
    %c0_183 = arith.constant 0 : index
    %401 = vector.load %arg13[%c80_182, %c0_183] : memref<224x384xbf16, #tpu.memory_space<vmem>>, vector<16x128xbf16>
    tpu.vector_store %arg13[%c80_182, %c0_183], %400 {strides = array<i32>} : memref<224x384xbf16, #tpu.memory_space<vmem>>, vector<16x128xbf16>,
    %c176_184 = arith.constant 176 : index
    %c0_185 = arith.constant 0 : index
    %402 = vector.load %arg12[%c176_184, %c0_185] : memref<256x128xbf16, #tpu.memory_space<vmem>>, vector<16x128xbf16>
    %c80_186 = arith.constant 80 : index
    %c128_187 = arith.constant 128 : index
    %403 = vector.load %arg13[%c80_186, %c128_187] : memref<224x384xbf16, #tpu.memory_space<vmem>>, vector<16x128xbf16>
    tpu.vector_store %arg13[%c80_186, %c128_187], %402 {strides = array<i32>} : memref<224x384xbf16, #tpu.memory_space<vmem>>, vector<16x128xbf16>,
    %c192_188 = arith.constant 192 : index
    %c0_189 = arith.constant 0 : index
    %404 = vector.load %arg12[%c192_188, %c0_189] : memref<256x128xbf16, #tpu.memory_space<vmem>>, vector<16x128xbf16>
    %c80_190 = arith.constant 80 : index
    %c256_191 = arith.constant 256 : index
    %405 = vector.load %arg13[%c80_190, %c256_191] : memref<224x384xbf16, #tpu.memory_space<vmem>>, vector<16x128xbf16>
    tpu.vector_store %arg13[%c80_190, %c256_191], %404 {strides = array<i32>} : memref<224x384xbf16, #tpu.memory_space<vmem>>, vector<16x128xbf16>,
    %c192_192 = arith.constant 192 : index
    %c0_193 = arith.constant 0 : index
    %406 = vector.load %arg12[%c192_192, %c0_193] : memref<256x128xbf16, #tpu.memory_space<vmem>>, vector<16x128xbf16>
    %c96_194 = arith.constant 96 : index
    %c0_195 = arith.constant 0 : index
    %407 = vector.load %arg13[%c96_194, %c0_195] : memref<224x384xbf16, #tpu.memory_space<vmem>>, vector<16x128xbf16>
    tpu.vector_store %arg13[%c96_194, %c0_195], %406 {strides = array<i32>} : memref<224x384xbf16, #tpu.memory_space<vmem>>, vector<16x128xbf16>,
    %c208_196 = arith.constant 208 : index
    %c0_197 = arith.constant 0 : index
    %408 = vector.load %arg12[%c208_196, %c0_197] : memref<256x128xbf16, #tpu.memory_space<vmem>>, vector<16x128xbf16>
    %c96_198 = arith.constant 96 : index
    %c128_199 = arith.constant 128 : index
    %409 = vector.load %arg13[%c96_198, %c128_199] : memref<224x384xbf16, #tpu.memory_space<vmem>>, vector<16x128xbf16>
    tpu.vector_store %arg13[%c96_198, %c128_199], %408 {strides = array<i32>} : memref<224x384xbf16, #tpu.memory_space<vmem>>, vector<16x128xbf16>,
    %c224_200 = arith.constant 224 : index
    %c0_201 = arith.constant 0 : index
    %410 = vector.load %arg12[%c224_200, %c0_201] : memref<256x128xbf16, #tpu.memory_space<vmem>>, vector<16x128xbf16>
    %c96_202 = arith.constant 96 : index
    %c256_203 = arith.constant 256 : index
    %411 = vector.load %arg13[%c96_202, %c256_203] : memref<224x384xbf16, #tpu.memory_space<vmem>>, vector<16x128xbf16>
    tpu.vector_store %arg13[%c96_202, %c256_203], %410 {strides = array<i32>} : memref<224x384xbf16, #tpu.memory_space<vmem>>, vector<16x128xbf16>,
    %c16_204 = arith.constant 16 : index
    %c0_205 = arith.constant 0 : index
    %412 = vector.load %arg12[%c16_204, %c0_205] : memref<256x128xbf16, #tpu.memory_space<vmem>>, vector<16x128xbf16>
    %c112_206 = arith.constant 112 : index
    %c0_207 = arith.constant 0 : index
    %413 = vector.load %arg13[%c112_206, %c0_207] : memref<224x384xbf16, #tpu.memory_space<vmem>>, vector<16x128xbf16>
    tpu.vector_store %arg13[%c112_206, %c0_207], %412 {strides = array<i32>} : memref<224x384xbf16, #tpu.memory_space<vmem>>, vector<16x128xbf16>,
    %c32_208 = arith.constant 32 : index
    %c0_209 = arith.constant 0 : index
    %414 = vector.load %arg12[%c32_208, %c0_209] : memref<256x128xbf16, #tpu.memory_space<vmem>>, vector<16x128xbf16>
    %c112_210 = arith.constant 112 : index
    %c128_211 = arith.constant 128 : index
    %415 = vector.load %arg13[%c112_210, %c128_211] : memref<224x384xbf16, #tpu.memory_space<vmem>>, vector<16x128xbf16>
    tpu.vector_store %arg13[%c112_210, %c128_211], %414 {strides = array<i32>} : memref<224x384xbf16, #tpu.memory_space<vmem>>, vector<16x128xbf16>,
    %c48_212 = arith.constant 48 : index
    %c0_213 = arith.constant 0 : index
    %416 = vector.load %arg12[%c48_212, %c0_213] : memref<256x128xbf16, #tpu.memory_space<vmem>>, vector<16x128xbf16>
    %c112_214 = arith.constant 112 : index
    %c256_215 = arith.constant 256 : index
    %417 = vector.load %arg13[%c112_214, %c256_215] : memref<224x384xbf16, #tpu.memory_space<vmem>>, vector<16x128xbf16>
    tpu.vector_store %arg13[%c112_214, %c256_215], %416 {strides = array<i32>} : memref<224x384xbf16, #tpu.memory_space<vmem>>, vector<16x128xbf16>,
    %c48_216 = arith.constant 48 : index
    %c0_217 = arith.constant 0 : index
    %418 = vector.load %arg12[%c48_216, %c0_217] : memref<256x128xbf16, #tpu.memory_space<vmem>>, vector<16x128xbf16>
    %c128_218 = arith.constant 128 : index
    %c0_219 = arith.constant 0 : index
    %419 = vector.load %arg13[%c128_218, %c0_219] : memref<224x384xbf16, #tpu.memory_space<vmem>>, vector<16x128xbf16>
    tpu.vector_store %arg13[%c128_218, %c0_219], %418 {strides = array<i32>} : memref<224x384xbf16, #tpu.memory_space<vmem>>, vector<16x128xbf16>,
    %c64_220 = arith.constant 64 : index
    %c0_221 = arith.constant 0 : index
    %420 = vector.load %arg12[%c64_220, %c0_221] : memref<256x128xbf16, #tpu.memory_space<vmem>>, vector<16x128xbf16>
    %c128_222 = arith.constant 128 : index
    %c128_223 = arith.constant 128 : index
    %421 = vector.load %arg13[%c128_222, %c128_223] : memref<224x384xbf16, #tpu.memory_space<vmem>>, vector<16x128xbf16>
    tpu.vector_store %arg13[%c128_222, %c128_223], %420 {strides = array<i32>} : memref<224x384xbf16, #tpu.memory_space<vmem>>, vector<16x128xbf16>,
    %c80_224 = arith.constant 80 : index
    %c0_225 = arith.constant 0 : index
    %422 = vector.load %arg12[%c80_224, %c0_225] : memref<256x128xbf16, #tpu.memory_space<vmem>>, vector<16x128xbf16>
    %c128_226 = arith.constant 128 : index
    %c256_227 = arith.constant 256 : index
    %423 = vector.load %arg13[%c128_226, %c256_227] : memref<224x384xbf16, #tpu.memory_space<vmem>>, vector<16x128xbf16>
    tpu.vector_store %arg13[%c128_226, %c256_227], %422 {strides = array<i32>} : memref<224x384xbf16, #tpu.memory_space<vmem>>, vector<16x128xbf16>,
    %c80_228 = arith.constant 80 : index
    %c0_229 = arith.constant 0 : index
    %424 = vector.load %arg12[%c80_228, %c0_229] : memref<256x128xbf16, #tpu.memory_space<vmem>>, vector<16x128xbf16>
    %c144_230 = arith.constant 144 : index
    %c0_231 = arith.constant 0 : index
    %425 = vector.load %arg13[%c144_230, %c0_231] : memref<224x384xbf16, #tpu.memory_space<vmem>>, vector<16x128xbf16>
    tpu.vector_store %arg13[%c144_230, %c0_231], %424 {strides = array<i32>} : memref<224x384xbf16, #tpu.memory_space<vmem>>, vector<16x128xbf16>,
    %c96_232 = arith.constant 96 : index
    %c0_233 = arith.constant 0 : index
    %426 = vector.load %arg12[%c96_232, %c0_233] : memref<256x128xbf16, #tpu.memory_space<vmem>>, vector<16x128xbf16>
    %c144_234 = arith.constant 144 : index
    %c128_235 = arith.constant 128 : index
    %427 = vector.load %arg13[%c144_234, %c128_235] : memref<224x384xbf16, #tpu.memory_space<vmem>>, vector<16x128xbf16>
    tpu.vector_store %arg13[%c144_234, %c128_235], %426 {strides = array<i32>} : memref<224x384xbf16, #tpu.memory_space<vmem>>, vector<16x128xbf16>,
    %c112_236 = arith.constant 112 : index
    %c0_237 = arith.constant 0 : index
    %428 = vector.load %arg12[%c112_236, %c0_237] : memref<256x128xbf16, #tpu.memory_space<vmem>>, vector<16x128xbf16>
    %c144_238 = arith.constant 144 : index
    %c256_239 = arith.constant 256 : index
    %429 = vector.load %arg13[%c144_238, %c256_239] : memref<224x384xbf16, #tpu.memory_space<vmem>>, vector<16x128xbf16>
    tpu.vector_store %arg13[%c144_238, %c256_239], %428 {strides = array<i32>} : memref<224x384xbf16, #tpu.memory_space<vmem>>, vector<16x128xbf16>,
    %c112_240 = arith.constant 112 : index
    %c0_241 = arith.constant 0 : index
    %430 = vector.load %arg12[%c112_240, %c0_241] : memref<256x128xbf16, #tpu.memory_space<vmem>>, vector<16x128xbf16>
    %c160_242 = arith.constant 160 : index
    %c0_243 = arith.constant 0 : index
    %431 = vector.load %arg13[%c160_242, %c0_243] : memref<224x384xbf16, #tpu.memory_space<vmem>>, vector<16x128xbf16>
    tpu.vector_store %arg13[%c160_242, %c0_243], %430 {strides = array<i32>} : memref<224x384xbf16, #tpu.memory_space<vmem>>, vector<16x128xbf16>,
    %c128_244 = arith.constant 128 : index
    %c0_245 = arith.constant 0 : index
    %432 = vector.load %arg12[%c128_244, %c0_245] : memref<256x128xbf16, #tpu.memory_space<vmem>>, vector<16x128xbf16>
    %c160_246 = arith.constant 160 : index
    %c128_247 = arith.constant 128 : index
    %433 = vector.load %arg13[%c160_246, %c128_247] : memref<224x384xbf16, #tpu.memory_space<vmem>>, vector<16x128xbf16>
    tpu.vector_store %arg13[%c160_246, %c128_247], %432 {strides = array<i32>} : memref<224x384xbf16, #tpu.memory_space<vmem>>, vector<16x128xbf16>,
    %c144_248 = arith.constant 144 : index
    %c0_249 = arith.constant 0 : index
    %434 = vector.load %arg12[%c144_248, %c0_249] : memref<256x128xbf16, #tpu.memory_space<vmem>>, vector<16x128xbf16>
    %c160_250 = arith.constant 160 : index
    %c256_251 = arith.constant 256 : index
    %435 = vector.load %arg13[%c160_250, %c256_251] : memref<224x384xbf16, #tpu.memory_space<vmem>>, vector<16x128xbf16>
    tpu.vector_store %arg13[%c160_250, %c256_251], %434 {strides = array<i32>} : memref<224x384xbf16, #tpu.memory_space<vmem>>, vector<16x128xbf16>,
    %c144_252 = arith.constant 144 : index
    %c0_253 = arith.constant 0 : index
    %436 = vector.load %arg12[%c144_252, %c0_253] : memref<256x128xbf16, #tpu.memory_space<vmem>>, vector<16x128xbf16>
    %c176_254 = arith.constant 176 : index
    %c0_255 = arith.constant 0 : index
    %437 = vector.load %arg13[%c176_254, %c0_255] : memref<224x384xbf16, #tpu.memory_space<vmem>>, vector<16x128xbf16>
    tpu.vector_store %arg13[%c176_254, %c0_255], %436 {strides = array<i32>} : memref<224x384xbf16, #tpu.memory_space<vmem>>, vector<16x128xbf16>,
    %c160_256 = arith.constant 160 : index
    %c0_257 = arith.constant 0 : index
    %438 = vector.load %arg12[%c160_256, %c0_257] : memref<256x128xbf16, #tpu.memory_space<vmem>>, vector<16x128xbf16>
    %c176_258 = arith.constant 176 : index
    %c128_259 = arith.constant 128 : index
    %439 = vector.load %arg13[%c176_258, %c128_259] : memref<224x384xbf16, #tpu.memory_space<vmem>>, vector<16x128xbf16>
    tpu.vector_store %arg13[%c176_258, %c128_259], %438 {strides = array<i32>} : memref<224x384xbf16, #tpu.memory_space<vmem>>, vector<16x128xbf16>,
    %c176_260 = arith.constant 176 : index
    %c0_261 = arith.constant 0 : index
    %440 = vector.load %arg12[%c176_260, %c0_261] : memref<256x128xbf16, #tpu.memory_space<vmem>>, vector<16x128xbf16>
    %c176_262 = arith.constant 176 : index
    %c256_263 = arith.constant 256 : index
    %441 = vector.load %arg13[%c176_262, %c256_263] : memref<224x384xbf16, #tpu.memory_space<vmem>>, vector<16x128xbf16>
    tpu.vector_store %arg13[%c176_262, %c256_263], %440 {strides = array<i32>} : memref<224x384xbf16, #tpu.memory_space<vmem>>, vector<16x128xbf16>,
    %c176_264 = arith.constant 176 : index
    %c0_265 = arith.constant 0 : index
    %442 = vector.load %arg12[%c176_264, %c0_265] : memref<256x128xbf16, #tpu.memory_space<vmem>>, vector<16x128xbf16>
    %c192_266 = arith.constant 192 : index
    %c0_267 = arith.constant 0 : index
    %443 = vector.load %arg13[%c192_266, %c0_267] : memref<224x384xbf16, #tpu.memory_space<vmem>>, vector<16x128xbf16>
    tpu.vector_store %arg13[%c192_266, %c0_267], %442 {strides = array<i32>} : memref<224x384xbf16, #tpu.memory_space<vmem>>, vector<16x128xbf16>,
    %c192_268 = arith.constant 192 : index
    %c0_269 = arith.constant 0 : index
    %444 = vector.load %arg12[%c192_268, %c0_269] : memref<256x128xbf16, #tpu.memory_space<vmem>>, vector<16x128xbf16>
    %c192_270 = arith.constant 192 : index
    %c128_271 = arith.constant 128 : index
    %445 = vector.load %arg13[%c192_270, %c128_271] : memref<224x384xbf16, #tpu.memory_space<vmem>>, vector<16x128xbf16>
    tpu.vector_store %arg13[%c192_270, %c128_271], %444 {strides = array<i32>} : memref<224x384xbf16, #tpu.memory_space<vmem>>, vector<16x128xbf16>,
    %c208_272 = arith.constant 208 : index
    %c0_273 = arith.constant 0 : index
    %446 = vector.load %arg12[%c208_272, %c0_273] : memref<256x128xbf16, #tpu.memory_space<vmem>>, vector<16x128xbf16>
    %c192_274 = arith.constant 192 : index
    %c256_275 = arith.constant 256 : index
    %447 = vector.load %arg13[%c192_274, %c256_275] : memref<224x384xbf16, #tpu.memory_space<vmem>>, vector<16x128xbf16>
    tpu.vector_store %arg13[%c192_274, %c256_275], %446 {strides = array<i32>} : memref<224x384xbf16, #tpu.memory_space<vmem>>, vector<16x128xbf16>,
    %c208_276 = arith.constant 208 : index
    %c0_277 = arith.constant 0 : index
    %448 = vector.load %arg12[%c208_276, %c0_277] : memref<256x128xbf16, #tpu.memory_space<vmem>>, vector<16x128xbf16>
    %c208_278 = arith.constant 208 : index
    %c0_279 = arith.constant 0 : index
    %449 = vector.load %arg13[%c208_278, %c0_279] : memref<224x384xbf16, #tpu.memory_space<vmem>>, vector<16x128xbf16>
    tpu.vector_store %arg13[%c208_278, %c0_279], %448 {strides = array<i32>} : memref<224x384xbf16, #tpu.memory_space<vmem>>, vector<16x128xbf16>,
    %c224_280 = arith.constant 224 : index
    %c0_281 = arith.constant 0 : index
    %450 = vector.load %arg12[%c224_280, %c0_281] : memref<256x128xbf16, #tpu.memory_space<vmem>>, vector<16x128xbf16>
    %c208_282 = arith.constant 208 : index
    %c128_283 = arith.constant 128 : index
    %451 = vector.load %arg13[%c208_282, %c128_283] : memref<224x384xbf16, #tpu.memory_space<vmem>>, vector<16x128xbf16>
    tpu.vector_store %arg13[%c208_282, %c128_283], %450 {strides = array<i32>} : memref<224x384xbf16, #tpu.memory_space<vmem>>, vector<16x128xbf16>,
    %c240_284 = arith.constant 240 : index
    %c0_285 = arith.constant 0 : index
    %452 = vector.load %arg12[%c240_284, %c0_285] : memref<256x128xbf16, #tpu.memory_space<vmem>>, vector<16x128xbf16>
    %c208_286 = arith.constant 208 : index
    %c256_287 = arith.constant 256 : index
    %453 = vector.load %arg13[%c208_286, %c256_287] : memref<224x384xbf16, #tpu.memory_space<vmem>>, vector<16x128xbf16>
    tpu.vector_store %arg13[%c208_286, %c256_287], %452 {strides = array<i32>} : memref<224x384xbf16, #tpu.memory_space<vmem>>, vector<16x128xbf16>,
    %c0_288 = arith.constant 0 : index
    %c0_289 = arith.constant 0 : index
    %454 = vector.load %arg13[%c0_288, %c0_289] : memref<224x384xbf16, #tpu.memory_space<vmem>>, vector<224x384xbf16>
    %c0_290 = arith.constant 0 : index
    %c0_291 = arith.constant 0 : index
    %455 = vector.load %arg5[%c0_290, %c0_291] : memref<384x256xbf16, #tpu.memory_space<vmem>>, vector<384x256xbf16>
    %cst_292 = arith.constant dense<0.000000e+00> : vector<224x256xf32>
    %456 = tpu.matmul %454, %455, %cst_292 {dimension_numbers = #tpu.dot_dimension_numbers<[1], [0], [0], [1], [0, 0, 1, 1], [], []>} : vector<224x384xbf16>, vector<384x256xbf16>, vector<224x256xf32> -> vector<224x256xf32>
    %c0_293 = arith.constant 0 : index
    %c0_294 = arith.constant 0 : index
    %457 = vector.load %arg6[%c0_293, %c0_294] : memref<1x128xf32, #tpu.memory_space<vmem>>, vector<1x128xf32>
    %458 = vector.extract_strided_slice %456 {offsets = [0, 0], sizes = [16, 256], strides = [1, 1]} : vector<224x256xf32> to vector<16x256xf32>
    %459 = vector.extract_strided_slice %456 {offsets = [112, 0], sizes = [16, 256], strides = [1, 1]} : vector<224x256xf32> to vector<16x256xf32>
    %460 = arith.maximumf %458, %459 : vector<16x256xf32>
    %461 = vector.extract_strided_slice %460 {offsets = [0, 0], sizes = [16, 128], strides = [1, 1]} : vector<16x256xf32> to vector<16x128xf32>
    %462 = vector.extract_strided_slice %460 {offsets = [0, 128], sizes = [16, 128], strides = [1, 1]} : vector<16x256xf32> to vector<16x128xf32>
    %463 = arith.maximumf %461, %462 : vector<16x128xf32>
    %464 = vector.broadcast %457 : vector<1x128xf32> to vector<16x128xf32>
    %465 = arith.addf %463, %464 : vector<16x128xf32>
    %cst_295 = arith.constant 0.000000e+00 : f32
    %466 = vector.broadcast %cst_295 : f32 to vector<16x128xf32>
    %467 = arith.cmpf ogt, %465, %466 : vector<16x128xf32>
    %468 = math.exp %465 : vector<16x128xf32>
    %cst_296 = arith.constant 1.000000e+00 : f32
    %469 = vector.broadcast %cst_296 : f32 to vector<16x128xf32>
    %470 = arith.subf %468, %469 : vector<16x128xf32>
    %cst_297 = arith.constant 1.67326319 : f32
    %471 = vector.broadcast %cst_297 : f32 to vector<16x128xf32>
    %472 = arith.mulf %471, %470 : vector<16x128xf32>
    %473 = arith.select %467, %465, %472 : vector<16x128xi1>, vector<16x128xf32>
    %cst_298 = arith.constant 1.05070102 : f32
    %474 = vector.broadcast %cst_298 : f32 to vector<16x128xf32>
    %475 = arith.mulf %474, %473 : vector<16x128xf32>
    %c0_299 = arith.constant 0 : index
    %c0_300 = arith.constant 0 : index
    %476 = vector.load %arg14[%c0_299, %c0_300] : memref<16x896xf32, #tpu.memory_space<vmem>>, vector<16x128xf32>
    tpu.vector_store %arg14[%c0_299, %c0_300], %475 {strides = array<i32>} : memref<16x896xf32, #tpu.memory_space<vmem>>, vector<16x128xf32>,
    %477 = vector.extract_strided_slice %456 {offsets = [16, 0], sizes = [16, 256], strides = [1, 1]} : vector<224x256xf32> to vector<16x256xf32>
    %478 = vector.extract_strided_slice %456 {offsets = [128, 0], sizes = [16, 256], strides = [1, 1]} : vector<224x256xf32> to vector<16x256xf32>
    %479 = arith.maximumf %477, %478 : vector<16x256xf32>
    %480 = vector.extract_strided_slice %479 {offsets = [0, 0], sizes = [16, 128], strides = [1, 1]} : vector<16x256xf32> to vector<16x128xf32>
    %481 = vector.extract_strided_slice %479 {offsets = [0, 128], sizes = [16, 128], strides = [1, 1]} : vector<16x256xf32> to vector<16x128xf32>
    %482 = arith.maximumf %480, %481 : vector<16x128xf32>
    %483 = vector.broadcast %457 : vector<1x128xf32> to vector<16x128xf32>
    %484 = arith.addf %482, %483 : vector<16x128xf32>
    %cst_301 = arith.constant 0.000000e+00 : f32
    %485 = vector.broadcast %cst_301 : f32 to vector<16x128xf32>
    %486 = arith.cmpf ogt, %484, %485 : vector<16x128xf32>
    %487 = math.exp %484 : vector<16x128xf32>
    %cst_302 = arith.constant 1.000000e+00 : f32
    %488 = vector.broadcast %cst_302 : f32 to vector<16x128xf32>
    %489 = arith.subf %487, %488 : vector<16x128xf32>
    %cst_303 = arith.constant 1.67326319 : f32
    %490 = vector.broadcast %cst_303 : f32 to vector<16x128xf32>
    %491 = arith.mulf %490, %489 : vector<16x128xf32>
    %492 = arith.select %486, %484, %491 : vector<16x128xi1>, vector<16x128xf32>
    %cst_304 = arith.constant 1.05070102 : f32
    %493 = vector.broadcast %cst_304 : f32 to vector<16x128xf32>
    %494 = arith.mulf %493, %492 : vector<16x128xf32>
    %c0_305 = arith.constant 0 : index
    %c128_306 = arith.constant 128 : index
    %495 = vector.load %arg14[%c0_305, %c128_306] : memref<16x896xf32, #tpu.memory_space<vmem>>, vector<16x128xf32>
    tpu.vector_store %arg14[%c0_305, %c128_306], %494 {strides = array<i32>} : memref<16x896xf32, #tpu.memory_space<vmem>>, vector<16x128xf32>,
    %496 = vector.extract_strided_slice %456 {offsets = [32, 0], sizes = [16, 256], strides = [1, 1]} : vector<224x256xf32> to vector<16x256xf32>
    %497 = vector.extract_strided_slice %456 {offsets = [144, 0], sizes = [16, 256], strides = [1, 1]} : vector<224x256xf32> to vector<16x256xf32>
    %498 = arith.maximumf %496, %497 : vector<16x256xf32>
    %499 = vector.extract_strided_slice %498 {offsets = [0, 0], sizes = [16, 128], strides = [1, 1]} : vector<16x256xf32> to vector<16x128xf32>
    %500 = vector.extract_strided_slice %498 {offsets = [0, 128], sizes = [16, 128], strides = [1, 1]} : vector<16x256xf32> to vector<16x128xf32>
    %501 = arith.maximumf %499, %500 : vector<16x128xf32>
    %502 = vector.broadcast %457 : vector<1x128xf32> to vector<16x128xf32>
    %503 = arith.addf %501, %502 : vector<16x128xf32>
    %cst_307 = arith.constant 0.000000e+00 : f32
    %504 = vector.broadcast %cst_307 : f32 to vector<16x128xf32>
    %505 = arith.cmpf ogt, %503, %504 : vector<16x128xf32>
    %506 = math.exp %503 : vector<16x128xf32>
    %cst_308 = arith.constant 1.000000e+00 : f32
    %507 = vector.broadcast %cst_308 : f32 to vector<16x128xf32>
    %508 = arith.subf %506, %507 : vector<16x128xf32>
    %cst_309 = arith.constant 1.67326319 : f32
    %509 = vector.broadcast %cst_309 : f32 to vector<16x128xf32>
    %510 = arith.mulf %509, %508 : vector<16x128xf32>
    %511 = arith.select %505, %503, %510 : vector<16x128xi1>, vector<16x128xf32>
    %cst_310 = arith.constant 1.05070102 : f32
    %512 = vector.broadcast %cst_310 : f32 to vector<16x128xf32>
    %513 = arith.mulf %512, %511 : vector<16x128xf32>
    %c0_311 = arith.constant 0 : index
    %c256_312 = arith.constant 256 : index
    %514 = vector.load %arg14[%c0_311, %c256_312] : memref<16x896xf32, #tpu.memory_space<vmem>>, vector<16x128xf32>
    tpu.vector_store %arg14[%c0_311, %c256_312], %513 {strides = array<i32>} : memref<16x896xf32, #tpu.memory_space<vmem>>, vector<16x128xf32>,
    %515 = vector.extract_strided_slice %456 {offsets = [48, 0], sizes = [16, 256], strides = [1, 1]} : vector<224x256xf32> to vector<16x256xf32>
    %516 = vector.extract_strided_slice %456 {offsets = [160, 0], sizes = [16, 256], strides = [1, 1]} : vector<224x256xf32> to vector<16x256xf32>
    %517 = arith.maximumf %515, %516 : vector<16x256xf32>
    %518 = vector.extract_strided_slice %517 {offsets = [0, 0], sizes = [16, 128], strides = [1, 1]} : vector<16x256xf32> to vector<16x128xf32>
    %519 = vector.extract_strided_slice %517 {offsets = [0, 128], sizes = [16, 128], strides = [1, 1]} : vector<16x256xf32> to vector<16x128xf32>
    %520 = arith.maximumf %518, %519 : vector<16x128xf32>
    %521 = vector.broadcast %457 : vector<1x128xf32> to vector<16x128xf32>
    %522 = arith.addf %520, %521 : vector<16x128xf32>
    %cst_313 = arith.constant 0.000000e+00 : f32
    %523 = vector.broadcast %cst_313 : f32 to vector<16x128xf32>
    %524 = arith.cmpf ogt, %522, %523 : vector<16x128xf32>
    %525 = math.exp %522 : vector<16x128xf32>
    %cst_314 = arith.constant 1.000000e+00 : f32
    %526 = vector.broadcast %cst_314 : f32 to vector<16x128xf32>
    %527 = arith.subf %525, %526 : vector<16x128xf32>
    %cst_315 = arith.constant 1.67326319 : f32
    %528 = vector.broadcast %cst_315 : f32 to vector<16x128xf32>
    %529 = arith.mulf %528, %527 : vector<16x128xf32>
    %530 = arith.select %524, %522, %529 : vector<16x128xi1>, vector<16x128xf32>
    %cst_316 = arith.constant 1.05070102 : f32
    %531 = vector.broadcast %cst_316 : f32 to vector<16x128xf32>
    %532 = arith.mulf %531, %530 : vector<16x128xf32>
    %c0_317 = arith.constant 0 : index
    %c384 = arith.constant 384 : index
    %533 = vector.load %arg14[%c0_317, %c384] : memref<16x896xf32, #tpu.memory_space<vmem>>, vector<16x128xf32>
    tpu.vector_store %arg14[%c0_317, %c384], %532 {strides = array<i32>} : memref<16x896xf32, #tpu.memory_space<vmem>>, vector<16x128xf32>,
    %534 = vector.extract_strided_slice %456 {offsets = [64, 0], sizes = [16, 256], strides = [1, 1]} : vector<224x256xf32> to vector<16x256xf32>
    %535 = vector.extract_strided_slice %456 {offsets = [176, 0], sizes = [16, 256], strides = [1, 1]} : vector<224x256xf32> to vector<16x256xf32>
    %536 = arith.maximumf %534, %535 : vector<16x256xf32>
    %537 = vector.extract_strided_slice %536 {offsets = [0, 0], sizes = [16, 128], strides = [1, 1]} : vector<16x256xf32> to vector<16x128xf32>
    %538 = vector.extract_strided_slice %536 {offsets = [0, 128], sizes = [16, 128], strides = [1, 1]} : vector<16x256xf32> to vector<16x128xf32>
    %539 = arith.maximumf %537, %538 : vector<16x128xf32>
    %540 = vector.broadcast %457 : vector<1x128xf32> to vector<16x128xf32>
    %541 = arith.addf %539, %540 : vector<16x128xf32>
    %cst_318 = arith.constant 0.000000e+00 : f32
    %542 = vector.broadcast %cst_318 : f32 to vector<16x128xf32>
    %543 = arith.cmpf ogt, %541, %542 : vector<16x128xf32>
    %544 = math.exp %541 : vector<16x128xf32>
    %cst_319 = arith.constant 1.000000e+00 : f32
    %545 = vector.broadcast %cst_319 : f32 to vector<16x128xf32>
    %546 = arith.subf %544, %545 : vector<16x128xf32>
    %cst_320 = arith.constant 1.67326319 : f32
    %547 = vector.broadcast %cst_320 : f32 to vector<16x128xf32>
    %548 = arith.mulf %547, %546 : vector<16x128xf32>
    %549 = arith.select %543, %541, %548 : vector<16x128xi1>, vector<16x128xf32>
    %cst_321 = arith.constant 1.05070102 : f32
    %550 = vector.broadcast %cst_321 : f32 to vector<16x128xf32>
    %551 = arith.mulf %550, %549 : vector<16x128xf32>
    %c0_322 = arith.constant 0 : index
    %c512 = arith.constant 512 : index
    %552 = vector.load %arg14[%c0_322, %c512] : memref<16x896xf32, #tpu.memory_space<vmem>>, vector<16x128xf32>
    tpu.vector_store %arg14[%c0_322, %c512], %551 {strides = array<i32>} : memref<16x896xf32, #tpu.memory_space<vmem>>, vector<16x128xf32>,
    %553 = vector.extract_strided_slice %456 {offsets = [80, 0], sizes = [16, 256], strides = [1, 1]} : vector<224x256xf32> to vector<16x256xf32>
    %554 = vector.extract_strided_slice %456 {offsets = [192, 0], sizes = [16, 256], strides = [1, 1]} : vector<224x256xf32> to vector<16x256xf32>
    %555 = arith.maximumf %553, %554 : vector<16x256xf32>
    %556 = vector.extract_strided_slice %555 {offsets = [0, 0], sizes = [16, 128], strides = [1, 1]} : vector<16x256xf32> to vector<16x128xf32>
    %557 = vector.extract_strided_slice %555 {offsets = [0, 128], sizes = [16, 128], strides = [1, 1]} : vector<16x256xf32> to vector<16x128xf32>
    %558 = arith.maximumf %556, %557 : vector<16x128xf32>
    %559 = vector.broadcast %457 : vector<1x128xf32> to vector<16x128xf32>
    %560 = arith.addf %558, %559 : vector<16x128xf32>
    %cst_323 = arith.constant 0.000000e+00 : f32
    %561 = vector.broadcast %cst_323 : f32 to vector<16x128xf32>
    %562 = arith.cmpf ogt, %560, %561 : vector<16x128xf32>
    %563 = math.exp %560 : vector<16x128xf32>
    %cst_324 = arith.constant 1.000000e+00 : f32
    %564 = vector.broadcast %cst_324 : f32 to vector<16x128xf32>
    %565 = arith.subf %563, %564 : vector<16x128xf32>
    %cst_325 = arith.constant 1.67326319 : f32
    %566 = vector.broadcast %cst_325 : f32 to vector<16x128xf32>
    %567 = arith.mulf %566, %565 : vector<16x128xf32>
    %568 = arith.select %562, %560, %567 : vector<16x128xi1>, vector<16x128xf32>
    %cst_326 = arith.constant 1.05070102 : f32
    %569 = vector.broadcast %cst_326 : f32 to vector<16x128xf32>
    %570 = arith.mulf %569, %568 : vector<16x128xf32>
    %c0_327 = arith.constant 0 : index
    %c640 = arith.constant 640 : index
    %571 = vector.load %arg14[%c0_327, %c640] : memref<16x896xf32, #tpu.memory_space<vmem>>, vector<16x128xf32>
    tpu.vector_store %arg14[%c0_327, %c640], %570 {strides = array<i32>} : memref<16x896xf32, #tpu.memory_space<vmem>>, vector<16x128xf32>,
    %572 = vector.extract_strided_slice %456 {offsets = [96, 0], sizes = [16, 256], strides = [1, 1]} : vector<224x256xf32> to vector<16x256xf32>
    %573 = vector.extract_strided_slice %456 {offsets = [208, 0], sizes = [16, 256], strides = [1, 1]} : vector<224x256xf32> to vector<16x256xf32>
    %574 = arith.maximumf %572, %573 : vector<16x256xf32>
    %575 = vector.extract_strided_slice %574 {offsets = [0, 0], sizes = [16, 128], strides = [1, 1]} : vector<16x256xf32> to vector<16x128xf32>
    %576 = vector.extract_strided_slice %574 {offsets = [0, 128], sizes = [16, 128], strides = [1, 1]} : vector<16x256xf32> to vector<16x128xf32>
    %577 = arith.maximumf %575, %576 : vector<16x128xf32>
    %578 = vector.broadcast %457 : vector<1x128xf32> to vector<16x128xf32>
    %579 = arith.addf %577, %578 : vector<16x128xf32>
    %cst_328 = arith.constant 0.000000e+00 : f32
    %580 = vector.broadcast %cst_328 : f32 to vector<16x128xf32>
    %581 = arith.cmpf ogt, %579, %580 : vector<16x128xf32>
    %582 = math.exp %579 : vector<16x128xf32>
    %cst_329 = arith.constant 1.000000e+00 : f32
    %583 = vector.broadcast %cst_329 : f32 to vector<16x128xf32>
    %584 = arith.subf %582, %583 : vector<16x128xf32>
    %cst_330 = arith.constant 1.67326319 : f32
    %585 = vector.broadcast %cst_330 : f32 to vector<16x128xf32>
    %586 = arith.mulf %585, %584 : vector<16x128xf32>
    %587 = arith.select %581, %579, %586 : vector<16x128xi1>, vector<16x128xf32>
    %cst_331 = arith.constant 1.05070102 : f32
    %588 = vector.broadcast %cst_331 : f32 to vector<16x128xf32>
    %589 = arith.mulf %588, %587 : vector<16x128xf32>
    %c0_332 = arith.constant 0 : index
    %c768 = arith.constant 768 : index
    %590 = vector.load %arg14[%c0_332, %c768] : memref<16x896xf32, #tpu.memory_space<vmem>>, vector<16x128xf32>
    tpu.vector_store %arg14[%c0_332, %c768], %589 {strides = array<i32>} : memref<16x896xf32, #tpu.memory_space<vmem>>, vector<16x128xf32>,
    %c0_333 = arith.constant 0 : index
    %c0_334 = arith.constant 0 : index
    %591 = vector.load %arg14[%c0_333, %c0_334] : memref<16x896xf32, #tpu.memory_space<vmem>>, vector<16x896xf32>
    %c0_335 = arith.constant 0 : index
    %c0_336 = arith.constant 0 : index
    %592 = vector.load %arg7[%c0_335, %c0_336] : memref<896x128xf32, #tpu.memory_space<vmem>>, vector<896x128xf32>
    %cst_337 = arith.constant dense<0.000000e+00> : vector<16x128xf32>
    %593 = tpu.matmul %591, %592, %cst_337 {dimension_numbers = #tpu.dot_dimension_numbers<[1], [0], [0], [1], [0, 0, 1, 1], [], []>} : vector<16x896xf32>, vector<896x128xf32>, vector<16x128xf32> -> vector<16x128xf32>
    %c0_338 = arith.constant 0 : index
    %c0_339 = arith.constant 0 : index
    %594 = vector.load %arg8[%c0_338, %c0_339] : memref<1x128xf32, #tpu.memory_space<vmem>>, vector<1x128xf32>
    %595 = vector.broadcast %594 : vector<1x128xf32> to vector<16x128xf32>
    %596 = arith.addf %593, %595 : vector<16x128xf32>
    %cst_340 = arith.constant 0.000000e+00 : f32
    %597 = vector.broadcast %cst_340 : f32 to vector<16x128xf32>
    %598 = arith.cmpf ogt, %596, %597 : vector<16x128xf32>
    %599 = math.exp %596 : vector<16x128xf32>
    %cst_341 = arith.constant 1.000000e+00 : f32
    %600 = vector.broadcast %cst_341 : f32 to vector<16x128xf32>
    %601 = arith.subf %599, %600 : vector<16x128xf32>
    %cst_342 = arith.constant 1.67326319 : f32
    %602 = vector.broadcast %cst_342 : f32 to vector<16x128xf32>
    %603 = arith.mulf %602, %601 : vector<16x128xf32>
    %604 = arith.select %598, %596, %603 : vector<16x128xi1>, vector<16x128xf32>
    %cst_343 = arith.constant 1.05070102 : f32
    %605 = vector.broadcast %cst_343 : f32 to vector<16x128xf32>
    %606 = arith.mulf %605, %604 : vector<16x128xf32>
    %c0_344 = arith.constant 0 : index
    %c0_345 = arith.constant 0 : index
    %607 = vector.load %arg9[%c0_344, %c0_345] : memref<128x128xf32, #tpu.memory_space<vmem>>, vector<128x128xf32>
    %cst_346 = arith.constant dense<0.000000e+00> : vector<16x128xf32>
    %608 = tpu.matmul %606, %607, %cst_346 {dimension_numbers = #tpu.dot_dimension_numbers<[1], [0], [0], [1], [0, 0, 1, 1], [], []>} : vector<16x128xf32>, vector<128x128xf32>, vector<16x128xf32> -> vector<16x128xf32>
    %c0_347 = arith.constant 0 : index
    %c0_348 = arith.constant 0 : index
    %609 = vector.load %arg10[%c0_347, %c0_348] : memref<1x128xf32, #tpu.memory_space<vmem>>, vector<1x128xf32>
    %610 = vector.broadcast %609 : vector<1x128xf32> to vector<16x128xf32>
    %611 = arith.addf %608, %610 : vector<16x128xf32>
    %612 = vector.extract_strided_slice %611 {offsets = [0, 0], sizes = [16, 10], strides = [1, 1]} : vector<16x128xf32> to vector<16x10xf32>
    %cst_349 = arith.constant dense<0xFF800000> : vector<16xf32>
    %613 = vector.multi_reduction <maximumf>, %612, %cst_349 [1] : vector<16x10xf32> to vector<16xf32>
    %614 = vector.shape_cast %613 : vector<16xf32> to vector<16x1xf32>
    %615 = vector.broadcast %614 : vector<16x1xf32> to vector<16x10xf32>
    %616 = arith.subf %612, %615 : vector<16x10xf32>
    %617 = math.exp %616 : vector<16x10xf32>
    %cst_350 = arith.constant dense<0.000000e+00> : vector<16xf32>
    %618 = vector.multi_reduction <add>, %617, %cst_350 [1] : vector<16x10xf32> to vector<16xf32>
    %619 = vector.shape_cast %618 : vector<16xf32> to vector<16x1xf32>
    %620 = math.log %619 : vector<16x1xf32>
    %621 = arith.addf %614, %620 : vector<16x1xf32>
    %622 = vector.broadcast %621 : vector<16x1xf32> to vector<16x128xf32>
    %623 = arith.subf %611, %622 : vector<16x128xf32>
    %c0_351 = arith.constant 0 : index
    %c0_352 = arith.constant 0 : index
    %624 = vector.load %arg11[%c0_351, %c0_352] : memref<16x128xf32, #tpu.memory_space<vmem>>, vector<16x128xf32>
    tpu.vector_store %arg11[%c0_351, %c0_352], %623 {strides = array<i32>} : memref<16x128xf32, #tpu.memory_space<vmem>>, vector<16x128xf32>,
    return
  }
  func.func @transform_0(%arg0: i32) -> (i32, i32, i32) {
    %c0_i32 = arith.constant 0 : i32
    %c0_i32_0 = arith.constant 0 : i32
    %c0_i32_1 = arith.constant 0 : i32
    return %c0_i32, %arg0, %c0_i32_0 : i32, i32, i32
  }
  func.func @transform_1(%arg0: i32) -> (i32, i32) {
    %c0_i32 = arith.constant 0 : i32
    %c0_i32_0 = arith.constant 0 : i32
    %c0_i32_1 = arith.constant 0 : i32
    return %c0_i32, %c0_i32_0 : i32, i32
  }
  func.func @transform_2(%arg0: i32) -> (i32, i32) {
    %c0_i32 = arith.constant 0 : i32
    %c0_i32_0 = arith.constant 0 : i32
    %c0_i32_1 = arith.constant 0 : i32
    return %c0_i32, %c0_i32_0 : i32, i32
  }
  func.func @transform_3(%arg0: i32) -> (i32, i32) {
    %c0_i32 = arith.constant 0 : i32
    %c0_i32_0 = arith.constant 0 : i32
    %c0_i32_1 = arith.constant 0 : i32
    return %c0_i32, %c0_i32_0 : i32, i32
  }
  func.func @transform_4(%arg0: i32) -> (i32, i32) {
    %c0_i32 = arith.constant 0 : i32
    %c0_i32_0 = arith.constant 0 : i32
    %c0_i32_1 = arith.constant 0 : i32
    return %c0_i32, %c0_i32_0 : i32, i32
  }
  func.func @transform_5(%arg0: i32) -> (i32, i32) {
    %c0_i32 = arith.constant 0 : i32
    %c0_i32_0 = arith.constant 0 : i32
    %c0_i32_1 = arith.constant 0 : i32
    return %c0_i32, %c0_i32_0 : i32, i32
  }
  func.func @transform_6(%arg0: i32) -> (i32, i32) {
    %c0_i32 = arith.constant 0 : i32
    %c0_i32_0 = arith.constant 0 : i32
    %c0_i32_1 = arith.constant 0 : i32
    return %c0_i32, %c0_i32_0 : i32, i32
  }
  func.func @transform_7(%arg0: i32) -> (i32, i32) {
    %c0_i32 = arith.constant 0 : i32
    %c0_i32_0 = arith.constant 0 : i32
    %c0_i32_1 = arith.constant 0 : i32
    return %c0_i32, %c0_i32_0 : i32, i32
  }
  func.func @transform_8(%arg0: i32) -> (i32, i32) {
    %c0_i32 = arith.constant 0 : i32
    %c0_i32_0 = arith.constant 0 : i32
    %c0_i32_1 = arith.constant 0 : i32
    return %c0_i32, %c0_i32_0 : i32, i32
  }
  func.func @transform_9(%arg0: i32) -> (i32, i32) {
    %c0_i32 = arith.constant 0 : i32
    %c0_i32_0 = arith.constant 0 : i32
    %c0_i32_1 = arith.constant 0 : i32
    return %c0_i32, %c0_i32_0 : i32, i32
  }
  func.func @transform_10(%arg0: i32) -> (i32, i32) {
    %c0_i32 = arith.constant 0 : i32
    %c0_i32_0 = arith.constant 0 : i32
    return %arg0, %c0_i32 : i32, i32
  }
}

</mosaic_0001>

<bundles_post_ra>
// kernel: tile.18
= control target key start
LH: loop header
LB: loop body
LE: loop exit
PB: predicated region body
PF: predicated region fallthrough
CT: control target
= control target key end

     0   :  { %s22_s0 = inlined_call_operand.vmem [shape: f32[16], index: 0, kind: input, shape index: {}]   ;;  %s23_s1 = inlined_call_operand.vmem [shape: f32[7,16], index: 1, kind: output, shape index: {}]  }
   0x1   :  { %v4_v0 = vld [vmem:[%s22_s0] ss:$0 sm:$0xff] }
   0x2   :  { %5 = vst [vmem:[%s23_s1] sm:$0xff] %v4_v0 }

// kernel: tile.19
= control target key start
LH: loop header
LB: loop body
LE: loop exit
PB: predicated region body
PF: predicated region fallthrough
CT: control target
= control target key end

     0   :  { %s59_s10 = smov 96   ;;  %s60_s11 = smov 64   ;;  %vm3_vm0 = vcmask 130048   ;;  %vm9_vm1 = vcmask 917248   ;;  %vm15_vm2 = vcmask 786048   ;;  %vm21_vm3 = vcmask 654848   ;;  %s99_s0 = inlined_call_operand.vmem [shape: f32[7,16], index: 0, kind: input, shape index: {}]   ;;  %s100_s1 = inlined_call_operand.vmem [shape: f32[112], index: 1, kind: output, shape index: {}]  }
   0x1   :  { %v47_v0 = vld [vmem:[%s99_s0 + $0x6] sm:$0x1]   ;;  %v49_v1 = vld [vmem:[%s99_s0 + $0x4] sm:$0x1]   ;;  %v48_v2 = vld [vmem:[%s99_s0 + $0x5] sm:$0x1]  }
   0x2   :  { %7 = vrot.lane.b32.xlu0 %v47_v0, %s59_s10  ;;  %19 = vrot.lane.b32.xlu1 %v49_v1, %s60_s11  ;;  %v50_v3 = vld [vmem:[%s99_s0 + $0x3] sm:$0x1]   ;;  %v2_v4 = vld [vmem:[%s99_s0] sm:$0x1]   ;;  %s61_s18 = smov 80   ;;  %s62_s19 = smov 48  }
   0x3   :  { %4 = vst.msk [vmem:[#allocation0] sm:$0x1] %vm3_vm0, %v2_v4   ;;  %v51_v5 = vld [vmem:[%s99_s0 + $0x2] sm:$0x1]   ;;  %v52_v6 = vld [vmem:[%s99_s0 + $0x1] sm:$0x1]  }
   0x4   :  { %s63_s0 = smov 32   ;;  %s64_s24 = smov 16   ;;  %vm27_vm4 = vcmask 523648   ;;  %vm33_vm5 = vcmask 392448   ;;  %vm39_vm6 = vcmask 261248  }
   0x6   :  { %13 = vrot.lane.b32.xlu0 %v48_v2, %s61_s18  ;;  %25 = vrot.lane.b32.xlu1 %v50_v3, %s62_s19 }
   0xa   :  { %31 = vrot.lane.b32.xlu0 %v51_v5, %s63_s0  ;;  %37 = vrot.lane.b32.xlu1 %v52_v6, %s64_s24 }
  0x74   :  { %v8_v7 = vpop.permute.xlu0 %7   ;;  %v20_v8 = vpop.permute.xlu1 %19  }
  0x75   :  { %10 = vst.msk [vmem:[#allocation0] sm:$0x1] %vm9_vm1, %v8_v7  }
  0x78   :  { %v14_v9 = vpop.permute.xlu0 %13   ;;  %v26_v10 = vpop.permute.xlu1 %25  }
  0x79   :  { %16 = vst.msk [vmem:[#allocation0] sm:$0x1] %vm15_vm2, %v14_v9  }
  0x7a   :  { %22 = vst.msk [vmem:[#allocation0] sm:$0x1] %vm21_vm3, %v20_v8  }
  0x7b   :  { %28 = vst.msk [vmem:[#allocation0] sm:$0x1] %vm27_vm4, %v26_v10  }
  0x7c   :  { %v32_v11 = vpop.permute.xlu0 %31   ;;  %v38_v12 = vpop.permute.xlu1 %37  }
  0x7d   :  { %34 = vst.msk [vmem:[#allocation0] sm:$0x1] %vm33_vm5, %v32_v11  }
  0x7e   :  { %40 = vst.msk [vmem:[#allocation0] sm:$0x1] %vm39_vm6, %v38_v12  }
  0x85   :  { %v44_v13 = vld [vmem:[#allocation0] sm:$0x1] }
  0x86   :  { %46 = vst [vmem:[%s100_s1] sm:$0x1] %v44_v13 }

// kernel: tile.13
= control target key start
LH: loop header
LB: loop body
LE: loop exit
PB: predicated region body
PF: predicated region fallthrough
CT: control target
= control target key end

     0   :  { %s28_s0 = inlined_call_operand.vmem [shape: f32[8], index: 0, kind: input, shape index: {}]   ;;  %s29_s1 = inlined_call_operand.vmem [shape: f32[16,8], index: 1, kind: output, shape index: {}]  }
   0x1   :  { %v4_v0 = vld [vmem:[%s28_s0] ss:$0 sm:$0xff] }
   0x2   :  { %5 = vst [vmem:[%s29_s1] sm:$0xff] %v4_v0  ;;  %8 = vst [vmem:[%s29_s1 + $0x8] sm:$0xff] %v4_v0 }

// kernel: tile.14
= control target key start
LH: loop header
LB: loop body
LE: loop exit
PB: predicated region body
PF: predicated region fallthrough
CT: control target
= control target key end

     0   :  { %s131_s10 = smov 120   ;;  %s132_s11 = smov 104   ;;  %vm3_vm0 = vcmask 64512   ;;  %vm9_vm1 = vcmask 1048512   ;;  %vm15_vm2 = vcmask 982912   ;;  %vm21_vm3 = vcmask 917312   ;;  %s207_s0 = inlined_call_operand.vmem [shape: f32[16,8], index: 0, kind: input, shape index: {}]   ;;  %s208_s1 = inlined_call_operand.vmem [shape: f32[1,128], index: 1, kind: output, shape index: {}]  }
   0x1   :  { %v101_v0 = vld [vmem:[%s207_s0 + $0xf] sm:$0x1]   ;;  %v103_v1 = vld [vmem:[%s207_s0 + $0xd] sm:$0x1]   ;;  %v102_v2 = vld [vmem:[%s207_s0 + $0xe] sm:$0x1]  }
   0x2   :  { %7 = vrot.lane.b32.xlu0 %v101_v0, %s131_s10  ;;  %19 = vrot.lane.b32.xlu1 %v103_v1, %s132_s11  ;;  %v104_v3 = vld [vmem:[%s207_s0 + $0xc] sm:$0x1]   ;;  %s133_s16 = smov 112   ;;  %s134_s17 = smov 96   ;;  %v105_v4 = vld [vmem:[%s207_s0 + $0xb] sm:$0x1]  }
   0x3   :  { %v106_v5 = vld [vmem:[%s207_s0 + $0xa] sm:$0x1]   ;;  %v2_v6 = vld [vmem:[%s207_s0] sm:$0x1]   ;;  %s135_s24 = smov 88   ;;  %s136_s25 = smov 80  }
   0x4   :  { %4 = vst.msk [vmem:[#allocation0] sm:$0x1] %vm3_vm0, %v2_v6   ;;  %v107_v7 = vld [vmem:[%s207_s0 + $0x9] sm:$0x1]   ;;  %v108_v8 = vld [vmem:[%s207_s0 + $0x8] sm:$0x1]  }
   0x5   :  { %s137_s30 = smov 72   ;;  %s138_s2 = smov 64   ;;  %v109_v9 = vld [vmem:[%s207_s0 + $0x7] sm:$0x1]   ;;  %v110_v10 = vld [vmem:[%s207_s0 + $0x6] sm:$0x1]  }
   0x6   :  { %13 = vrot.lane.b32.xlu0 %v102_v2, %s133_s16  ;;  %25 = vrot.lane.b32.xlu1 %v104_v3, %s134_s17  ;;  %s139_s7 = smov 56   ;;  %s140_s8 = smov 48   ;;  %v111_v11 = vld [vmem:[%s207_s0 + $0x5] sm:$0x1]   ;;  %v112_v12 = vld [vmem:[%s207_s0 + $0x4] sm:$0x1]  }
   0x7   :  { %s141_s13 = smov 40   ;;  %s142_s14 = smov 32   ;;  %v113_v13 = vld [vmem:[%s207_s0 + $0x3] sm:$0x1]   ;;  %v114_v14 = vld [vmem:[%s207_s0 + $0x2] sm:$0x1]  }
   0x8   :  { %s143_s19 = smov 24   ;;  %s144_s20 = smov 16   ;;  %v115_v15 = vld [vmem:[%s207_s0 + $0x1] sm:$0x1]   ;;  %vm27_vm4 = vcmask 851712   ;;  %vm33_vm5 = vcmask 786112  }
   0x9   :  { %s145_s0 = smov 8   ;;  %vm39_vm6 = vcmask 720512   ;;  %vm45_vm7 = vcmask 654912   ;;  %vm51_vm8 = vcmask 589312   ;;  %vm57_vm9 = vcmask 523712  }
   0xa   :  { %31 = vrot.lane.b32.xlu0 %v105_v4, %s135_s24  ;;  %37 = vrot.lane.b32.xlu1 %v106_v5, %s136_s25  ;;  %vm63_vm10 = vcmask 458112   ;;  %vm69_vm11 = vcmask 392512   ;;  %vm75_vm12 = vcmask 326912   ;;  %vm81_vm13 = vcmask 261312  }
   0xb   :  { %vm87_vm14 = vcmask 195712   ;;  %vm93_vm15 = vcmask 130112  }
   0xe   :  { %43 = vrot.lane.b32.xlu0 %v107_v7, %s137_s30  ;;  %49 = vrot.lane.b32.xlu1 %v108_v8, %s138_s2 }
  0x12   :  { %55 = vrot.lane.b32.xlu0 %v109_v9, %s139_s7  ;;  %61 = vrot.lane.b32.xlu1 %v110_v10, %s140_s8 }
  0x16   :  { %67 = vrot.lane.b32.xlu0 %v111_v11, %s141_s13  ;;  %73 = vrot.lane.b32.xlu1 %v112_v12, %s142_s14 }
  0x1a   :  { %79 = vrot.lane.b32.xlu0 %v113_v13, %s143_s19  ;;  %85 = vrot.lane.b32.xlu1 %v114_v14, %s144_s20 }
  0x1e   :  { %91 = vrot.lane.b32.xlu0 %v115_v15, %s145_s0 }
  0x74   :  { %v8_v16 = vpop.permute.xlu0 %7   ;;  %v20_v17 = vpop.permute.xlu1 %19  }
  0x75   :  { %10 = vst.msk [vmem:[#allocation0] sm:$0x1] %vm9_vm1, %v8_v16  }
  0x78   :  { %v14_v18 = vpop.permute.xlu0 %13   ;;  %v26_v19 = vpop.permute.xlu1 %25  }
  0x79   :  { %16 = vst.msk [vmem:[#allocation0] sm:$0x1] %vm15_vm2, %v14_v18  }
  0x7a   :  { %22 = vst.msk [vmem:[#allocation0] sm:$0x1] %vm21_vm3, %v20_v17  }
  0x7b   :  { %28 = vst.msk [vmem:[#allocation0] sm:$0x1] %vm27_vm4, %v26_v19  }
  0x7c   :  { %v32_v20 = vpop.permute.xlu0 %31   ;;  %v38_v21 = vpop.permute.xlu1 %37  }
  0x7d   :  { %34 = vst.msk [vmem:[#allocation0] sm:$0x1] %vm33_vm5, %v32_v20  }
  0x7e   :  { %40 = vst.msk [vmem:[#allocation0] sm:$0x1] %vm39_vm6, %v38_v21  }
  0x80   :  { %v44_v22 = vpop.permute.xlu0 %43   ;;  %v50_v23 = vpop.permute.xlu1 %49  }
  0x81   :  { %46 = vst.msk [vmem:[#allocation0] sm:$0x1] %vm45_vm7, %v44_v22  }
  0x82   :  { %52 = vst.msk [vmem:[#allocation0] sm:$0x1] %vm51_vm8, %v50_v23  }
  0x84   :  { %v56_v24 = vpop.permute.xlu0 %55   ;;  %v62_v25 = vpop.permute.xlu1 %61  }
  0x85   :  { %58 = vst.msk [vmem:[#allocation0] sm:$0x1] %vm57_vm9, %v56_v24  }
  0x86   :  { %64 = vst.msk [vmem:[#allocation0] sm:$0x1] %vm63_vm10, %v62_v25  }
  0x88   :  { %v68_v26 = vpop.permute.xlu0 %67   ;;  %v74_v27 = vpop.permute.xlu1 %73  }
  0x89   :  { %70 = vst.msk [vmem:[#allocation0] sm:$0x1] %vm69_vm11, %v68_v26  }
  0x8a   :  { %76 = vst.msk [vmem:[#allocation0] sm:$0x1] %vm75_vm12, %v74_v27  }
  0x8c   :  { %v80_v28 = vpop.permute.xlu0 %79   ;;  %v86_v29 = vpop.permute.xlu1 %85  }
  0x8d   :  { %82 = vst.msk [vmem:[#allocation0] sm:$0x1] %vm81_vm13, %v80_v28  }
  0x8e   :  { %88 = vst.msk [vmem:[#allocation0] sm:$0x1] %vm87_vm14, %v86_v29  }
  0x90   :  { %v92_v30 = vpop.permute.xlu0 %91  }
  0x91   :  { %94 = vst.msk [vmem:[#allocation0] sm:$0x1] %vm93_vm15, %v92_v30  }
  0x98   :  { %v98_v31 = vld [vmem:[#allocation0] sm:$0x1] }
  0x99   :  { %100 = vst [vmem:[%s208_s1] sm:$0x1] %v98_v31 }

// kernel: net_forward.1
= control target key start
LH: loop header
LB: loop body
LE: loop exit
PB: predicated region body
PF: predicated region fallthrough
CT: control target
= control target key end

     0   :  { %v4416_v1 = vmov 0   ;;  %vm231_vm0 = vcmask 1043456   ;;  %vm227_vm1 = vcmask 982016   ;;  %s6329_s1 = inlined_call_operand.vmem [shape: bf16[120,512], index: 1, kind: input, shape index: {}]   ;;  %s6330_s0 = inlined_call_operand.vmem [shape: bf16[14,16,120], index: 0, kind: input, shape index: {}]   ;;  %s6331_s2 = inlined_call_operand.vmem [shape: f32[1,128], index: 2, kind: input, shape index: {}]   ;;  %s6332_s3 = inlined_call_operand.vmem [shape: f32[1,128], index: 3, kind: input, shape index: {}]   ;;  %s6333_s4 = inlined_call_operand.vmem [shape: bf16[384,256], index: 4, kind: input, shape index: {}]   ;;  %s6334_s6 = inlined_call_operand.vmem [shape: f32[896,128], index: 6, kind: input, shape index: {}]   ;;  %s6335_s5 = inlined_call_operand.vmem [shape: f32[1,128], index: 5, kind: input, shape index: {}]   ;;  %s6336_s8 = inlined_call_operand.vmem [shape: f32[128,128], index: 8, kind: input, shape index: {}]   ;;  %s6337_s7 = inlined_call_operand.vmem [shape: f32[1,128], index: 7, kind: input, shape index: {}]   ;;  %s6338_s9 = inlined_call_operand.vmem [shape: f32[1,128], index: 9, kind: input, shape index: {}]   ;;  %s6339_s10 = inlined_call_operand.vmem [shape: f32[16,128], index: 10, kind: output, shape index: {}]  }
   0x1   :  { %v4475_v0 = vld [vmem:[%s6329_s1 + $0x4] ss:$16 sps:$4 sm:$0xff]   ;;  %276 = vmatprep.mubr.bf16.mxu0 %v4416_v1  ;;  %319 = vmatprep.mubr.bf16.mxu1 %v4416_v1  ;;  %v4482_v2 = vld [vmem:[%s6329_s1 + $0xc] ss:$16 sps:$4 sm:$0xff]   ;;  %v4488_v3 = vld [vmem:[%s6329_s1] ss:$16 sps:$4 sm:$0xff]  }
   0x2   :  { %244 = vmatprep.subr.bf16.mxu0 %v4475_v0  ;;  %v4493_v4 = vld [vmem:[%s6329_s1 + $0x8] ss:$16 sps:$4 sm:$0xff]   ;;  %287 = vmatprep.subr.bf16.mxu1 %v4482_v2  ;;  %v4499_v5 = vld [vmem:[%s6329_s1 + $0x24] ss:$16 sps:$4 sm:$0xff]   ;;  %v4506_v6 = vld [vmem:[%s6329_s1 + $0x2c] ss:$16 sps:$4 sm:$0xff]  }
   0x3   :  { %245 = vmatpush1.bf16.msra.mxu0 %v4488_v3  ;;  %288 = vmatpush1.bf16.msra.mxu1 %v4493_v4  ;;  %v4511_v7 = vld [vmem:[%s6329_s1 + $0x20] ss:$16 sps:$4 sm:$0xff]   ;;  %v4517_v8 = vld [vmem:[%s6329_s1 + $0x28] ss:$16 sps:$4 sm:$0xff]   ;;  %v4523_v9 = vld [vmem:[%s6329_s1 + $0x44] ss:$16 sps:$4 sm:$0xff]  }
   0x4   :  { %246 = vmatprep.subr.bf16.mxu0 %v4499_v5  ;;  %289 = vmatprep.subr.bf16.mxu1 %v4506_v6  ;;  %v4528_v10 = vld [vmem:[%s6329_s1 + $0x4c] ss:$16 sps:$4 sm:$0xff]   ;;  %v4533_v11 = vld [vmem:[%s6329_s1 + $0x40] ss:$16 sps:$4 sm:$0xff]   ;;  %v4538_v12 = vld [vmem:[%s6329_s1 + $0x48] ss:$16 sps:$4 sm:$0xff]  }
   0x5   :  { %v4545_v13 = vld [vmem:[%s6329_s1 + $0x64] ss:$16 sps:$4 sm:$0xff]   ;;  %v4552_v14 = vld [vmem:[%s6329_s1 + $0x6c] ss:$16 sps:$4 sm:$0xff]   ;;  %v4557_v15 = vld [vmem:[%s6329_s1 + $0x60] ss:$16 sps:$4 sm:$0xff]  }
   0x6   :  { %v4564_v16 = vld [vmem:[%s6329_s1 + $0x68] ss:$16 sps:$4 sm:$0xff]   ;;  %v4569_v17 = vld [vmem:[%s6329_s1 + $0x84] ss:$16 sps:$4 sm:$0xff]   ;;  %v4576_v18 = vld [vmem:[%s6329_s1 + $0x8c] ss:$16 sps:$4 sm:$0xff]  }
   0x7   :  { %247 = vmatpush1.bf16.msra.mxu0 %v4511_v7  ;;  %290 = vmatpush1.bf16.msra.mxu1 %v4517_v8  ;;  %v4581_v19 = vld [vmem:[%s6329_s1 + $0x80] ss:$16 sps:$4 sm:$0xff]   ;;  %v4586_v20 = vld [vmem:[%s6329_s1 + $0x88] ss:$16 sps:$4 sm:$0xff]   ;;  %v4593_v21 = vld [vmem:[%s6329_s1 + $0xa4] ss:$16 sps:$4 sm:$0xff]  }
   0x8   :  { %248 = vmatprep.subr.bf16.mxu0 %v4523_v9  ;;  %291 = vmatprep.subr.bf16.mxu1 %v4528_v10  ;;  %v4600_v22 = vld [vmem:[%s6329_s1 + $0xac] ss:$16 sps:$4 sm:$0xff]   ;;  %v4605_v23 = vld [vmem:[%s6329_s1 + $0xa0] ss:$16 sps:$4 sm:$0xff]   ;;  %v4610_v24 = vld [vmem:[%s6329_s1 + $0xa8] ss:$16 sps:$4 sm:$0xff]  }
   0x9   :  { %v64_v25 = vld [vmem:[%s6329_s1 + $0xe0] sm:$0xff]  ;;  %v65_v26 = vld [vmem:[%s6329_s1 + $0xe8] sm:$0xff]  ;;  %v4206_v39 = vld [vmem:[%s6330_s0 + $0x10] sm:$0xff]  }
   0xa   :  { %v3509_v27 = vcombine.low %v64_v25, %v64_v25  ;;  %v4623_v28 = vld [vmem:[%s6329_s1 + $0xc4] ss:$16 sps:$4 sm:$0xff]   ;;  %v3511_v29 = vcombine.low %v65_v26, %v65_v26  ;;  %v4630_v30 = vld [vmem:[%s6329_s1 + $0xcc] ss:$16 sps:$4 sm:$0xff]   ;;  %v4635_v31 = vld [vmem:[%s6329_s1 + $0xc0] ss:$16 sps:$4 sm:$0xff]   ;;  %v4652_v35 = vcombine.high %v64_v25, %v64_v25  ;;  %v4654_v36 = vcombine.high %v65_v26, %v65_v26 }
   0xb   :  { %249 = vmatpush1.bf16.msra.mxu0 %v4533_v11  ;;  %292 = vmatpush1.bf16.msra.mxu1 %v4538_v12  ;;  %v4640_v32 = vld [vmem:[%s6329_s1 + $0xc8] ss:$16 sps:$4 sm:$0xff]   ;;  %v4204_v37 = vld [vmem:[%s6330_s0] sm:$0xff]   ;;  %v4210_v43 = vld [vmem:[%s6330_s0 + $0x30] sm:$0xff]  }
   0xc   :  { %250 = vmatprep.subr.bf16.mxu0 %v4545_v13  ;;  %293 = vmatprep.subr.bf16.mxu1 %v4552_v14  ;;  %v4643_v33 = vsel %vm231_vm0, %v3509_v27, 0  ;;  %v4646_v34 = vsel %vm231_vm0, %v3511_v29, 0  ;;  %v4205_v38 = vld [vmem:[%s6330_s0 + $0x8] sm:$0xff]   ;;  %v4207_v40 = vld [vmem:[%s6330_s0 + $0x18] sm:$0xff]   ;;  %v4208_v41 = vld [vmem:[%s6330_s0 + $0x20] sm:$0xff]  }
   0xd   :  { %v4209_v42 = vld [vmem:[%s6330_s0 + $0x28] sm:$0xff]   ;;  %v4944_v52 = vld [vmem:[%s6331_s2] ss:$0 sm:$0xff]  ;;  %v4211_v62 = vld [vmem:[%s6330_s0 + $0x38] sm:$0xff]  }
   0xf   :  { %251 = vmatpush1.bf16.msra.mxu0 %v4557_v15  ;;  %294 = vmatpush1.bf16.msra.mxu1 %v4564_v16 }
  0x10   :  { %252 = vmatprep.subr.bf16.mxu0 %v4569_v17  ;;  %295 = vmatprep.subr.bf16.mxu1 %v4576_v18 }
  0x13   :  { %253 = vmatpush1.bf16.msra.mxu0 %v4581_v19  ;;  %296 = vmatpush1.bf16.msra.mxu1 %v4586_v20 }
  0x14   :  { %254 = vmatprep.subr.bf16.mxu0 %v4593_v21  ;;  %297 = vmatprep.subr.bf16.mxu1 %v4600_v22 }
  0x17   :  { %255 = vmatpush1.bf16.msra.mxu0 %v4605_v23  ;;  %298 = vmatpush1.bf16.msra.mxu1 %v4610_v24 }
  0x18   :  { %256 = vmatprep.subr.bf16.mxu0 %v4623_v28  ;;  %299 = vmatprep.subr.bf16.mxu1 %v4630_v30 }
  0x1b   :  { %257 = vmatpush1.bf16.msra.mxu0 %v4635_v31  ;;  %300 = vmatpush1.bf16.msra.mxu1 %v4640_v32 }
  0x1c   :  { %3513 = vmatprep.subr.msk.bf16.mxu0 %vm231_vm0, %v4652_v35  ;;  %3515 = vmatprep.subr.msk.bf16.mxu1 %vm231_vm0, %v4654_v36 }
  0x1f   :  { %259 = vmatpush1.bf16.msra.mxu0 %v4643_v33  ;;  %302 = vmatpush1.bf16.msra.mxu1 %v4646_v34 }
  0x20   :  { %379 = vmatprep.subr.bf16.mxu0 %v4475_v0  ;;  %422 = vmatprep.subr.bf16.mxu1 %v4482_v2 }
  0x22   :  { %3514 = vmatmul.mubr.msk.bf16.vlgmr.msra.gmra.mrb[0].mxu0 %vm227_vm1, %v4204_v37  ;;  %3516 = vmatmul.mubr.msk.bf16.vlgmr.msra.gmra.mrb[0].mxu1 %vm227_vm1, %v4204_v37 }
  0x23   :  { %380 = vmatpush1.bf16.msra.mxu0 %v4488_v3  ;;  %423 = vmatpush1.bf16.msra.mxu1 %v4493_v4 }
  0x24   :  { %381 = vmatprep.subr.bf16.mxu0 %v4499_v5  ;;  %424 = vmatprep.subr.bf16.mxu1 %v4506_v6 }
  0x25   :  { %411 = vmatprep.mubr.bf16.mxu0 %v4416_v1  ;;  %454 = vmatprep.mubr.bf16.mxu1 %v4416_v1 }
  0x27   :  { %382 = vmatpush1.bf16.msra.mxu0 %v4511_v7  ;;  %425 = vmatpush1.bf16.msra.mxu1 %v4517_v8 }
  0x28   :  { %383 = vmatprep.subr.bf16.mxu0 %v4523_v9  ;;  %426 = vmatprep.subr.bf16.mxu1 %v4528_v10 }
  0x2b   :  { %384 = vmatpush1.bf16.msra.mxu0 %v4533_v11  ;;  %427 = vmatpush1.bf16.msra.mxu1 %v4538_v12 }
  0x2c   :  { %385 = vmatprep.subr.bf16.mxu0 %v4545_v13  ;;  %428 = vmatprep.subr.bf16.mxu1 %v4552_v14 }
  0x2f   :  { %386 = vmatpush1.bf16.msra.mxu0 %v4557_v15  ;;  %429 = vmatpush1.bf16.msra.mxu1 %v4564_v16 }
  0x30   :  { %387 = vmatprep.subr.bf16.mxu0 %v4569_v17  ;;  %430 = vmatprep.subr.bf16.mxu1 %v4576_v18 }
  0x33   :  { %388 = vmatpush1.bf16.msra.mxu0 %v4581_v19  ;;  %431 = vmatpush1.bf16.msra.mxu1 %v4586_v20 }
  0x34   :  { %389 = vmatprep.subr.bf16.mxu0 %v4593_v21  ;;  %432 = vmatprep.subr.bf16.mxu1 %v4600_v22 }
  0x37   :  { %390 = vmatpush1.bf16.msra.mxu0 %v4605_v23  ;;  %433 = vmatpush1.bf16.msra.mxu1 %v4610_v24 }
  0x38   :  { %391 = vmatprep.subr.bf16.mxu0 %v4623_v28  ;;  %434 = vmatprep.subr.bf16.mxu1 %v4630_v30 }
  0x3b   :  { %392 = vmatpush1.bf16.msra.mxu0 %v4635_v31  ;;  %435 = vmatpush1.bf16.msra.mxu1 %v4640_v32 }
  0x3c   :  { %3524 = vmatprep.subr.msk.bf16.mxu0 %vm231_vm0, %v4652_v35  ;;  %3526 = vmatprep.subr.msk.bf16.mxu1 %vm231_vm0, %v4654_v36 }
  0x3f   :  { %394 = vmatpush1.bf16.msra.mxu0 %v4643_v33  ;;  %437 = vmatpush1.bf16.msra.mxu1 %v4646_v34 }
  0x40   :  { %502 = vmatprep.subr.bf16.mxu0 %v4475_v0  ;;  %545 = vmatprep.subr.bf16.mxu1 %v4482_v2 }
  0x42   :  { %3525 = vmatmul.mubr.msk.bf16.vlgmr.msra.gmra.mrb[4].mxu0 %vm227_vm1, %v4205_v38  ;;  %3527 = vmatmul.mubr.msk.bf16.vlgmr.msra.gmra.mrb[4].mxu1 %vm227_vm1, %v4205_v38 }
  0x43   :  { %503 = vmatpush1.bf16.msra.mxu0 %v4488_v3  ;;  %546 = vmatpush1.bf16.msra.mxu1 %v4493_v4 }
  0x44   :  { %504 = vmatprep.subr.bf16.mxu0 %v4499_v5  ;;  %547 = vmatprep.subr.bf16.mxu1 %v4506_v6 }
  0x45   :  { %534 = vmatprep.mubr.bf16.mxu0 %v4416_v1  ;;  %577 = vmatprep.mubr.bf16.mxu1 %v4416_v1 }
  0x47   :  { %505 = vmatpush1.bf16.msra.mxu0 %v4511_v7  ;;  %548 = vmatpush1.bf16.msra.mxu1 %v4517_v8 }
  0x48   :  { %506 = vmatprep.subr.bf16.mxu0 %v4523_v9  ;;  %549 = vmatprep.subr.bf16.mxu1 %v4528_v10 }
  0x4b   :  { %507 = vmatpush1.bf16.msra.mxu0 %v4533_v11  ;;  %550 = vmatpush1.bf16.msra.mxu1 %v4538_v12 }
  0x4c   :  { %508 = vmatprep.subr.bf16.mxu0 %v4545_v13  ;;  %551 = vmatprep.subr.bf16.mxu1 %v4552_v14 }
  0x4f   :  { %509 = vmatpush1.bf16.msra.mxu0 %v4557_v15  ;;  %552 = vmatpush1.bf16.msra.mxu1 %v4564_v16 }
  0x50   :  { %510 = vmatprep.subr.bf16.mxu0 %v4569_v17  ;;  %553 = vmatprep.subr.bf16.mxu1 %v4576_v18 }
  0x53   :  { %511 = vmatpush1.bf16.msra.mxu0 %v4581_v19  ;;  %554 = vmatpush1.bf16.msra.mxu1 %v4586_v20 }
  0x54   :  { %512 = vmatprep.subr.bf16.mxu0 %v4593_v21  ;;  %555 = vmatprep.subr.bf16.mxu1 %v4600_v22 }
  0x57   :  { %513 = vmatpush1.bf16.msra.mxu0 %v4605_v23  ;;  %556 = vmatpush1.bf16.msra.mxu1 %v4610_v24 }
  0x58   :  { %514 = vmatprep.subr.bf16.mxu0 %v4623_v28  ;;  %557 = vmatprep.subr.bf16.mxu1 %v4630_v30 }
  0x5b   :  { %515 = vmatpush1.bf16.msra.mxu0 %v4635_v31  ;;  %558 = vmatpush1.bf16.msra.mxu1 %v4640_v32 }
  0x5c   :  { %3533 = vmatprep.subr.msk.bf16.mxu0 %vm231_vm0, %v4652_v35  ;;  %3535 = vmatprep.subr.msk.bf16.mxu1 %vm231_vm0, %v4654_v36 }
  0x5f   :  { %517 = vmatpush1.bf16.msra.mxu0 %v4643_v33  ;;  %560 = vmatpush1.bf16.msra.mxu1 %v4646_v34 }
  0x60   :  { %625 = vmatprep.subr.bf16.mxu0 %v4475_v0  ;;  %668 = vmatprep.subr.bf16.mxu1 %v4482_v2 }
  0x62   :  { %3534 = vmatmul.mubr.msk.bf16.vlgmr.msra.gmra.mrb[8].mxu0 %vm227_vm1, %v4206_v39  ;;  %3536 = vmatmul.mubr.msk.bf16.vlgmr.msra.gmra.mrb[8].mxu1 %vm227_vm1, %v4206_v39 }
  0x63   :  { %626 = vmatpush1.bf16.msra.mxu0 %v4488_v3  ;;  %669 = vmatpush1.bf16.msra.mxu1 %v4493_v4 }
  0x64   :  { %627 = vmatprep.subr.bf16.mxu0 %v4499_v5  ;;  %670 = vmatprep.subr.bf16.mxu1 %v4506_v6 }
  0x65   :  { %657 = vmatprep.mubr.bf16.mxu0 %v4416_v1  ;;  %700 = vmatprep.mubr.bf16.mxu1 %v4416_v1 }
  0x67   :  { %628 = vmatpush1.bf16.msra.mxu0 %v4511_v7  ;;  %671 = vmatpush1.bf16.msra.mxu1 %v4517_v8 }
  0x68   :  { %629 = vmatprep.subr.bf16.mxu0 %v4523_v9  ;;  %672 = vmatprep.subr.bf16.mxu1 %v4528_v10 }
  0x6b   :  { %630 = vmatpush1.bf16.msra.mxu0 %v4533_v11  ;;  %673 = vmatpush1.bf16.msra.mxu1 %v4538_v12 }
  0x6c   :  { %631 = vmatprep.subr.bf16.mxu0 %v4545_v13  ;;  %674 = vmatprep.subr.bf16.mxu1 %v4552_v14 }
  0x6f   :  { %632 = vmatpush1.bf16.msra.mxu0 %v4557_v15  ;;  %675 = vmatpush1.bf16.msra.mxu1 %v4564_v16 }
  0x70   :  { %633 = vmatprep.subr.bf16.mxu0 %v4569_v17  ;;  %676 = vmatprep.subr.bf16.mxu1 %v4576_v18 }
  0x73   :  { %634 = vmatpush1.bf16.msra.mxu0 %v4581_v19  ;;  %677 = vmatpush1.bf16.msra.mxu1 %v4586_v20 }
  0x74   :  { %635 = vmatprep.subr.bf16.mxu0 %v4593_v21  ;;  %678 = vmatprep.subr.bf16.mxu1 %v4600_v22 }
  0x77   :  { %636 = vmatpush1.bf16.msra.mxu0 %v4605_v23  ;;  %679 = vmatpush1.bf16.msra.mxu1 %v4610_v24 }
  0x78   :  { %637 = vmatprep.subr.bf16.mxu0 %v4623_v28  ;;  %680 = vmatprep.subr.bf16.mxu1 %v4630_v30 }
  0x7b   :  { %638 = vmatpush1.bf16.msra.mxu0 %v4635_v31  ;;  %681 = vmatpush1.bf16.msra.mxu1 %v4640_v32 }
  0x7c   :  { %3542 = vmatprep.subr.msk.bf16.mxu0 %vm231_vm0, %v4652_v35  ;;  %3544 = vmatprep.subr.msk.bf16.mxu1 %vm231_vm0, %v4654_v36 }
  0x7f   :  { %640 = vmatpush1.bf16.msra.mxu0 %v4643_v33  ;;  %683 = vmatpush1.bf16.msra.mxu1 %v4646_v34 }
  0x80   :  { %748 = vmatprep.subr.bf16.mxu0 %v4475_v0  ;;  %791 = vmatprep.subr.bf16.mxu1 %v4482_v2 }
  0x82   :  { %3543 = vmatmul.mubr.msk.bf16.vlgmr.msra.gmra.mrb[12].mxu0 %vm227_vm1, %v4207_v40  ;;  %3545 = vmatmul.mubr.msk.bf16.vlgmr.msra.gmra.mrb[12].mxu1 %vm227_vm1, %v4207_v40 }
  0x83   :  { %749 = vmatpush1.bf16.msra.mxu0 %v4488_v3  ;;  %792 = vmatpush1.bf16.msra.mxu1 %v4493_v4 }
  0x84   :  { %750 = vmatprep.subr.bf16.mxu0 %v4499_v5  ;;  %793 = vmatprep.subr.bf16.mxu1 %v4506_v6 }
  0x85   :  { %780 = vmatprep.mubr.bf16.mxu0 %v4416_v1  ;;  %823 = vmatprep.mubr.bf16.mxu1 %v4416_v1 }
  0x87   :  { %751 = vmatpush1.bf16.msra.mxu0 %v4511_v7  ;;  %794 = vmatpush1.bf16.msra.mxu1 %v4517_v8 }
  0x88   :  { %752 = vmatprep.subr.bf16.mxu0 %v4523_v9  ;;  %795 = vmatprep.subr.bf16.mxu1 %v4528_v10 }
  0x8b   :  { %753 = vmatpush1.bf16.msra.mxu0 %v4533_v11  ;;  %796 = vmatpush1.bf16.msra.mxu1 %v4538_v12 }
  0x8c   :  { %754 = vmatprep.subr.bf16.mxu0 %v4545_v13  ;;  %797 = vmatprep.subr.bf16.mxu1 %v4552_v14 }
  0x8f   :  { %755 = vmatpush1.bf16.msra.mxu0 %v4557_v15  ;;  %798 = vmatpush1.bf16.msra.mxu1 %v4564_v16 }
  0x90   :  { %756 = vmatprep.subr.bf16.mxu0 %v4569_v17  ;;  %799 = vmatprep.subr.bf16.mxu1 %v4576_v18 }
  0x93   :  { %757 = vmatpush1.bf16.msra.mxu0 %v4581_v19  ;;  %800 = vmatpush1.bf16.msra.mxu1 %v4586_v20 }
  0x94   :  { %758 = vmatprep.subr.bf16.mxu0 %v4593_v21  ;;  %801 = vmatprep.subr.bf16.mxu1 %v4600_v22 }
  0x97   :  { %759 = vmatpush1.bf16.msra.mxu0 %v4605_v23  ;;  %802 = vmatpush1.bf16.msra.mxu1 %v4610_v24 }
  0x98   :  { %760 = vmatprep.subr.bf16.mxu0 %v4623_v28  ;;  %803 = vmatprep.subr.bf16.mxu1 %v4630_v30 }
  0x9b   :  { %761 = vmatpush1.bf16.msra.mxu0 %v4635_v31  ;;  %804 = vmatpush1.bf16.msra.mxu1 %v4640_v32 }
  0x9c   :  { %3551 = vmatprep.subr.msk.bf16.mxu0 %vm231_vm0, %v4652_v35  ;;  %3553 = vmatprep.subr.msk.bf16.mxu1 %vm231_vm0, %v4654_v36 }
  0x9f   :  { %763 = vmatpush1.bf16.msra.mxu0 %v4643_v33  ;;  %806 = vmatpush1.bf16.msra.mxu1 %v4646_v34 }
  0xa0   :  { %871 = vmatprep.subr.bf16.mxu0 %v4475_v0  ;;  %914 = vmatprep.subr.bf16.mxu1 %v4482_v2 }
  0xa2   :  { %3552 = vmatmul.mubr.msk.bf16.vlgmr.msra.gmra.mrb[16].mxu0 %vm227_vm1, %v4208_v41  ;;  %3554 = vmatmul.mubr.msk.bf16.vlgmr.msra.gmra.mrb[16].mxu1 %vm227_vm1, %v4208_v41  ;;  %v4986_v41 = vld [vmem:[%s6332_s3] ss:$0 sm:$0xff] }
  0xa3   :  { %872 = vmatpush1.bf16.msra.mxu0 %v4488_v3  ;;  %915 = vmatpush1.bf16.msra.mxu1 %v4493_v4 }
  0xa4   :  { %873 = vmatprep.subr.bf16.mxu0 %v4499_v5  ;;  %916 = vmatprep.subr.bf16.mxu1 %v4506_v6 }
  0xa5   :  { %903 = vmatprep.mubr.bf16.mxu0 %v4416_v1  ;;  %946 = vmatprep.mubr.bf16.mxu1 %v4416_v1 }
  0xa7   :  { %874 = vmatpush1.bf16.msra.mxu0 %v4511_v7  ;;  %917 = vmatpush1.bf16.msra.mxu1 %v4517_v8 }
  0xa8   :  { %875 = vmatprep.subr.bf16.mxu0 %v4523_v9  ;;  %918 = vmatprep.subr.bf16.mxu1 %v4528_v10 }
  0xab   :  { %876 = vmatpush1.bf16.msra.mxu0 %v4533_v11  ;;  %919 = vmatpush1.bf16.msra.mxu1 %v4538_v12 }
  0xac   :  { %877 = vmatprep.subr.bf16.mxu0 %v4545_v13  ;;  %920 = vmatprep.subr.bf16.mxu1 %v4552_v14 }
  0xaf   :  { %878 = vmatpush1.bf16.msra.mxu0 %v4557_v15  ;;  %921 = vmatpush1.bf16.msra.mxu1 %v4564_v16 }
  0xb0   :  { %879 = vmatprep.subr.bf16.mxu0 %v4569_v17  ;;  %922 = vmatprep.subr.bf16.mxu1 %v4576_v18 }
  0xb3   :  { %880 = vmatpush1.bf16.msra.mxu0 %v4581_v19  ;;  %923 = vmatpush1.bf16.msra.mxu1 %v4586_v20 }
  0xb4   :  { %881 = vmatprep.subr.bf16.mxu0 %v4593_v21  ;;  %924 = vmatprep.subr.bf16.mxu1 %v4600_v22 }
  0xb7   :  { %882 = vmatpush1.bf16.msra.mxu0 %v4605_v23  ;;  %925 = vmatpush1.bf16.msra.mxu1 %v4610_v24 }
  0xb8   :  { %883 = vmatprep.subr.bf16.mxu0 %v4623_v28  ;;  %926 = vmatprep.subr.bf16.mxu1 %v4630_v30 }
  0xbb   :  { %884 = vmatpush1.bf16.msra.mxu0 %v4635_v31  ;;  %927 = vmatpush1.bf16.msra.mxu1 %v4640_v32 }
  0xbc   :  { %3560 = vmatprep.subr.msk.bf16.mxu0 %vm231_vm0, %v4652_v35  ;;  %3562 = vmatprep.subr.msk.bf16.mxu1 %vm231_vm0, %v4654_v36 }
  0xbf   :  { %886 = vmatpush1.bf16.msra.mxu0 %v4643_v33  ;;  %929 = vmatpush1.bf16.msra.mxu1 %v4646_v34 }
  0xc0   :  { %994 = vmatprep.subr.bf16.mxu0 %v4475_v0  ;;  %1037 = vmatprep.subr.bf16.mxu1 %v4482_v2 }
  0xc2   :  { %3561 = vmatmul.mubr.msk.bf16.vlgmr.msra.gmra.mrb[20].mxu0 %vm227_vm1, %v4209_v42  ;;  %3563 = vmatmul.mubr.msk.bf16.vlgmr.msra.gmra.mrb[20].mxu1 %vm227_vm1, %v4209_v42 }
  0xc3   :  { %995 = vmatpush1.bf16.msra.mxu0 %v4488_v3  ;;  %1038 = vmatpush1.bf16.msra.mxu1 %v4493_v4 }
  0xc4   :  { %996 = vmatprep.subr.bf16.mxu0 %v4499_v5  ;;  %1039 = vmatprep.subr.bf16.mxu1 %v4506_v6 }
  0xc5   :  { %1026 = vmatprep.mubr.bf16.mxu0 %v4416_v1  ;;  %1069 = vmatprep.mubr.bf16.mxu1 %v4416_v1 }
  0xc7   :  { %997 = vmatpush1.bf16.msra.mxu0 %v4511_v7  ;;  %1040 = vmatpush1.bf16.msra.mxu1 %v4517_v8 }
  0xc8   :  { %998 = vmatprep.subr.bf16.mxu0 %v4523_v9  ;;  %1041 = vmatprep.subr.bf16.mxu1 %v4528_v10 }
  0xcb   :  { %999 = vmatpush1.bf16.msra.mxu0 %v4533_v11  ;;  %1042 = vmatpush1.bf16.msra.mxu1 %v4538_v12 }
  0xcc   :  { %1000 = vmatprep.subr.bf16.mxu0 %v4545_v13  ;;  %1043 = vmatprep.subr.bf16.mxu1 %v4552_v14 }
  0xcf   :  { %1001 = vmatpush1.bf16.msra.mxu0 %v4557_v15  ;;  %1044 = vmatpush1.bf16.msra.mxu1 %v4564_v16 }
  0xd0   :  { %1002 = vmatprep.subr.bf16.mxu0 %v4569_v17  ;;  %1045 = vmatprep.subr.bf16.mxu1 %v4576_v18 }
  0xd3   :  { %1003 = vmatpush1.bf16.msra.mxu0 %v4581_v19  ;;  %1046 = vmatpush1.bf16.msra.mxu1 %v4586_v20 }
  0xd4   :  { %1004 = vmatprep.subr.bf16.mxu0 %v4593_v21  ;;  %1047 = vmatprep.subr.bf16.mxu1 %v4600_v22 }
  0xd7   :  { %1005 = vmatpush1.bf16.msra.mxu0 %v4605_v23  ;;  %1048 = vmatpush1.bf16.msra.mxu1 %v4610_v24 }
  0xd8   :  { %1006 = vmatprep.subr.bf16.mxu0 %v4623_v28  ;;  %1049 = vmatprep.subr.bf16.mxu1 %v4630_v30 }
  0xdb   :  { %1007 = vmatpush1.bf16.msra.mxu0 %v4635_v31  ;;  %1050 = vmatpush1.bf16.msra.mxu1 %v4640_v32 }
  0xdc   :  { %3569 = vmatprep.subr.msk.bf16.mxu0 %vm231_vm0, %v4652_v35  ;;  %3571 = vmatprep.subr.msk.bf16.mxu1 %vm231_vm0, %v4654_v36 }
  0xdf   :  { %1009 = vmatpush1.bf16.msra.mxu0 %v4643_v33  ;;  %1052 = vmatpush1.bf16.msra.mxu1 %v4646_v34 }
  0xe0   :  { %1117 = vmatprep.subr.bf16.mxu0 %v4475_v0  ;;  %1160 = vmatprep.subr.bf16.mxu1 %v4482_v2 }
  0xe2   :  { %3570 = vmatmul.mubr.msk.bf16.vlgmr.msra.gmra.mrb[24].mxu0 %vm227_vm1, %v4210_v43  ;;  %3572 = vmatmul.mubr.msk.bf16.vlgmr.msra.gmra.mrb[24].mxu1 %vm227_vm1, %v4210_v43 }
  0xe3   :  { %1118 = vmatpush1.bf16.msra.mxu0 %v4488_v3  ;;  %1161 = vmatpush1.bf16.msra.mxu1 %v4493_v4 }
  0xe4   :  { %1119 = vmatprep.subr.bf16.mxu0 %v4499_v5  ;;  %1162 = vmatprep.subr.bf16.mxu1 %v4506_v6 }
  0xe5   :  { %1149 = vmatprep.mubr.bf16.mxu0 %v4416_v1  ;;  %1192 = vmatprep.mubr.bf16.mxu1 %v4416_v1 }
  0xe7   :  { %1120 = vmatpush1.bf16.msra.mxu0 %v4511_v7  ;;  %1163 = vmatpush1.bf16.msra.mxu1 %v4517_v8 }
  0xe8   :  { %1121 = vmatprep.subr.bf16.mxu0 %v4523_v9  ;;  %1164 = vmatprep.subr.bf16.mxu1 %v4528_v10 }
  0xeb   :  { %1122 = vmatpush1.bf16.msra.mxu0 %v4533_v11  ;;  %1165 = vmatpush1.bf16.msra.mxu1 %v4538_v12 }
  0xec   :  { %1123 = vmatprep.subr.bf16.mxu0 %v4545_v13  ;;  %1166 = vmatprep.subr.bf16.mxu1 %v4552_v14 }
  0xef   :  { %1124 = vmatpush1.bf16.msra.mxu0 %v4557_v15  ;;  %1167 = vmatpush1.bf16.msra.mxu1 %v4564_v16 }
  0xf0   :  { %1125 = vmatprep.subr.bf16.mxu0 %v4569_v17  ;;  %1168 = vmatprep.subr.bf16.mxu1 %v4576_v18 }
  0xf3   :  { %1126 = vmatpush1.bf16.msra.mxu0 %v4581_v19  ;;  %1169 = vmatpush1.bf16.msra.mxu1 %v4586_v20 }
  0xf4   :  { %1127 = vmatprep.subr.bf16.mxu0 %v4593_v21  ;;  %1170 = vmatprep.subr.bf16.mxu1 %v4600_v22 }
  0xf5   :  { %v278_v44 = vpop.f32.mrb[0].mxu0  ;;  %v321_v45 = vpop.f32.mrb[0].mxu1 }
  0xf6   :  { %v280_v46 = vpop.f32.mrb[1].mxu0  ;;  %v323_v47 = vpop.f32.mrb[1].mxu1 }
  0xf7   :  { %v330_v48 = vmax.f32 %v278_v44, %v280_v46  ;;  %v332_v49 = vmax.f32 %v321_v45, %v323_v47  ;;  %v282_v50 = vpop.f32.mrb[2].mxu0  ;;  %v325_v51 = vpop.f32.mrb[2].mxu1  ;;  %1128 = vmatpush1.bf16.msra.mxu0 %v4605_v23  ;;  %1171 = vmatpush1.bf16.msra.mxu1 %v4610_v24 }
  0xf8   :  { %v284_v53 = vpop.f32.mrb[3].mxu0  ;;  %v327_v54 = vpop.f32.mrb[3].mxu1  ;;  %1129 = vmatprep.subr.bf16.mxu0 %v4623_v28  ;;  %1172 = vmatprep.subr.bf16.mxu1 %v4630_v30 }
  0xf9   :  { %v334_v55 = vmax.f32 %v330_v48, %v332_v49  ;;  %v331_v56 = vmax.f32 %v282_v50, %v284_v53  ;;  %v333_v57 = vmax.f32 %v325_v51, %v327_v54 }
  0xfb   :  { %v342_v58 = vadd.f32 %v4944_v52, %v334_v55  ;;  %v335_v59 = vmax.f32 %v331_v56, %v333_v57  ;;  %1130 = vmatpush1.bf16.msra.mxu0 %v4635_v31  ;;  %1173 = vmatpush1.bf16.msra.mxu1 %v4640_v32 }
  0xfc   :  { %3578 = vmatprep.subr.msk.bf16.mxu0 %vm231_vm0, %v4652_v35  ;;  %3580 = vmatprep.subr.msk.bf16.mxu1 %vm231_vm0, %v4654_v36 }
  0xfd   :  { %v346_v60 = vmul.f32 1.442695, %v342_v58  ;;  %v343_v61 = vadd.f32 %v4944_v52, %v335_v59  ;;  %vm344_vm2 = vcmp.gt.f32.partialorder %v342_v58, 0.0 }
  0xff   :  { %4290 = vpow2.f32 %v346_v60  ;;  %v348_v63 = vmul.f32 1.442695, %v343_v61  ;;  %1132 = vmatpush1.bf16.msra.mxu0 %v4643_v33  ;;  %1175 = vmatpush1.bf16.msra.mxu1 %v4646_v34  ;;  %vm345_vm3 = vcmp.gt.f32.partialorder %v343_v61, 0.0 }
 0x100   :  { %1240 = vmatprep.subr.bf16.mxu0 %v4475_v0  ;;  %1283 = vmatprep.subr.bf16.mxu1 %v4482_v2 }
 0x101   :  { %4292 = vpow2.f32 %v348_v63 }
 0x102   :  { %3579 = vmatmul.mubr.msk.bf16.vlgmr.msra.gmra.mrb[28].mxu0 %vm227_vm1, %v4211_v62  ;;  %3581 = vmatmul.mubr.msk.bf16.vlgmr.msra.gmra.mrb[28].mxu1 %vm227_vm1, %v4211_v62 }
 0x103   :  { %1241 = vmatpush1.bf16.msra.mxu0 %v4488_v3  ;;  %1284 = vmatpush1.bf16.msra.mxu1 %v4493_v4 }
 0x104   :  { %1242 = vmatprep.subr.bf16.mxu0 %v4499_v5  ;;  %1285 = vmatprep.subr.bf16.mxu1 %v4506_v6 }
 0x105   :  { %1272 = vmatprep.mubr.bf16.mxu0 %v4416_v1  ;;  %1315 = vmatprep.mubr.bf16.mxu1 %v4416_v1 }
 0x107   :  { %1243 = vmatpush1.bf16.msra.mxu0 %v4511_v7  ;;  %1286 = vmatpush1.bf16.msra.mxu1 %v4517_v8 }
 0x108   :  { %1244 = vmatprep.subr.bf16.mxu0 %v4523_v9  ;;  %1287 = vmatprep.subr.bf16.mxu1 %v4528_v10 }
 0x109   :  { %v4291_v25 = vpop.eup %4290 }
 0x10a   :  { %v3518_v26 = vadd.f32 -1.0, %v4291_v25 }
 0x10b   :  { %v4293_v27 = vpop.eup %4292  ;;  %1245 = vmatpush1.bf16.msra.mxu0 %v4533_v11  ;;  %1288 = vmatpush1.bf16.msra.mxu1 %v4538_v12 }
 0x10c   :  { %v3519_v29 = vadd.f32 -1.0, %v4293_v27  ;;  %1246 = vmatprep.subr.bf16.mxu0 %v4545_v13  ;;  %1289 = vmatprep.subr.bf16.mxu1 %v4552_v14  ;;  %v352_v37 = vmul.f32 1.6732632, %v3518_v26  ;;  %v4212_v26 = vld [vmem:[%s6330_s0 + $0x40] sm:$0xff]  }
 0x10e   :  { %v353_v38 = vmul.f32 1.6732632, %v3519_v29  ;;  %v354_v39 = vsel %vm344_vm2, %v342_v58, %v352_v37 }
 0x10f   :  { %1247 = vmatpush1.bf16.msra.mxu0 %v4557_v15  ;;  %1290 = vmatpush1.bf16.msra.mxu1 %v4564_v16  ;;  %v356_v40 = vmul.f32 1.050701, %v354_v39 }
 0x110   :  { %1248 = vmatprep.subr.bf16.mxu0 %v4569_v17  ;;  %1291 = vmatprep.subr.bf16.mxu1 %v4576_v18  ;;  %v355_v42 = vsel %vm345_vm3, %v343_v61, %v353_v38 }
 0x111   :  { %v357_v43 = vmul.f32 1.050701, %v355_v42  ;;  %v364_v44 = vmul.f32 %v4986_v41, %v356_v40 }
 0x113   :  { %1249 = vmatpush1.bf16.msra.mxu0 %v4581_v19  ;;  %1292 = vmatpush1.bf16.msra.mxu1 %v4586_v20  ;;  %v365_v45 = vmul.f32 %v4986_v41, %v357_v43  ;;  %v5077_v43 = vld [vmem:[%s6329_s1] ss:$16 sps:$4 sm:$0xff]  }
 0x114   :  { %1250 = vmatprep.subr.bf16.mxu0 %v4593_v21  ;;  %1293 = vmatprep.subr.bf16.mxu1 %v4600_v22 }
 0x115   :  { %v413_v46 = vpop.f32.mrb[4].mxu0  ;;  %v456_v47 = vpop.f32.mrb[4].mxu1  ;;  %v4994_v48 = vpack.c.bf16 %v365_v45, %v364_v44  ;;  %v5083_v44 = vld [vmem:[%s6329_s1 + $0x8] ss:$16 sps:$4 sm:$0xff]   ;;  %v5089_v45 = vld [vmem:[%s6329_s1 + $0x24] ss:$16 sps:$4 sm:$0xff]  }
 0x116   :  { %v415_v49 = vpop.f32.mrb[5].mxu0  ;;  %v458_v50 = vpop.f32.mrb[5].mxu1 }
 0x117   :  { %v465_v51 = vmax.f32 %v413_v46, %v415_v49  ;;  %v467_v53 = vmax.f32 %v456_v47, %v458_v50  ;;  %v417_v54 = vpop.f32.mrb[6].mxu0  ;;  %v460_v55 = vpop.f32.mrb[6].mxu1  ;;  %1251 = vmatpush1.bf16.msra.mxu0 %v4605_v23  ;;  %1294 = vmatpush1.bf16.msra.mxu1 %v4610_v24  ;;  %v5095_v46 = vld [vmem:[%s6329_s1 + $0x2c] ss:$16 sps:$4 sm:$0xff]   ;;  %v5103_v47 = vld [vmem:[%s6329_s1 + $0x20] ss:$16 sps:$4 sm:$0xff]  }
 0x118   :  { %v419_v56 = vpop.f32.mrb[7].mxu0  ;;  %v462_v57 = vpop.f32.mrb[7].mxu1  ;;  %1252 = vmatprep.subr.bf16.mxu0 %v4623_v28  ;;  %1295 = vmatprep.subr.bf16.mxu1 %v4630_v30  ;;  %v5109_v49 = vld [vmem:[%s6329_s1 + $0x28] ss:$16 sps:$4 sm:$0xff]   ;;  %v5115_v50 = vld [vmem:[%s6329_s1 + $0x44] ss:$16 sps:$4 sm:$0xff]  }
 0x119   :  { %v469_v58 = vmax.f32 %v465_v51, %v467_v53  ;;  %v466_v59 = vmax.f32 %v417_v54, %v419_v56  ;;  %v468_v60 = vmax.f32 %v460_v55, %v462_v57  ;;  %v5121_v51 = vld [vmem:[%s6329_s1 + $0x4c] ss:$16 sps:$4 sm:$0xff]   ;;  %v5127_v56 = vld [vmem:[%s6329_s1 + $0x40] ss:$16 sps:$4 sm:$0xff]   ;;  %v5133_v57 = vld [vmem:[%s6329_s1 + $0x48] ss:$16 sps:$4 sm:$0xff]  }
 0x11b   :  { %v471_v61 = vadd.f32 %v4944_v52, %v469_v58  ;;  %v470_v62 = vmax.f32 %v466_v59, %v468_v60  ;;  %1253 = vmatpush1.bf16.msra.mxu0 %v4635_v31  ;;  %1296 = vmatpush1.bf16.msra.mxu1 %v4640_v32  ;;  %v5139_v60 = vld [vmem:[%s6329_s1 + $0x64] ss:$16 sps:$4 sm:$0xff]  }
 0x11c   :  { %3587 = vmatprep.subr.msk.bf16.mxu0 %vm231_vm0, %v4652_v35  ;;  %3589 = vmatprep.subr.msk.bf16.mxu1 %vm231_vm0, %v4654_v36 }
 0x11d   :  { %v475_v63 = vmul.f32 1.442695, %v471_v61  ;;  %v472_v25 = vadd.f32 %v4944_v52, %v470_v62  ;;  %vm473_vm4 = vcmp.gt.f32.partialorder %v471_v61, 0.0 }
 0x11f   :  { %4294 = vpow2.f32 %v475_v63  ;;  %v477_v27 = vmul.f32 1.442695, %v472_v25  ;;  %1255 = vmatpush1.bf16.msra.mxu0 %v4643_v33  ;;  %1298 = vmatpush1.bf16.msra.mxu1 %v4646_v34  ;;  %vm474_vm5 = vcmp.gt.f32.partialorder %v472_v25, 0.0 }
 0x120   :  { %1363 = vmatprep.subr.bf16.mxu0 %v4475_v0  ;;  %1406 = vmatprep.subr.bf16.mxu1 %v4482_v2 }
 0x121   :  { %4296 = vpow2.f32 %v477_v27  ;;  %v5157_v27 = vld [vmem:[%s6329_s1 + $0x68] ss:$16 sps:$4 sm:$0xff]  }
 0x122   :  { %3588 = vmatmul.mubr.msk.bf16.vlgmr.msra.gmra.mrb[32].mxu0 %vm227_vm1, %v4212_v26  ;;  %3590 = vmatmul.mubr.msk.bf16.vlgmr.msra.gmra.mrb[32].mxu1 %vm227_vm1, %v4212_v26  ;;  %v5151_v26 = vld [vmem:[%s6329_s1 + $0x60] ss:$16 sps:$4 sm:$0xff]  }
 0x123   :  { %1364 = vmatpush1.bf16.msra.mxu0 %v4488_v3  ;;  %1407 = vmatpush1.bf16.msra.mxu1 %v4493_v4 }
 0x124   :  { %1365 = vmatprep.subr.bf16.mxu0 %v4499_v5  ;;  %1408 = vmatprep.subr.bf16.mxu1 %v4506_v6 }
 0x125   :  { %1395 = vmatprep.mubr.bf16.mxu0 %v4416_v1  ;;  %1438 = vmatprep.mubr.bf16.mxu1 %v4416_v1 }
 0x127   :  { %1366 = vmatpush1.bf16.msra.mxu0 %v4511_v7  ;;  %1409 = vmatpush1.bf16.msra.mxu1 %v4517_v8 }
 0x128   :  { %1367 = vmatprep.subr.bf16.mxu0 %v4523_v9  ;;  %1410 = vmatprep.subr.bf16.mxu1 %v4528_v10 }
 0x129   :  { %v4295_v0 = vpop.eup %4294 }
 0x12a   :  { %v3528_v2 = vadd.f32 -1.0, %v4295_v0 }
 0x12b   :  { %v4297_v3 = vpop.eup %4296  ;;  %1368 = vmatpush1.bf16.msra.mxu0 %v4533_v11  ;;  %1411 = vmatpush1.bf16.msra.mxu1 %v4538_v12 }
 0x12c   :  { %v3529_v4 = vadd.f32 -1.0, %v4297_v3  ;;  %1369 = vmatprep.subr.bf16.mxu0 %v4545_v13  ;;  %1412 = vmatprep.subr.bf16.mxu1 %v4552_v14  ;;  %v481_v5 = vmul.f32 1.6732632, %v3528_v2  ;;  %v5163_v2 = vld [vmem:[%s6329_s1 + $0x84] ss:$16 sps:$4 sm:$0xff]  }
 0x12d   :  { %v5169_v3 = vld [vmem:[%s6329_s1 + $0x8c] ss:$16 sps:$4 sm:$0xff]  }
 0x12e   :  { %v482_v6 = vmul.f32 1.6732632, %v3529_v4  ;;  %v483_v7 = vsel %vm473_vm4, %v471_v61, %v481_v5  ;;  %v5145_v61 = vld [vmem:[%s6329_s1 + $0x6c] ss:$16 sps:$4 sm:$0xff]   ;;  %v5175_v5 = vld [vmem:[%s6329_s1 + $0x80] ss:$16 sps:$4 sm:$0xff]  }
 0x12f   :  { %1370 = vmatpush1.bf16.msra.mxu0 %v4557_v15  ;;  %1413 = vmatpush1.bf16.msra.mxu1 %v4564_v16  ;;  %v485_v8 = vmul.f32 1.050701, %v483_v7 }
 0x130   :  { %1371 = vmatprep.subr.bf16.mxu0 %v4569_v17  ;;  %1414 = vmatprep.subr.bf16.mxu1 %v4576_v18  ;;  %v484_v9 = vsel %vm474_vm5, %v472_v25, %v482_v6  ;;  %v5181_v6 = vld [vmem:[%s6329_s1 + $0x88] ss:$16 sps:$4 sm:$0xff]  }
 0x131   :  { %v486_v10 = vmul.f32 1.050701, %v484_v9  ;;  %v487_v11 = vmul.f32 %v4986_v41, %v485_v8  ;;  %v5189_v9 = vld [vmem:[%s6329_s1 + $0xa4] ss:$16 sps:$4 sm:$0xff]  }
 0x133   :  { %1372 = vmatpush1.bf16.msra.mxu0 %v4581_v19  ;;  %1415 = vmatpush1.bf16.msra.mxu1 %v4586_v20  ;;  %v488_v12 = vmul.f32 %v4986_v41, %v486_v10  ;;  %v5195_v10 = vld [vmem:[%s6329_s1 + $0xac] ss:$16 sps:$4 sm:$0xff]  }
 0x134   :  { %1373 = vmatprep.subr.bf16.mxu0 %v4593_v21  ;;  %1416 = vmatprep.subr.bf16.mxu1 %v4600_v22 }
 0x135   :  { %v536_v13 = vpop.f32.mrb[8].mxu0  ;;  %v579_v14 = vpop.f32.mrb[8].mxu1  ;;  %v5041_v15 = vpack.c.bf16 %v488_v12, %v487_v11 }
 0x136   :  { %v538_v16 = vpop.f32.mrb[9].mxu0  ;;  %v581_v17 = vpop.f32.mrb[9].mxu1 }
 0x137   :  { %v588_v18 = vmax.f32 %v536_v13, %v538_v16  ;;  %v590_v29 = vmax.f32 %v579_v14, %v581_v17  ;;  %v540_v37 = vpop.f32.mrb[10].mxu0  ;;  %v583_v19 = vpop.f32.mrb[10].mxu1  ;;  %1374 = vmatpush1.bf16.msra.mxu0 %v4605_v23  ;;  %1417 = vmatpush1.bf16.msra.mxu1 %v4610_v24 }
 0x138   :  { %v542_v20 = vpop.f32.mrb[11].mxu0  ;;  %v585_v38 = vpop.f32.mrb[11].mxu1  ;;  %1375 = vmatprep.subr.bf16.mxu0 %v4623_v28  ;;  %1418 = vmatprep.subr.bf16.mxu1 %v4630_v30  ;;  %v4213_v28 = vld [vmem:[%s6330_s0 + $0x48] sm:$0xff]  }
 0x139   :  { %v592_v21 = vmax.f32 %v588_v18, %v590_v29  ;;  %v589_v22 = vmax.f32 %v540_v37, %v542_v20  ;;  %v591_v39 = vmax.f32 %v583_v19, %v585_v38  ;;  %v5203_v19 = vld [vmem:[%s6329_s1 + $0xa0] ss:$16 sps:$4 sm:$0xff]   ;;  %v5209_v20 = vld [vmem:[%s6329_s1 + $0xa8] ss:$16 sps:$4 sm:$0xff]  }
 0x13b   :  { %v594_v40 = vadd.f32 %v4944_v52, %v592_v21  ;;  %v593_v42 = vmax.f32 %v589_v22, %v591_v39  ;;  %1376 = vmatpush1.bf16.msra.mxu0 %v4635_v31  ;;  %1419 = vmatpush1.bf16.msra.mxu1 %v4640_v32  ;;  %v5063_v31 = vld [vmem:[%s6329_s1 + $0x4] ss:$16 sps:$4 sm:$0xff]   ;;  %v5069_v32 = vld [vmem:[%s6329_s1 + $0xc] ss:$16 sps:$4 sm:$0xff]  }
 0x13c   :  { %3596 = vmatprep.subr.msk.bf16.mxu0 %vm231_vm0, %v4652_v35  ;;  %3598 = vmatprep.subr.msk.bf16.mxu1 %vm231_vm0, %v4654_v36  ;;  %v5215_v22 = vld [vmem:[%s6329_s1 + $0xc4] ss:$16 sps:$4 sm:$0xff]   ;;  %v5221_v39 = vld [vmem:[%s6329_s1 + $0xcc] ss:$16 sps:$4 sm:$0xff]  }
 0x13d   :  { %v598_v23 = vmul.f32 1.442695, %v594_v40  ;;  %v595_v24 = vadd.f32 %v4944_v52, %v593_v42  ;;  %vm596_vm6 = vcmp.gt.f32.partialorder %v594_v40, 0.0 }
 0x13f   :  { %4298 = vpow2.f32 %v598_v23  ;;  %v600_v30 = vmul.f32 1.442695, %v595_v24  ;;  %1378 = vmatpush1.bf16.msra.mxu0 %v4643_v33  ;;  %1421 = vmatpush1.bf16.msra.mxu1 %v4646_v34  ;;  %vm597_vm7 = vcmp.gt.f32.partialorder %v595_v24, 0.0 }
 0x140   :  { %1486 = vmatprep.subr.bf16.mxu0 %v5063_v31  ;;  %1529 = vmatprep.subr.bf16.mxu1 %v5069_v32 }
 0x141   :  { %4300 = vpow2.f32 %v600_v30  ;;  %v5228_v30 = vld [vmem:[%s6329_s1 + $0xc0] ss:$16 sps:$4 sm:$0xff]  }
 0x142   :  { %3597 = vmatmul.mubr.msk.bf16.vlgmr.msra.gmra.mrb[36].mxu0 %vm227_vm1, %v4213_v28  ;;  %3599 = vmatmul.mubr.msk.bf16.vlgmr.msra.gmra.mrb[36].mxu1 %vm227_vm1, %v4213_v28 }
 0x143   :  { %1487 = vmatpush1.bf16.msra.mxu0 %v5077_v43  ;;  %1530 = vmatpush1.bf16.msra.mxu1 %v5083_v44 }
 0x144   :  { %1488 = vmatprep.subr.bf16.mxu0 %v5089_v45  ;;  %1531 = vmatprep.subr.bf16.mxu1 %v5095_v46 }
 0x145   :  { %1518 = vmatprep.mubr.bf16.mxu0 %v4416_v1  ;;  %1561 = vmatprep.mubr.bf16.mxu1 %v4416_v1 }
 0x147   :  { %1489 = vmatpush1.bf16.msra.mxu0 %v5103_v47  ;;  %1532 = vmatpush1.bf16.msra.mxu1 %v5109_v49 }
 0x148   :  { %1490 = vmatprep.subr.bf16.mxu0 %v5115_v50  ;;  %1533 = vmatprep.subr.bf16.mxu1 %v5121_v51 }
 0x149   :  { %v4299_v53 = vpop.eup %4298 }
 0x14a   :  { %v3537_v54 = vadd.f32 -1.0, %v4299_v53  ;;  %v5234_v53 = vld [vmem:[%s6329_s1 + $0xc8] ss:$16 sps:$4 sm:$0xff]  }
 0x14b   :  { %v4301_v55 = vpop.eup %4300  ;;  %1491 = vmatpush1.bf16.msra.mxu0 %v5127_v56  ;;  %1534 = vmatpush1.bf16.msra.mxu1 %v5133_v57 }
 0x14c   :  { %v604_v58 = vmul.f32 1.6732632, %v3537_v54  ;;  %v3538_v59 = vadd.f32 -1.0, %v4301_v55  ;;  %1492 = vmatprep.subr.bf16.mxu0 %v5139_v60  ;;  %1535 = vmatprep.subr.bf16.mxu1 %v5145_v61 }
 0x14e   :  { %v606_v62 = vsel %vm596_vm6, %v594_v40, %v604_v58  ;;  %v605_v63 = vmul.f32 1.6732632, %v3538_v59  ;;  %v4214_v58 = vld [vmem:[%s6330_s0 + $0x50] sm:$0xff]  }
 0x14f   :  { %v608_v25 = vmul.f32 1.050701, %v606_v62  ;;  %1493 = vmatpush1.bf16.msra.mxu0 %v5151_v26  ;;  %1536 = vmatpush1.bf16.msra.mxu1 %v5157_v27 }
 0x150   :  { %v607_v0 = vsel %vm597_vm7, %v595_v24, %v605_v63  ;;  %1494 = vmatprep.subr.bf16.mxu0 %v5163_v2  ;;  %1537 = vmatprep.subr.bf16.mxu1 %v5169_v3 }
 0x151   :  { %v609_v4 = vmul.f32 1.050701, %v607_v0  ;;  %v610_v7 = vmul.f32 %v4986_v41, %v608_v25 }
 0x153   :  { %1495 = vmatpush1.bf16.msra.mxu0 %v5175_v5  ;;  %1538 = vmatpush1.bf16.msra.mxu1 %v5181_v6  ;;  %v611_v8 = vmul.f32 %v4986_v41, %v609_v4 }
 0x154   :  { %1496 = vmatprep.subr.bf16.mxu0 %v5189_v9  ;;  %1539 = vmatprep.subr.bf16.mxu1 %v5195_v10 }
 0x155   :  { %v659_v11 = vpop.f32.mrb[12].mxu0  ;;  %v702_v12 = vpop.f32.mrb[12].mxu1  ;;  %v5198_v13 = vpack.c.bf16 %v611_v8, %v610_v7 }
 0x156   :  { %v661_v14 = vpop.f32.mrb[13].mxu0  ;;  %v704_v16 = vpop.f32.mrb[13].mxu1 }
 0x157   :  { %v711_v17 = vmax.f32 %v659_v11, %v661_v14  ;;  %v713_v18 = vmax.f32 %v702_v12, %v704_v16  ;;  %v663_v29 = vpop.f32.mrb[14].mxu0  ;;  %v706_v37 = vpop.f32.mrb[14].mxu1  ;;  %1497 = vmatpush1.bf16.msra.mxu0 %v5203_v19  ;;  %1540 = vmatpush1.bf16.msra.mxu1 %v5209_v20 }
 0x158   :  { %v665_v38 = vpop.f32.mrb[15].mxu0  ;;  %v708_v21 = vpop.f32.mrb[15].mxu1  ;;  %1498 = vmatprep.subr.bf16.mxu0 %v5215_v22  ;;  %1541 = vmatprep.subr.bf16.mxu1 %v5221_v39 }
 0x159   :  { %v715_v40 = vmax.f32 %v711_v17, %v713_v18  ;;  %v712_v42 = vmax.f32 %v663_v29, %v665_v38  ;;  %v714_v23 = vmax.f32 %v706_v37, %v708_v21 }
 0x15b   :  { %v717_v24 = vadd.f32 %v4944_v52, %v715_v40  ;;  %v716_v28 = vmax.f32 %v712_v42, %v714_v23  ;;  %1499 = vmatpush1.bf16.msra.mxu0 %v5228_v30  ;;  %1542 = vmatpush1.bf16.msra.mxu1 %v5234_v53 }
 0x15c   :  { %3605 = vmatprep.subr.msk.bf16.mxu0 %vm231_vm0, %v4652_v35  ;;  %3607 = vmatprep.subr.msk.bf16.mxu1 %vm231_vm0, %v4654_v36 }
 0x15d   :  { %v721_v54 = vmul.f32 1.442695, %v717_v24  ;;  %v718_v55 = vadd.f32 %v4944_v52, %v716_v28  ;;  %vm719_vm8 = vcmp.gt.f32.partialorder %v717_v24, 0.0 }
 0x15f   :  { %4302 = vpow2.f32 %v721_v54  ;;  %v723_v59 = vmul.f32 1.442695, %v718_v55  ;;  %1501 = vmatpush1.bf16.msra.mxu0 %v4643_v33  ;;  %1544 = vmatpush1.bf16.msra.mxu1 %v4646_v34  ;;  %vm720_vm9 = vcmp.gt.f32.partialorder %v718_v55, 0.0 }
 0x160   :  { %1609 = vmatprep.subr.bf16.mxu0 %v5063_v31  ;;  %1652 = vmatprep.subr.bf16.mxu1 %v5069_v32 }
 0x161   :  { %4304 = vpow2.f32 %v723_v59 }
 0x162   :  { %3606 = vmatmul.mubr.msk.bf16.vlgmr.msra.gmra.mrb[40].mxu0 %vm227_vm1, %v4214_v58  ;;  %3608 = vmatmul.mubr.msk.bf16.vlgmr.msra.gmra.mrb[40].mxu1 %vm227_vm1, %v4214_v58 }
 0x163   :  { %1610 = vmatpush1.bf16.msra.mxu0 %v5077_v43  ;;  %1653 = vmatpush1.bf16.msra.mxu1 %v5083_v44 }
 0x164   :  { %1611 = vmatprep.subr.bf16.mxu0 %v5089_v45  ;;  %1654 = vmatprep.subr.bf16.mxu1 %v5095_v46 }
 0x165   :  { %1641 = vmatprep.mubr.bf16.mxu0 %v4416_v1  ;;  %1684 = vmatprep.mubr.bf16.mxu1 %v4416_v1 }
 0x167   :  { %1612 = vmatpush1.bf16.msra.mxu0 %v5103_v47  ;;  %1655 = vmatpush1.bf16.msra.mxu1 %v5109_v49 }
 0x168   :  { %1613 = vmatprep.subr.bf16.mxu0 %v5115_v50  ;;  %1656 = vmatprep.subr.bf16.mxu1 %v5121_v51 }
 0x169   :  { %v4303_v62 = vpop.eup %4302 }
 0x16a   :  { %v3546_v63 = vadd.f32 -1.0, %v4303_v62 }
 0x16b   :  { %v4305_v25 = vpop.eup %4304  ;;  %1614 = vmatpush1.bf16.msra.mxu0 %v5127_v56  ;;  %1657 = vmatpush1.bf16.msra.mxu1 %v5133_v57 }
 0x16c   :  { %v3547_v0 = vadd.f32 -1.0, %v4305_v25  ;;  %1615 = vmatprep.subr.bf16.mxu0 %v5139_v60  ;;  %1658 = vmatprep.subr.bf16.mxu1 %v5145_v61  ;;  %v727_v4 = vmul.f32 1.6732632, %v3546_v63 }
 0x16e   :  { %v728_v7 = vmul.f32 1.6732632, %v3547_v0  ;;  %v729_v8 = vsel %vm719_vm8, %v717_v24, %v727_v4  ;;  %v4215_v4 = vld [vmem:[%s6330_s0 + $0x58] sm:$0xff]  }
 0x16f   :  { %1616 = vmatpush1.bf16.msra.mxu0 %v5151_v26  ;;  %1659 = vmatpush1.bf16.msra.mxu1 %v5157_v27  ;;  %v731_v12 = vmul.f32 1.050701, %v729_v8 }
 0x170   :  { %1617 = vmatprep.subr.bf16.mxu0 %v5163_v2  ;;  %1660 = vmatprep.subr.bf16.mxu1 %v5169_v3  ;;  %v730_v11 = vsel %vm720_vm9, %v718_v55, %v728_v7 }
 0x171   :  { %v732_v14 = vmul.f32 1.050701, %v730_v11  ;;  %v733_v16 = vmul.f32 %v4986_v41, %v731_v12 }
 0x173   :  { %1618 = vmatpush1.bf16.msra.mxu0 %v5175_v5  ;;  %1661 = vmatpush1.bf16.msra.mxu1 %v5181_v6  ;;  %v734_v17 = vmul.f32 %v4986_v41, %v732_v14 }
 0x174   :  { %1619 = vmatprep.subr.bf16.mxu0 %v5189_v9  ;;  %1662 = vmatprep.subr.bf16.mxu1 %v5195_v10 }
 0x175   :  { %v782_v18 = vpop.f32.mrb[16].mxu0  ;;  %v825_v29 = vpop.f32.mrb[16].mxu1  ;;  %v5275_v37 = vpack.c.bf16 %v734_v17, %v733_v16 }
 0x176   :  { %v784_v38 = vpop.f32.mrb[17].mxu0  ;;  %v827_v21 = vpop.f32.mrb[17].mxu1 }
 0x177   :  { %v834_v40 = vmax.f32 %v782_v18, %v784_v38  ;;  %v836_v42 = vmax.f32 %v825_v29, %v827_v21  ;;  %v786_v23 = vpop.f32.mrb[18].mxu0  ;;  %v829_v24 = vpop.f32.mrb[18].mxu1  ;;  %1620 = vmatpush1.bf16.msra.mxu0 %v5203_v19  ;;  %1663 = vmatpush1.bf16.msra.mxu1 %v5209_v20 }
 0x178   :  { %v788_v28 = vpop.f32.mrb[19].mxu0  ;;  %v831_v54 = vpop.f32.mrb[19].mxu1  ;;  %1621 = vmatprep.subr.bf16.mxu0 %v5215_v22  ;;  %1664 = vmatprep.subr.bf16.mxu1 %v5221_v39 }
 0x179   :  { %v838_v55 = vmax.f32 %v834_v40, %v836_v42  ;;  %v835_v58 = vmax.f32 %v786_v23, %v788_v28  ;;  %v837_v59 = vmax.f32 %v829_v24, %v831_v54 }
 0x17b   :  { %v840_v62 = vadd.f32 %v4944_v52, %v838_v55  ;;  %v839_v63 = vmax.f32 %v835_v58, %v837_v59  ;;  %1622 = vmatpush1.bf16.msra.mxu0 %v5228_v30  ;;  %1665 = vmatpush1.bf16.msra.mxu1 %v5234_v53 }
 0x17c   :  { %3614 = vmatprep.subr.msk.bf16.mxu0 %vm231_vm0, %v4652_v35  ;;  %3616 = vmatprep.subr.msk.bf16.mxu1 %vm231_vm0, %v4654_v36 }
 0x17d   :  { %v844_v25 = vmul.f32 1.442695, %v840_v62  ;;  %v841_v0 = vadd.f32 %v4944_v52, %v839_v63  ;;  %vm842_vm10 = vcmp.gt.f32.partialorder %v840_v62, 0.0 }
 0x17f   :  { %4306 = vpow2.f32 %v844_v25  ;;  %v846_v7 = vmul.f32 1.442695, %v841_v0  ;;  %1624 = vmatpush1.bf16.msra.mxu0 %v4643_v33  ;;  %1667 = vmatpush1.bf16.msra.mxu1 %v4646_v34  ;;  %vm843_vm11 = vcmp.gt.f32.partialorder %v841_v0, 0.0 }
 0x180   :  { %1732 = vmatprep.subr.bf16.mxu0 %v5063_v31  ;;  %1775 = vmatprep.subr.bf16.mxu1 %v5069_v32 }
 0x181   :  { %4308 = vpow2.f32 %v846_v7 }
 0x182   :  { %3615 = vmatmul.mubr.msk.bf16.vlgmr.msra.gmra.mrb[44].mxu0 %vm227_vm1, %v4215_v4  ;;  %3617 = vmatmul.mubr.msk.bf16.vlgmr.msra.gmra.mrb[44].mxu1 %vm227_vm1, %v4215_v4 }
 0x183   :  { %1733 = vmatpush1.bf16.msra.mxu0 %v5077_v43  ;;  %1776 = vmatpush1.bf16.msra.mxu1 %v5083_v44 }
 0x184   :  { %1734 = vmatprep.subr.bf16.mxu0 %v5089_v45  ;;  %1777 = vmatprep.subr.bf16.mxu1 %v5095_v46 }
 0x185   :  { %1764 = vmatprep.mubr.bf16.mxu0 %v4416_v1  ;;  %1807 = vmatprep.mubr.bf16.mxu1 %v4416_v1 }
 0x187   :  { %1735 = vmatpush1.bf16.msra.mxu0 %v5103_v47  ;;  %1778 = vmatpush1.bf16.msra.mxu1 %v5109_v49 }
 0x188   :  { %1736 = vmatprep.subr.bf16.mxu0 %v5115_v50  ;;  %1779 = vmatprep.subr.bf16.mxu1 %v5121_v51 }
 0x189   :  { %v4307_v8 = vpop.eup %4306 }
 0x18a   :  { %v3555_v11 = vadd.f32 -1.0, %v4307_v8 }
 0x18b   :  { %v4309_v12 = vpop.eup %4308  ;;  %1737 = vmatpush1.bf16.msra.mxu0 %v5127_v56  ;;  %1780 = vmatpush1.bf16.msra.mxu1 %v5133_v57 }
 0x18c   :  { %v3556_v14 = vadd.f32 -1.0, %v4309_v12  ;;  %1738 = vmatprep.subr.bf16.mxu0 %v5139_v60  ;;  %1781 = vmatprep.subr.bf16.mxu1 %v5145_v61  ;;  %v850_v16 = vmul.f32 1.6732632, %v3555_v11 }
 0x18e   :  { %v851_v17 = vmul.f32 1.6732632, %v3556_v14  ;;  %v852_v18 = vsel %vm842_vm10, %v840_v62, %v850_v16 }
 0x18f   :  { %1739 = vmatpush1.bf16.msra.mxu0 %v5151_v26  ;;  %1782 = vmatpush1.bf16.msra.mxu1 %v5157_v27  ;;  %v854_v29 = vmul.f32 1.050701, %v852_v18 }
 0x190   :  { %1740 = vmatprep.subr.bf16.mxu0 %v5163_v2  ;;  %1783 = vmatprep.subr.bf16.mxu1 %v5169_v3  ;;  %v853_v38 = vsel %vm843_vm11, %v841_v0, %v851_v17  ;;  %v4216_v17 = vld [vmem:[%s6330_s0 + $0x60] sm:$0xff]  }
 0x191   :  { %v855_v21 = vmul.f32 1.050701, %v853_v38  ;;  %v856_v40 = vmul.f32 %v4986_v41, %v854_v29 }
 0x193   :  { %1741 = vmatpush1.bf16.msra.mxu0 %v5175_v5  ;;  %1784 = vmatpush1.bf16.msra.mxu1 %v5181_v6  ;;  %v857_v42 = vmul.f32 %v4986_v41, %v855_v21 }
 0x194   :  { %1742 = vmatprep.subr.bf16.mxu0 %v5189_v9  ;;  %1785 = vmatprep.subr.bf16.mxu1 %v5195_v10 }
 0x195   :  { %v905_v23 = vpop.f32.mrb[20].mxu0  ;;  %v948_v24 = vpop.f32.mrb[20].mxu1  ;;  %v5322_v28 = vpack.c.bf16 %v857_v42, %v856_v40 }
 0x196   :  { %v907_v54 = vpop.f32.mrb[21].mxu0  ;;  %v950_v55 = vpop.f32.mrb[21].mxu1 }
 0x197   :  { %v957_v58 = vmax.f32 %v905_v23, %v907_v54  ;;  %v959_v59 = vmax.f32 %v948_v24, %v950_v55  ;;  %v909_v62 = vpop.f32.mrb[22].mxu0  ;;  %v952_v63 = vpop.f32.mrb[22].mxu1  ;;  %1743 = vmatpush1.bf16.msra.mxu0 %v5203_v19  ;;  %1786 = vmatpush1.bf16.msra.mxu1 %v5209_v20  ;;  %v5423_v24 = vld [vmem:[%s6333_s4 + $0x110] ss:$8 sps:$4 sm:$0xff]   ;;  %v4232_v54 = vld [vmem:[%s6333_s4 + $0x24] ss:$8 sps:$4 sm:$0xff]  }
 0x198   :  { %v911_v25 = vpop.f32.mrb[23].mxu0  ;;  %v954_v0 = vpop.f32.mrb[23].mxu1  ;;  %1744 = vmatprep.subr.bf16.mxu0 %v5215_v22  ;;  %1787 = vmatprep.subr.bf16.mxu1 %v5221_v39  ;;  %v5432_v55 = vld [vmem:[%s6333_s4 + $0x124] ss:$8 sps:$4 sm:$0xff]  }
 0x199   :  { %v961_v4 = vmax.f32 %v957_v58, %v959_v59  ;;  %v958_v7 = vmax.f32 %v909_v62, %v911_v25  ;;  %v960_v8 = vmax.f32 %v952_v63, %v954_v0  ;;  %v4230_v58 = vld [vmem:[%s6333_s4 + $0x20] ss:$8 sps:$4 sm:$0xff]   ;;  %v4238_v62 = vld [vmem:[%s6333_s4 + $0x34] ss:$8 sps:$4 sm:$0xff]  }
 0x19a   :  { %v5442_v59 = vld [vmem:[%s6333_s4 + $0x120] ss:$8 sps:$4 sm:$0xff]   ;;  %v5451_v25 = vld [vmem:[%s6333_s4 + $0x134] ss:$8 sps:$4 sm:$0xff]  }
 0x19b   :  { %v963_v11 = vadd.f32 %v4944_v52, %v961_v4  ;;  %v962_v12 = vmax.f32 %v958_v7, %v960_v8  ;;  %1745 = vmatpush1.bf16.msra.mxu0 %v5228_v30  ;;  %1788 = vmatpush1.bf16.msra.mxu1 %v5234_v53  ;;  %v4236_v7 = vld [vmem:[%s6333_s4 + $0x30] ss:$8 sps:$4 sm:$0xff]  }
 0x19c   :  { %3623 = vmatprep.subr.msk.bf16.mxu0 %vm231_vm0, %v4652_v35  ;;  %3625 = vmatprep.subr.msk.bf16.mxu1 %vm231_vm0, %v4654_v36  ;;  %v5459_v8 = vld [vmem:[%s6333_s4 + $0x130] ss:$8 sps:$4 sm:$0xff]  }
 0x19d   :  { %v967_v14 = vmul.f32 1.442695, %v963_v11  ;;  %v964_v16 = vadd.f32 %v4944_v52, %v962_v12  ;;  %vm965_vm12 = vcmp.gt.f32.partialorder %v963_v11, 0.0  ;;  %v4244_v12 = vld [vmem:[%s6333_s4 + $0x44] ss:$8 sps:$4 sm:$0xff]  }
 0x19f   :  { %4310 = vpow2.f32 %v967_v14  ;;  %v969_v18 = vmul.f32 1.442695, %v964_v16  ;;  %1747 = vmatpush1.bf16.msra.mxu0 %v4643_v33  ;;  %1790 = vmatpush1.bf16.msra.mxu1 %v4646_v34  ;;  %vm966_vm13 = vcmp.gt.f32.partialorder %v964_v16, 0.0 }
 0x1a0   :  { %1855 = vmatprep.subr.bf16.mxu0 %v5063_v31  ;;  %1898 = vmatprep.subr.bf16.mxu1 %v5069_v32 }
 0x1a1   :  { %4312 = vpow2.f32 %v969_v18 }
 0x1a2   :  { %3624 = vmatmul.mubr.msk.bf16.vlgmr.msra.gmra.mrb[48].mxu0 %vm227_vm1, %v4216_v17  ;;  %3626 = vmatmul.mubr.msk.bf16.vlgmr.msra.gmra.mrb[48].mxu1 %vm227_vm1, %v4216_v17 }
 0x1a3   :  { %1856 = vmatpush1.bf16.msra.mxu0 %v5077_v43  ;;  %1899 = vmatpush1.bf16.msra.mxu1 %v5083_v44 }
 0x1a4   :  { %1857 = vmatprep.subr.bf16.mxu0 %v5089_v45  ;;  %1900 = vmatprep.subr.bf16.mxu1 %v5095_v46 }
 0x1a5   :  { %1887 = vmatprep.mubr.bf16.mxu0 %v4416_v1  ;;  %1930 = vmatprep.mubr.bf16.mxu1 %v4416_v1 }
 0x1a7   :  { %1858 = vmatpush1.bf16.msra.mxu0 %v5103_v47  ;;  %1901 = vmatpush1.bf16.msra.mxu1 %v5109_v49 }
 0x1a8   :  { %1859 = vmatprep.subr.bf16.mxu0 %v5115_v50  ;;  %1902 = vmatprep.subr.bf16.mxu1 %v5121_v51 }
 0x1a9   :  { %v4311_v31 = vpop.eup %4310 }
 0x1aa   :  { %v3564_v32 = vadd.f32 -1.0, %v4311_v31  ;;  %v4242_v31 = vld [vmem:[%s6333_s4 + $0x40] ss:$8 sps:$4 sm:$0xff]  }
 0x1ab   :  { %v4313_v43 = vpop.eup %4312  ;;  %1860 = vmatpush1.bf16.msra.mxu0 %v5127_v56  ;;  %1903 = vmatpush1.bf16.msra.mxu1 %v5133_v57 }
 0x1ac   :  { %v3565_v44 = vadd.f32 -1.0, %v4313_v43  ;;  %1861 = vmatprep.subr.bf16.mxu0 %v5139_v60  ;;  %1904 = vmatprep.subr.bf16.mxu1 %v5145_v61  ;;  %v973_v45 = vmul.f32 1.6732632, %v3564_v32  ;;  %v5478_v43 = vld [vmem:[%s6333_s4 + $0x140] ss:$8 sps:$4 sm:$0xff]  }
 0x1ae   :  { %v974_v46 = vmul.f32 1.6732632, %v3565_v44  ;;  %v975_v47 = vsel %vm965_vm12, %v963_v11, %v973_v45  ;;  %v4250_v44 = vld [vmem:[%s6333_s4 + $0x54] ss:$8 sps:$4 sm:$0xff]  }
 0x1af   :  { %1862 = vmatpush1.bf16.msra.mxu0 %v5151_v26  ;;  %1905 = vmatpush1.bf16.msra.mxu1 %v5157_v27  ;;  %v977_v49 = vmul.f32 1.050701, %v975_v47 }
 0x1b0   :  { %1863 = vmatprep.subr.bf16.mxu0 %v5163_v2  ;;  %1906 = vmatprep.subr.bf16.mxu1 %v5169_v3  ;;  %v976_v50 = vsel %vm966_vm13, %v964_v16, %v974_v46  ;;  %v5469_v16 = vld [vmem:[%s6333_s4 + $0x144] ss:$8 sps:$4 sm:$0xff]   ;;  %v5487_v46 = vld [vmem:[%s6333_s4 + $0x154] ss:$8 sps:$4 sm:$0xff]  }
 0x1b1   :  { %v978_v51 = vmul.f32 1.050701, %v976_v50  ;;  %v979_v56 = vmul.f32 %v4986_v41, %v977_v49  ;;  %v4248_v49 = vld [vmem:[%s6333_s4 + $0x50] ss:$8 sps:$4 sm:$0xff]  }
 0x1b3   :  { %1864 = vmatpush1.bf16.msra.mxu0 %v5175_v5  ;;  %1907 = vmatpush1.bf16.msra.mxu1 %v5181_v6  ;;  %v980_v57 = vmul.f32 %v4986_v41, %v978_v51 }
 0x1b4   :  { %1865 = vmatprep.subr.bf16.mxu0 %v5189_v9  ;;  %1908 = vmatprep.subr.bf16.mxu1 %v5195_v10 }
 0x1b5   :  { %v1028_v60 = vpop.f32.mrb[24].mxu0  ;;  %v1071_v61 = vpop.f32.mrb[24].mxu1  ;;  %v5369_v26 = vpack.c.bf16 %v980_v57, %v979_v56  ;;  %v5498_v56 = vld [vmem:[%s6333_s4 + $0x150] ss:$8 sps:$4 sm:$0xff]   ;;  %v4256_v57 = vld [vmem:[%s6333_s4 + $0x64] ss:$8 sps:$4 sm:$0xff]  }
 0x1b6   :  { %v1030_v27 = vpop.f32.mrb[25].mxu0  ;;  %v1073_v2 = vpop.f32.mrb[25].mxu1 }
 0x1b7   :  { %v1080_v3 = vmax.f32 %v1028_v60, %v1030_v27  ;;  %v1082_v29 = vmax.f32 %v1071_v61, %v1073_v2  ;;  %v1032_v38 = vpop.f32.mrb[26].mxu0  ;;  %v1075_v5 = vpop.f32.mrb[26].mxu1  ;;  %1866 = vmatpush1.bf16.msra.mxu0 %v5203_v19  ;;  %1909 = vmatpush1.bf16.msra.mxu1 %v5209_v20  ;;  %v4220_v19 = vld [vmem:[%s6333_s4 + $0x4] ss:$8 sps:$4 sm:$0xff]  }
 0x1b8   :  { %v1034_v6 = vpop.f32.mrb[27].mxu0  ;;  %v1077_v21 = vpop.f32.mrb[27].mxu1  ;;  %1867 = vmatprep.subr.bf16.mxu0 %v5215_v22  ;;  %1910 = vmatprep.subr.bf16.mxu1 %v5221_v39  ;;  %v5388_v20 = vld [vmem:[%s6333_s4 + $0x104] ss:$8 sps:$4 sm:$0xff]  }
 0x1b9   :  { %v1084_v9 = vmax.f32 %v1080_v3, %v1082_v29  ;;  %v1081_v10 = vmax.f32 %v1032_v38, %v1034_v6  ;;  %v1083_v40 = vmax.f32 %v1075_v5, %v1077_v21  ;;  %v4254_v21 = vld [vmem:[%s6333_s4 + $0x60] ss:$8 sps:$4 sm:$0xff]  }
 0x1bb   :  { %v1086_v42 = vadd.f32 %v4944_v52, %v1084_v9  ;;  %v1085_v23 = vmax.f32 %v1081_v10, %v1083_v40  ;;  %1868 = vmatpush1.bf16.msra.mxu0 %v5228_v30  ;;  %1911 = vmatpush1.bf16.msra.mxu1 %v5234_v53  ;;  %v4217_v30 = vld [vmem:[%s6330_s0 + $0x68] sm:$0xff]  }
 0x1bc   :  { %3632 = vmatprep.subr.msk.bf16.mxu0 %vm231_vm0, %v4652_v35  ;;  %3634 = vmatprep.subr.msk.bf16.mxu1 %vm231_vm0, %v4654_v36  ;;  %v4218_v36 = vld [vmem:[%s6333_s4] ss:$8 sps:$4 sm:$0xff]  }
 0x1bd   :  { %v1090_v22 = vmul.f32 1.442695, %v1086_v42  ;;  %v1087_v39 = vadd.f32 %v4944_v52, %v1085_v23  ;;  %v5402_v53 = vld [vmem:[%s6333_s4 + $0x100] ss:$8 sps:$4 sm:$0xff]   ;;  %v4226_v52 = vld [vmem:[%s6333_s4 + $0x14] ss:$8 sps:$4 sm:$0xff]  }
 0x1be   :  { %vm1088_vm14 = vcmp.gt.f32.partialorder %v1086_v42, 0.0  ;;  %v5518_v40 = vld [vmem:[%s6333_s4 + $0x160] ss:$8 sps:$4 sm:$0xff]  }
 0x1bf   :  { %4314 = vpow2.f32 %v1090_v22  ;;  %v1092_v35 = vmul.f32 1.442695, %v1087_v39  ;;  %1870 = vmatpush1.bf16.msra.mxu0 %v4643_v33  ;;  %1913 = vmatpush1.bf16.msra.mxu1 %v4646_v34  ;;  %v5411_v33 = vld [vmem:[%s6333_s4 + $0x114] ss:$8 sps:$4 sm:$0xff]   ;;  %v4224_v34 = vld [vmem:[%s6333_s4 + $0x10] ss:$8 sps:$4 sm:$0xff]  }
 0x1c0   :  { %2381 = vmatprep.subr.bf16.mxu0 %v4220_v19  ;;  %4085 = vmatprep.subr.bf16.mxu1 %v5388_v20  ;;  %vm1089_vm15 = vcmp.gt.f32.partialorder %v1087_v39, 0.0 }
 0x1c1   :  { %4316 = vpow2.f32 %v1092_v35 }
 0x1c2   :  { %3633 = vmatmul.mubr.msk.bf16.vlgmr.msra.gmra.mrb[52].mxu0 %vm227_vm1, %v4217_v30  ;;  %3635 = vmatmul.mubr.msk.bf16.vlgmr.msra.gmra.mrb[52].mxu1 %vm227_vm1, %v4217_v30  ;;  %v5532_v30 = vld [vmem:[%s6331_s2] ss:$0 sm:$0xff] }
 0x1c3   :  { %2382 = vmatpush1.bf16.msra.mxu0 %v4218_v36  ;;  %2413 = vmatprep.mubr.bf16.mxu0 %v4994_v48 }
 0x1c4   :  { %4093 = vmatpush1.bf16.msra.mxu1 %v5402_v53  ;;  %2383 = vmatprep.subr.bf16.mxu0 %v4226_v52  ;;  %v4260_v52 = vld [vmem:[%s6333_s4 + $0x70] ss:$8 sps:$4 sm:$0xff]  }
 0x1c5   :  { %4086 = vmatprep.subr.bf16.mxu1 %v5411_v33  ;;  %2656 = vmatprep.mubr.bf16.mxu1 %v4416_v1 }
 0x1c7   :  { %2384 = vmatpush1.bf16.msra.mxu0 %v4224_v34  ;;  %v5542_v34 = vld [vmem:[%s6333_s4 + $0x170] ss:$8 sps:$4 sm:$0xff]  }
 0x1c8   :  { %4094 = vmatpush1.bf16.msra.mxu1 %v5423_v24  ;;  %2385 = vmatprep.subr.bf16.mxu0 %v4232_v54  ;;  %v4268_v54 = vld [vmem:[%s6333_s4 + $0x84] ss:$8 sps:$4 sm:$0xff]  }
 0x1c9   :  { %v4315_v63 = vpop.eup %4314  ;;  %4087 = vmatprep.subr.bf16.mxu1 %v5432_v55 }
 0x1ca   :  { %v3573_v0 = vadd.f32 -1.0, %v4315_v63 }
 0x1cb   :  { %v4317_v4 = vpop.eup %4316  ;;  %2386 = vmatpush1.bf16.msra.mxu0 %v4230_v58 }
 0x1cc   :  { %v3574_v11 = vadd.f32 -1.0, %v4317_v4  ;;  %4095 = vmatpush1.bf16.msra.mxu1 %v5442_v59  ;;  %2387 = vmatprep.subr.bf16.mxu0 %v4238_v62  ;;  %v1096_v14 = vmul.f32 1.6732632, %v3573_v0  ;;  %v4266_v0 = vld [vmem:[%s6333_s4 + $0x80] ss:$8 sps:$4 sm:$0xff]  }
 0x1cd   :  { %4088 = vmatprep.subr.bf16.mxu1 %v5451_v25  ;;  %v4271_v4 = vld [vmem:[%s6333_s4 + $0x94] ss:$8 sps:$4 sm:$0xff]  }
 0x1ce   :  { %v1097_v17 = vmul.f32 1.6732632, %v3574_v11  ;;  %v1098_v18 = vsel %vm1088_vm14, %v1086_v42, %v1096_v14  ;;  %v4262_v42 = vld [vmem:[%s6333_s4 + $0x74] ss:$8 sps:$4 sm:$0xff]   ;;  %v4274_v11 = vld [vmem:[%s6333_s4 + $0xa4] ss:$8 sps:$4 sm:$0xff]  }
 0x1cf   :  { %2388 = vmatpush1.bf16.msra.mxu0 %v4236_v7  ;;  %v1100_v32 = vmul.f32 1.050701, %v1098_v18  ;;  %v4269_v7 = vld [vmem:[%s6333_s4 + $0x90] ss:$8 sps:$4 sm:$0xff]   ;;  %v4277_v14 = vld [vmem:[%s6333_s4 + $0xb4] ss:$8 sps:$4 sm:$0xff]  }
 0x1d0   :  { %4096 = vmatpush1.bf16.msra.mxu1 %v5459_v8  ;;  %2389 = vmatprep.subr.bf16.mxu0 %v4244_v12  ;;  %v1099_v45 = vsel %vm1089_vm15, %v1087_v39, %v1097_v17  ;;  %v5527_v39 = vld [vmem:[%s6333_s4 + $0x174] ss:$8 sps:$4 sm:$0xff]   ;;  %v4272_v12 = vld [vmem:[%s6333_s4 + $0xa0] ss:$8 sps:$4 sm:$0xff]  }
 0x1d1   :  { %4089 = vmatprep.subr.bf16.mxu1 %v5469_v16  ;;  %v1101_v47 = vmul.f32 1.050701, %v1099_v45  ;;  %v1102_v50 = vmul.f32 %v4986_v41, %v1100_v32  ;;  %v4275_v32 = vld [vmem:[%s6333_s4 + $0xb0] ss:$8 sps:$4 sm:$0xff]   ;;  %v4280_v45 = vld [vmem:[%s6333_s4 + $0xc4] ss:$8 sps:$4 sm:$0xff]  }
 0x1d3   :  { %2390 = vmatpush1.bf16.msra.mxu0 %v4242_v31  ;;  %v1103_v51 = vmul.f32 %v4986_v41, %v1101_v47  ;;  %v5507_v41 = vld [vmem:[%s6333_s4 + $0x164] ss:$8 sps:$4 sm:$0xff]  }
 0x1d4   :  { %4097 = vmatpush1.bf16.msra.mxu1 %v5478_v43  ;;  %2391 = vmatprep.subr.bf16.mxu0 %v4250_v44 }
 0x1d5   :  { %v1151_v60 = vpop.f32.mrb[28].mxu0  ;;  %v1194_v61 = vpop.f32.mrb[28].mxu1  ;;  %4090 = vmatprep.subr.bf16.mxu1 %v5487_v46  ;;  %v5509_v27 = vpack.c.bf16 %v1103_v51, %v1102_v50  ;;  %v4278_v51 = vld [vmem:[%s6333_s4 + $0xc0] ss:$8 sps:$4 sm:$0xff]  }
 0x1d6   :  { %v1153_v2 = vpop.f32.mrb[29].mxu0  ;;  %v1196_v3 = vpop.f32.mrb[29].mxu1 }
 0x1d7   :  { %v1203_v29 = vmax.f32 %v1151_v60, %v1153_v2  ;;  %v1205_v38 = vmax.f32 %v1194_v61, %v1196_v3  ;;  %v1155_v5 = vpop.f32.mrb[30].mxu0  ;;  %v1198_v6 = vpop.f32.mrb[30].mxu1  ;;  %2392 = vmatpush1.bf16.msra.mxu0 %v4248_v49  ;;  %v4283_v60 = vld [vmem:[%s6333_s4 + $0xd4] ss:$8 sps:$4 sm:$0xff]   ;;  %v4281_v3 = vld [vmem:[%s6333_s4 + $0xd0] ss:$8 sps:$4 sm:$0xff]  }
 0x1d8   :  { %4098 = vmatpush1.bf16.msra.mxu1 %v5498_v56  ;;  %v1157_v9 = vpop.f32.mrb[31].mxu0  ;;  %v1200_v10 = vpop.f32.mrb[31].mxu1  ;;  %2393 = vmatprep.subr.bf16.mxu0 %v4256_v57 }
 0x1d9   :  { %v1207_v23 = vmax.f32 %v1203_v29, %v1205_v38  ;;  %v1204_v19 = vmax.f32 %v1155_v5, %v1157_v9  ;;  %v1206_v22 = vmax.f32 %v1198_v6, %v1200_v10  ;;  %4091 = vmatprep.subr.bf16.mxu1 %v5507_v41  ;;  %v5591_v29 = vld [vmem:[%s6332_s3] ss:$0 sm:$0xff]  ;;  %v4286_v6 = vld [vmem:[%s6333_s4 + $0xe4] ss:$8 sps:$4 sm:$0xff]  }
 0x1db   :  { %v1209_v35 = vadd.f32 %v5532_v30, %v1207_v23  ;;  %v1208_v36 = vmax.f32 %v1204_v19, %v1206_v22  ;;  %2394 = vmatpush1.bf16.msra.mxu0 %v4254_v21 }
 0x1dc   :  { %4099 = vmatpush1.bf16.msra.mxu1 %v5518_v40  ;;  %2395 = vmatprep.subr.bf16.mxu0 %v4262_v42 }
 0x1dd   :  { %v1213_v58 = vmul.f32 1.442695, %v1209_v35  ;;  %v1210_v62 = vadd.f32 %v5532_v30, %v1208_v36  ;;  %4092 = vmatprep.subr.bf16.mxu1 %v5527_v39  ;;  %vm1211_vm0 = vcmp.gt.f32.partialorder %v1209_v35, 0.0 }
 0x1df   :  { %4318 = vpow2.f32 %v1213_v58  ;;  %v1215_v63 = vmul.f32 1.442695, %v1210_v62  ;;  %2396 = vmatpush1.bf16.msra.mxu0 %v4260_v52  ;;  %vm1212_vm1 = vcmp.gt.f32.partialorder %v1210_v62, 0.0  ;;  %v4284_v52 = vld [vmem:[%s6333_s4 + $0xe0] ss:$8 sps:$4 sm:$0xff]  }
 0x1e0   :  { %4100 = vmatpush1.bf16.msra.mxu1 %v5542_v34  ;;  %2397 = vmatprep.subr.bf16.mxu0 %v4268_v54 }
 0x1e1   :  { %4320 = vpow2.f32 %v1215_v63 }
 0x1e3   :  { %2657 = vmatmul.mubr.bf16.vlgmr.msra.gmra.mrb[56].mxu1 %v5198_v13  ;;  %2398 = vmatpush1.bf16.msra.mxu0 %v4266_v0 }
 0x1e4   :  { %2399 = vmatprep.subr.bf16.mxu0 %v4271_v4  ;;  %2666 = vmatprep.mubr.bf16.mxu1 %v4416_v1 }
 0x1e7   :  { %2400 = vmatpush1.bf16.msra.mxu0 %v4269_v7 }
 0x1e8   :  { %2401 = vmatprep.subr.bf16.mxu0 %v4274_v11 }
 0x1e9   :  { %v4319_v17 = vpop.eup %4318 }
 0x1ea   :  { %v3582_v18 = vadd.f32 -1.0, %v4319_v17 }
 0x1eb   :  { %v4321_v31 = vpop.eup %4320  ;;  %2667 = vmatmul.mubr.bf16.gmra.mrb[60].mxu1 %v5322_v28  ;;  %2402 = vmatpush1.bf16.msra.mxu0 %v4272_v12  ;;  %v4287_v12 = vld [vmem:[%s6333_s4 + $0xf0] ss:$8 sps:$4 sm:$0xff]  }
 0x1ec   :  { %v3583_v44 = vadd.f32 -1.0, %v4321_v31  ;;  %2403 = vmatprep.subr.bf16.mxu0 %v4277_v14  ;;  %2676 = vmatprep.mubr.bf16.mxu1 %v4416_v1  ;;  %v1219_v47 = vmul.f32 1.6732632, %v3582_v18 }
 0x1ee   :  { %v1220_v49 = vmul.f32 1.6732632, %v3583_v44  ;;  %v1221_v50 = vsel %vm1211_vm0, %v1209_v35, %v1219_v47 }
 0x1ef   :  { %2404 = vmatpush1.bf16.msra.mxu0 %v4275_v32  ;;  %v1223_v57 = vmul.f32 1.050701, %v1221_v50 }
 0x1f0   :  { %2405 = vmatprep.subr.bf16.mxu0 %v4280_v45  ;;  %v1222_v61 = vsel %vm1212_vm1, %v1210_v62, %v1220_v49  ;;  %v4289_v62 = vld [vmem:[%s6333_s4 + $0xf4] ss:$8 sps:$4 sm:$0xff]  }
 0x1f1   :  { %v1224_v2 = vmul.f32 1.050701, %v1222_v61  ;;  %v1225_v38 = vmul.f32 %v5591_v29, %v1223_v57 }
 0x1f3   :  { %2677 = vmatmul.mubr.bf16.gmra.mrb[64].mxu1 %v5509_v27  ;;  %2406 = vmatpush1.bf16.msra.mxu0 %v4278_v51  ;;  %v1226_v5 = vmul.f32 %v5591_v29, %v1224_v2 }
 0x1f4   :  { %2407 = vmatprep.subr.bf16.mxu0 %v4283_v60  ;;  %2686 = vmatprep.mubr.bf16.mxu1 %v4416_v1 }
 0x1f5   :  { %v1274_v21 = vpop.f32.mrb[32].mxu0  ;;  %v1317_v9 = vpop.f32.mrb[32].mxu1  ;;  %v5599_v10 = vpack.c.bf16 %v1226_v5, %v1225_v38 }
 0x1f6   :  { %v1276_v42 = vpop.f32.mrb[33].mxu0  ;;  %v1319_v23 = vpop.f32.mrb[33].mxu1 }
 0x1f7   :  { %v1326_v19 = vmax.f32 %v1274_v21, %v1276_v42  ;;  %v1328_v22 = vmax.f32 %v1317_v9, %v1319_v23  ;;  %v1278_v35 = vpop.f32.mrb[34].mxu0  ;;  %v1321_v36 = vpop.f32.mrb[34].mxu1  ;;  %2408 = vmatpush1.bf16.msra.mxu0 %v4281_v3 }
 0x1f8   :  { %v1280_v54 = vpop.f32.mrb[35].mxu0  ;;  %v1323_v58 = vpop.f32.mrb[35].mxu1  ;;  %2409 = vmatprep.subr.bf16.mxu0 %v4286_v6 }
 0x1f9   :  { %v1330_v63 = vmax.f32 %v1326_v19, %v1328_v22  ;;  %v1327_v0 = vmax.f32 %v1278_v35, %v1280_v54  ;;  %v1329_v4 = vmax.f32 %v1321_v36, %v1323_v58 }
 0x1fb   :  { %v1332_v7 = vadd.f32 %v5532_v30, %v1330_v63  ;;  %v1331_v11 = vmax.f32 %v1327_v0, %v1329_v4  ;;  %2410 = vmatpush1.bf16.msra.mxu0 %v4284_v52 }
 0x1fc   :  { %2411 = vmatprep.subr.bf16.mxu0 %v4289_v62 }
 0x1fd   :  { %v1336_v14 = vmul.f32 1.442695, %v1332_v7  ;;  %v1333_v17 = vadd.f32 %v5532_v30, %v1331_v11  ;;  %vm1334_vm2 = vcmp.gt.f32.partialorder %v1332_v7, 0.0 }
 0x1ff   :  { %4322 = vpow2.f32 %v1336_v14  ;;  %v1338_v18 = vmul.f32 1.442695, %v1333_v17  ;;  %2412 = vmatpush1.bf16.msra.mxu0 %v4287_v12  ;;  %vm1335_vm3 = vcmp.gt.f32.partialorder %v1333_v17, 0.0 }
 0x200   :  { %2554 = vmatprep.subr.bf16.mxu0 %v5388_v20 }
 0x201   :  { %4324 = vpow2.f32 %v1338_v18 }
 0x202   :  { %2414 = vmatmul.mubr.bf16.vlgmr.msra.gmra.mrb[56].mxu0 %v4416_v1 }
 0x203   :  { %2423 = vmatprep.mubr.bf16.mxu0 %v5198_v13  ;;  %2555 = vmatpush1.bf16.msra.mxu0 %v5402_v53 }
 0x204   :  { %2556 = vmatprep.subr.bf16.mxu0 %v5411_v33 }
 0x207   :  { %2557 = vmatpush1.bf16.msra.mxu0 %v5423_v24 }
 0x208   :  { %2558 = vmatprep.subr.bf16.mxu0 %v5432_v55 }
 0x209   :  { %v4323_v31 = vpop.eup %4322 }
 0x20a   :  { %v3591_v32 = vadd.f32 -1.0, %v4323_v31  ;;  %2424 = vmatmul.mubr.bf16.gmra.mrb[60].mxu0 %v5041_v15 }
 0x20b   :  { %v4325_v44 = vpop.eup %4324  ;;  %2433 = vmatprep.mubr.bf16.mxu0 %v5322_v28  ;;  %2559 = vmatpush1.bf16.msra.mxu0 %v5442_v59 }
 0x20c   :  { %v3592_v20 = vadd.f32 -1.0, %v4325_v44  ;;  %v1342_v45 = vmul.f32 1.6732632, %v3591_v32  ;;  %2560 = vmatprep.subr.bf16.mxu0 %v5451_v25 }
 0x20e   :  { %v1343_v53 = vmul.f32 1.6732632, %v3592_v20  ;;  %v1344_v33 = vsel %vm1334_vm2, %v1332_v7, %v1342_v45 }
 0x20f   :  { %v1346_v24 = vmul.f32 1.050701, %v1344_v33  ;;  %2561 = vmatpush1.bf16.msra.mxu0 %v5459_v8 }
 0x210   :  { %v1345_v55 = vsel %vm1335_vm3, %v1333_v17, %v1343_v53  ;;  %2562 = vmatprep.subr.bf16.mxu0 %v5469_v16 }
 0x211   :  { %v1347_v47 = vmul.f32 1.050701, %v1345_v55  ;;  %v1348_v59 = vmul.f32 %v5591_v29, %v1346_v24 }
 0x212   :  { %2434 = vmatmul.mubr.bf16.gmra.mrb[64].mxu0 %v5275_v37 }
 0x213   :  { %2443 = vmatprep.mubr.bf16.mxu0 %v5509_v27  ;;  %v1349_v49 = vmul.f32 %v5591_v29, %v1347_v47  ;;  %2563 = vmatpush1.bf16.msra.mxu0 %v5478_v43 }
 0x214   :  { %2564 = vmatprep.subr.bf16.mxu0 %v5487_v46 }
 0x215   :  { %v1397_v25 = vpop.f32.mrb[36].mxu0  ;;  %v1440_v50 = vpop.f32.mrb[36].mxu1  ;;  %v5631_v51 = vpack.c.bf16 %v1349_v49, %v1348_v59 }
 0x216   :  { %v1399_v8 = vpop.f32.mrb[37].mxu0  ;;  %v1442_v57 = vpop.f32.mrb[37].mxu1 }
 0x217   :  { %v1449_v16 = vmax.f32 %v1397_v25, %v1399_v8  ;;  %v1451_v60 = vmax.f32 %v1440_v50, %v1442_v57  ;;  %v1401_v61 = vpop.f32.mrb[38].mxu0  ;;  %v1444_v2 = vpop.f32.mrb[38].mxu1  ;;  %2687 = vmatmul.mubr.bf16.gmra.mrb[68].mxu1 %v5631_v51  ;;  %2565 = vmatpush1.bf16.msra.mxu0 %v5498_v56 }
 0x218   :  { %v1403_v3 = vpop.f32.mrb[39].mxu0  ;;  %v1446_v38 = vpop.f32.mrb[39].mxu1  ;;  %2696 = vmatprep.mubr.bf16.mxu1 %v4416_v1  ;;  %2566 = vmatprep.subr.bf16.mxu0 %v5507_v41 }
 0x219   :  { %v1453_v43 = vmax.f32 %v1449_v16, %v1451_v60  ;;  %v1450_v46 = vmax.f32 %v1401_v61, %v1403_v3  ;;  %v1452_v5 = vmax.f32 %v1444_v2, %v1446_v38 }
 0x21a   :  { %2444 = vmatmul.mubr.bf16.gmra.mrb[68].mxu0 %v5369_v26 }
 0x21b   :  { %v1455_v6 = vadd.f32 %v5532_v30, %v1453_v43  ;;  %v1454_v21 = vmax.f32 %v1450_v46, %v1452_v5  ;;  %2453 = vmatprep.mubr.bf16.mxu0 %v5631_v51  ;;  %2567 = vmatpush1.bf16.msra.mxu0 %v5518_v40 }
 0x21c   :  { %2568 = vmatprep.subr.bf16.mxu0 %v5527_v39 }
 0x21d   :  { %v1459_v56 = vmul.f32 1.442695, %v1455_v6  ;;  %v1456_v9 = vadd.f32 %v5532_v30, %v1454_v21  ;;  %vm1457_vm4 = vcmp.gt.f32.partialorder %v1455_v6, 0.0 }
 0x21f   :  { %4326 = vpow2.f32 %v1459_v56  ;;  %v1461_v42 = vmul.f32 1.442695, %v1456_v9  ;;  %2569 = vmatpush1.bf16.msra.mxu0 %v5542_v34  ;;  %vm1458_vm5 = vcmp.gt.f32.partialorder %v1456_v9, 0.0 }
 0x221   :  { %4328 = vpow2.f32 %v1461_v42 }
 0x222   :  { %2454 = vmatmul.mubr.bf16.gmra.mrb[72].mxu0 %v5599_v10 }
 0x229   :  { %v4327_v41 = vpop.eup %4326 }
 0x22a   :  { %v3600_v23 = vadd.f32 -1.0, %v4327_v41 }
 0x22b   :  { %v4329_v19 = vpop.eup %4328 }
 0x22c   :  { %v3601_v22 = vadd.f32 -1.0, %v4329_v19  ;;  %v1465_v35 = vmul.f32 1.6732632, %v3600_v23 }
 0x22e   :  { %v1466_v36 = vmul.f32 1.6732632, %v3601_v22  ;;  %v1467_v40 = vsel %vm1457_vm4, %v1455_v6, %v1465_v35 }
 0x22f   :  { %v1469_v39 = vmul.f32 1.050701, %v1467_v40 }
 0x230   :  { %v1468_v52 = vsel %vm1458_vm5, %v1456_v9, %v1466_v36 }
 0x231   :  { %v1470_v54 = vmul.f32 1.050701, %v1468_v52  ;;  %v1471_v58 = vmul.f32 %v5591_v29, %v1469_v39 }
 0x233   :  { %v1472_v62 = vmul.f32 %v5591_v29, %v1470_v54 }
 0x235   :  { %v1520_v34 = vpop.f32.mrb[40].mxu0  ;;  %v1563_v63 = vpop.f32.mrb[40].mxu1  ;;  %v5647_v0 = vpack.c.bf16 %v1472_v62, %v1471_v58 }
 0x236   :  { %v1522_v4 = vpop.f32.mrb[41].mxu0  ;;  %v1565_v7 = vpop.f32.mrb[41].mxu1 }
 0x237   :  { %v1572_v11 = vmax.f32 %v1520_v34, %v1522_v4  ;;  %v1574_v12 = vmax.f32 %v1563_v63, %v1565_v7  ;;  %v1524_v14 = vpop.f32.mrb[42].mxu0  ;;  %v1567_v17 = vpop.f32.mrb[42].mxu1 }
 0x238   :  { %v1526_v18 = vpop.f32.mrb[43].mxu0  ;;  %v1569_v31 = vpop.f32.mrb[43].mxu1 }
 0x239   :  { %v1576_v32 = vmax.f32 %v1572_v11, %v1574_v12  ;;  %v1573_v44 = vmax.f32 %v1524_v14, %v1526_v18  ;;  %v1575_v20 = vmax.f32 %v1567_v17, %v1569_v31 }
 0x23b   :  { %v1578_v45 = vadd.f32 %v5532_v30, %v1576_v32  ;;  %v1577_v53 = vmax.f32 %v1573_v44, %v1575_v20 }
 0x23d   :  { %v1582_v33 = vmul.f32 1.442695, %v1578_v45  ;;  %v1579_v24 = vadd.f32 %v5532_v30, %v1577_v53  ;;  %vm1580_vm6 = vcmp.gt.f32.partialorder %v1578_v45, 0.0 }
 0x23f   :  { %4330 = vpow2.f32 %v1582_v33  ;;  %v1584_v55 = vmul.f32 1.442695, %v1579_v24  ;;  %vm1581_vm7 = vcmp.gt.f32.partialorder %v1579_v24, 0.0 }
 0x241   :  { %4332 = vpow2.f32 %v1584_v55 }
 0x249   :  { %v4331_v47 = vpop.eup %4330 }
 0x24a   :  { %v3609_v59 = vadd.f32 -1.0, %v4331_v47 }
 0x24b   :  { %v4333_v49 = vpop.eup %4332 }
 0x24c   :  { %v3610_v25 = vadd.f32 -1.0, %v4333_v49  ;;  %v1588_v50 = vmul.f32 1.6732632, %v3609_v59 }
 0x24e   :  { %v1589_v8 = vmul.f32 1.6732632, %v3610_v25  ;;  %v1590_v57 = vsel %vm1580_vm6, %v1578_v45, %v1588_v50 }
 0x24f   :  { %v1592_v16 = vmul.f32 1.050701, %v1590_v57 }
 0x250   :  { %v1591_v60 = vsel %vm1581_vm7, %v1579_v24, %v1589_v8 }
 0x251   :  { %v1593_v61 = vmul.f32 1.050701, %v1591_v60  ;;  %v1594_v2 = vmul.f32 %v5591_v29, %v1592_v16 }
 0x253   :  { %v1595_v3 = vmul.f32 %v5591_v29, %v1593_v61 }
 0x255   :  { %v1643_v38 = vpop.f32.mrb[44].mxu0  ;;  %v1686_v43 = vpop.f32.mrb[44].mxu1  ;;  %v5653_v46 = vpack.c.bf16 %v1595_v3, %v1594_v2 }
 0x256   :  { %v1645_v5 = vpop.f32.mrb[45].mxu0  ;;  %v1688_v6 = vpop.f32.mrb[45].mxu1 }
 0x257   :  { %v1695_v21 = vmax.f32 %v1643_v38, %v1645_v5  ;;  %v1697_v56 = vmax.f32 %v1686_v43, %v1688_v6  ;;  %v1647_v9 = vpop.f32.mrb[46].mxu0  ;;  %v1690_v42 = vpop.f32.mrb[46].mxu1  ;;  %2463 = vmatprep.mubr.bf16.mxu0 %v5653_v46  ;;  %2697 = vmatmul.mubr.bf16.gmra.mrb[72].mxu1 %v5653_v46 }
 0x258   :  { %v1649_v41 = vpop.f32.mrb[47].mxu0  ;;  %v1692_v23 = vpop.f32.mrb[47].mxu1  ;;  %2464 = vmatmul.mubr.bf16.gmra.mrb[76].mxu0 %v5647_v0  ;;  %2706 = vmatprep.mubr.bf16.mxu1 %v4416_v1 }
 0x259   :  { %v1699_v19 = vmax.f32 %v1695_v21, %v1697_v56  ;;  %v1696_v22 = vmax.f32 %v1647_v9, %v1649_v41  ;;  %v1698_v35 = vmax.f32 %v1690_v42, %v1692_v23 }
 0x25b   :  { %v1701_v36 = vadd.f32 %v5532_v30, %v1699_v19  ;;  %v1700_v40 = vmax.f32 %v1696_v22, %v1698_v35 }
 0x25d   :  { %v1705_v39 = vmul.f32 1.442695, %v1701_v36  ;;  %v1702_v52 = vadd.f32 %v5532_v30, %v1700_v40  ;;  %vm1703_vm8 = vcmp.gt.f32.partialorder %v1701_v36, 0.0 }
 0x25f   :  { %4334 = vpow2.f32 %v1705_v39  ;;  %v1707_v54 = vmul.f32 1.442695, %v1702_v52  ;;  %vm1704_vm9 = vcmp.gt.f32.partialorder %v1702_v52, 0.0 }
 0x261   :  { %4336 = vpow2.f32 %v1707_v54 }
 0x269   :  { %v4335_v58 = vpop.eup %4334 }
 0x26a   :  { %v3618_v62 = vadd.f32 -1.0, %v4335_v58 }
 0x26b   :  { %v4337_v34 = vpop.eup %4336 }
 0x26c   :  { %v3619_v63 = vadd.f32 -1.0, %v4337_v34  ;;  %v1711_v4 = vmul.f32 1.6732632, %v3618_v62 }
 0x26e   :  { %v1712_v7 = vmul.f32 1.6732632, %v3619_v63  ;;  %v1713_v11 = vsel %vm1703_vm8, %v1701_v36, %v1711_v4 }
 0x26f   :  { %v1715_v12 = vmul.f32 1.050701, %v1713_v11 }
 0x270   :  { %v1714_v14 = vsel %vm1704_vm9, %v1702_v52, %v1712_v7 }
 0x271   :  { %v1716_v17 = vmul.f32 1.050701, %v1714_v14  ;;  %v1717_v18 = vmul.f32 %v5591_v29, %v1715_v12 }
 0x273   :  { %v1718_v31 = vmul.f32 %v5591_v29, %v1716_v17 }
 0x275   :  { %v1766_v32 = vpop.f32.mrb[48].mxu0  ;;  %v1809_v44 = vpop.f32.mrb[48].mxu1  ;;  %v5663_v20 = vpack.c.bf16 %v1718_v31, %v1717_v18 }
 0x276   :  { %v1768_v45 = vpop.f32.mrb[49].mxu0  ;;  %v1811_v53 = vpop.f32.mrb[49].mxu1 }
 0x277   :  { %v1818_v33 = vmax.f32 %v1766_v32, %v1768_v45  ;;  %v1820_v24 = vmax.f32 %v1809_v44, %v1811_v53  ;;  %v1770_v55 = vpop.f32.mrb[50].mxu0  ;;  %v1813_v47 = vpop.f32.mrb[50].mxu1 }
 0x278   :  { %v1772_v59 = vpop.f32.mrb[51].mxu0  ;;  %v1815_v49 = vpop.f32.mrb[51].mxu1 }
 0x279   :  { %v1822_v25 = vmax.f32 %v1818_v33, %v1820_v24  ;;  %v1819_v50 = vmax.f32 %v1770_v55, %v1772_v59  ;;  %v1821_v8 = vmax.f32 %v1813_v47, %v1815_v49 }
 0x27b   :  { %v1824_v57 = vadd.f32 %v5532_v30, %v1822_v25  ;;  %v1823_v16 = vmax.f32 %v1819_v50, %v1821_v8 }
 0x27d   :  { %v1828_v60 = vmul.f32 1.442695, %v1824_v57  ;;  %v1825_v61 = vadd.f32 %v5532_v30, %v1823_v16  ;;  %vm1826_vm10 = vcmp.gt.f32.partialorder %v1824_v57, 0.0 }
 0x27f   :  { %4338 = vpow2.f32 %v1828_v60  ;;  %v1830_v2 = vmul.f32 1.442695, %v1825_v61  ;;  %vm1827_vm11 = vcmp.gt.f32.partialorder %v1825_v61, 0.0 }
 0x281   :  { %4340 = vpow2.f32 %v1830_v2 }
 0x289   :  { %v4339_v3 = vpop.eup %4338 }
 0x28a   :  { %v3627_v38 = vadd.f32 -1.0, %v4339_v3 }
 0x28b   :  { %v4341_v43 = vpop.eup %4340 }
 0x28c   :  { %v3628_v5 = vadd.f32 -1.0, %v4341_v43  ;;  %v1834_v6 = vmul.f32 1.6732632, %v3627_v38 }
 0x28e   :  { %v1835_v21 = vmul.f32 1.6732632, %v3628_v5  ;;  %v1836_v56 = vsel %vm1826_vm10, %v1824_v57, %v1834_v6  ;;  %v2935_v5 = vld [vmem:[%s6334_s6 + $0x98] sm:$0xff]  ;;  %v2918_v6 = vld [vmem:[%s6334_s6 + $0x10] sm:$0xff] }
 0x28f   :  { %v1838_v9 = vmul.f32 1.050701, %v1836_v56  ;;  %v2919_v56 = vld [vmem:[%s6334_s6 + $0x18] sm:$0xff] }
 0x290   :  { %v1837_v42 = vsel %vm1827_vm11, %v1825_v61, %v1835_v21 }
 0x291   :  { %v1839_v41 = vmul.f32 1.050701, %v1837_v42  ;;  %v1840_v23 = vmul.f32 %v5591_v29, %v1838_v9  ;;  %v3931_v9 = vpack.c.bf16 %v2919_v56, %v2918_v6  ;;  %v2936_v42 = vld [vmem:[%s6334_s6 + $0xa0] sm:$0xff] }
 0x293   :  { %v1841_v19 = vmul.f32 %v5591_v29, %v1839_v41  ;;  %v2937_v41 = vld [vmem:[%s6334_s6 + $0xa8] sm:$0xff] }
 0x295   :  { %v5669_v22 = vpack.c.bf16 %v1841_v19, %v1840_v23  ;;  %v1889_v35 = vpop.f32.mrb[52].mxu0  ;;  %v1932_v36 = vpop.f32.mrb[52].mxu1  ;;  %v3933_v23 = vpack.c.bf16 %v2937_v41, %v2936_v42  ;;  %v2920_v19 = vld [vmem:[%s6334_s6 + $0x20] sm:$0xff] }
 0x296   :  { %v1891_v40 = vpop.f32.mrb[53].mxu0  ;;  %v1934_v39 = vpop.f32.mrb[53].mxu1 }
 0x297   :  { %2473 = vmatprep.mubr.bf16.mxu0 %v5669_v22  ;;  %2707 = vmatmul.mubr.bf16.gmra.mrb[76].mxu1 %v5669_v22  ;;  %v1941_v52 = vmax.f32 %v1889_v35, %v1891_v40  ;;  %v1943_v54 = vmax.f32 %v1932_v36, %v1934_v39  ;;  %v1893_v58 = vpop.f32.mrb[54].mxu0  ;;  %v1936_v62 = vpop.f32.mrb[54].mxu1 }
 0x298   :  { %2474 = vmatmul.mubr.bf16.gmra.mrb[80].mxu0 %v5663_v20  ;;  %v1895_v34 = vpop.f32.mrb[55].mxu0  ;;  %v1938_v63 = vpop.f32.mrb[55].mxu1  ;;  %2716 = vmatprep.mubr.bf16.mxu1 %v4416_v1 }
 0x299   :  { %2483 = vmatprep.mubr.bf16.mxu0 %v5041_v15  ;;  %v1945_v4 = vmax.f32 %v1941_v52, %v1943_v54  ;;  %v1942_v7 = vmax.f32 %v1893_v58, %v1895_v34  ;;  %v1944_v11 = vmax.f32 %v1936_v62, %v1938_v63  ;;  %v2938_v54 = vld [vmem:[%s6334_s6 + $0xb0] sm:$0xff]  ;;  %v2939_v58 = vld [vmem:[%s6334_s6 + $0xb8] sm:$0xff] }
 0x29a   :  { %v3937_v62 = vpack.c.bf16 %v2939_v58, %v2938_v54  ;;  %v2922_v34 = vld [vmem:[%s6334_s6 + $0x30] sm:$0xff]  ;;  %v2923_v63 = vld [vmem:[%s6334_s6 + $0x38] sm:$0xff] }
 0x29b   :  { %v1947_v12 = vadd.f32 %v5532_v30, %v1945_v4  ;;  %v1946_v14 = vmax.f32 %v1942_v7, %v1944_v11  ;;  %v3939_v4 = vpack.c.bf16 %v2923_v63, %v2922_v34  ;;  %v2940_v7 = vld [vmem:[%s6334_s6 + $0xc0] sm:$0xff]  ;;  %v2941_v11 = vld [vmem:[%s6334_s6 + $0xc8] sm:$0xff] }
 0x29d   :  { %v1951_v17 = vmul.f32 1.442695, %v1947_v12  ;;  %v1948_v18 = vadd.f32 %v5532_v30, %v1946_v14  ;;  %vm1949_vm12 = vcmp.gt.f32.partialorder %v1947_v12, 0.0  ;;  %v2924_v14 = vld [vmem:[%s6334_s6 + $0x40] sm:$0xff] }
 0x29f   :  { %4342 = vpow2.f32 %v1951_v17  ;;  %v1953_v31 = vmul.f32 1.442695, %v1948_v18  ;;  %2717 = vmatmul.mubr.bf16.gmra.mrb[80].mxu1 %v4416_v1  ;;  %vm1950_vm13 = vcmp.gt.f32.partialorder %v1948_v18, 0.0  ;;  %v2925_v17 = vld [vmem:[%s6334_s6 + $0x48] sm:$0xff] }
 0x2a0   :  { %2484 = vmatmul.mubr.bf16.gmra.mrb[84].mxu0 %v4994_v48 }
 0x2a1   :  { %4344 = vpow2.f32 %v1953_v31  ;;  %2493 = vmatprep.mubr.bf16.mxu0 %v5275_v37  ;;  %v2942_v31 = vld [vmem:[%s6334_s6 + $0xd0] sm:$0xff] }
 0x2a8   :  { %2494 = vmatmul.mubr.bf16.gmra.mrb[88].mxu0 %v5198_v13 }
 0x2a9   :  { %v4343_v32 = vpop.eup %4342  ;;  %2503 = vmatprep.mubr.bf16.mxu0 %v5369_v26 }
 0x2aa   :  { %v3636_v44 = vadd.f32 -1.0, %v4343_v32  ;;  %v2943_v32 = vld [vmem:[%s6334_s6 + $0xd8] sm:$0xff] }
 0x2ab   :  { %v4345_v45 = vpop.eup %4344 }
 0x2ac   :  { %v3637_v53 = vadd.f32 -1.0, %v4345_v45  ;;  %v1957_v33 = vmul.f32 1.6732632, %v3636_v44  ;;  %v3945_v44 = vpack.c.bf16 %v2943_v32, %v2942_v31  ;;  %v2926_v45 = vld [vmem:[%s6334_s6 + $0x50] sm:$0xff] }
 0x2ae   :  { %v1958_v30 = vmul.f32 1.6732632, %v3637_v53  ;;  %v1959_v24 = vsel %vm1949_vm12, %v1947_v12, %v1957_v33  ;;  %v3941_v12 = vpack.c.bf16 %v2941_v11, %v2940_v7  ;;  %v2927_v53 = vld [vmem:[%s6334_s6 + $0x58] sm:$0xff] }
 0x2af   :  { %v1961_v55 = vmul.f32 1.050701, %v1959_v24  ;;  %v3947_v33 = vpack.c.bf16 %v2927_v53, %v2926_v45  ;;  %v2945_v24 = vld [vmem:[%s6334_s6 + $0xe8] sm:$0xff] }
 0x2b0   :  { %2504 = vmatmul.mubr.bf16.gmra.mrb[92].mxu0 %v5322_v28  ;;  %v1960_v48 = vsel %vm1950_vm13, %v1948_v18, %v1958_v30  ;;  %v3943_v18 = vpack.c.bf16 %v2925_v17, %v2924_v14  ;;  %v2944_v30 = vld [vmem:[%s6334_s6 + $0xe0] sm:$0xff] }
 0x2b1   :  { %2513 = vmatprep.mubr.bf16.mxu0 %v5599_v10  ;;  %v1962_v47 = vmul.f32 1.050701, %v1960_v48  ;;  %v1963_v13 = vmul.f32 %v5591_v29, %v1961_v55  ;;  %v3949_v55 = vpack.c.bf16 %v2945_v24, %v2944_v30  ;;  %v2928_v48 = vld [vmem:[%s6334_s6 + $0x60] sm:$0xff] }
 0x2b3   :  { %v1964_v59 = vmul.f32 %v5591_v29, %v1962_v47  ;;  %v2929_v47 = vld [vmem:[%s6334_s6 + $0x68] sm:$0xff] }
 0x2b5   :  { %v1965_v49 = vpack.c.bf16 %v1964_v59, %v1963_v13  ;;  %v3951_v13 = vpack.c.bf16 %v2929_v47, %v2928_v48  ;;  %v2946_v59 = vld [vmem:[%s6334_s6 + $0xf0] sm:$0xff] }
 0x2b6   :  { %v5687_v25 = vpop.f32.mrb[56].mxu1 }
 0x2b7   :  { %v5689_v50 = vpop.f32.mrb[57].mxu1 }
 0x2b8   :  { %v5691_v8 = vpop.f32.mrb[58].mxu1  ;;  %2514 = vmatmul.mubr.bf16.gmra.mrb[96].mxu0 %v5509_v27 }
 0x2b9   :  { %v5694_v57 = vpop.f32.mrb[59].mxu1  ;;  %2523 = vmatprep.mubr.bf16.mxu0 %v5647_v0 }
 0x2be   :  { %v5697_v28 = vpop.f32.mrb[60].mxu1 }
 0x2bf   :  { %v5699_v16 = vpop.f32.mrb[61].mxu1 }
 0x2c0   :  { %v5701_v60 = vpop.f32.mrb[62].mxu1  ;;  %2524 = vmatmul.mubr.bf16.gmra.mrb[100].mxu0 %v5631_v51 }
 0x2c1   :  { %v5704_v29 = vpop.f32.mrb[63].mxu1  ;;  %2533 = vmatprep.mubr.bf16.mxu0 %v5663_v20 }
 0x2c6   :  { %v5707_v61 = vpop.f32.mrb[64].mxu1 }
 0x2c7   :  { %v5709_v2 = vpop.f32.mrb[65].mxu1 }
 0x2c8   :  { %v5711_v27 = vpop.f32.mrb[66].mxu1  ;;  %2534 = vmatmul.mubr.bf16.gmra.mrb[104].mxu0 %v5653_v46 }
 0x2c9   :  { %v5714_v3 = vpop.f32.mrb[67].mxu1  ;;  %2543 = vmatprep.mubr.bf16.mxu0 %v1965_v49 }
 0x2d0   :  { %2544 = vmatmul.mubr.bf16.gmra.mrb[108].mxu0 %v5669_v22  ;;  %v2921_v22 = vld [vmem:[%s6334_s6 + $0x28] sm:$0xff] }
 0x2d1   :  { %2586 = vmatprep.mubr.bf16.mxu0 %v4416_v1  ;;  %v3935_v35 = vpack.c.bf16 %v2921_v22, %v2920_v19 }
 0x2d8   :  { %2587 = vmatmul.mubr.bf16.vlgmr.msra.gmra.mrb[56].mxu0 %v5041_v15  ;;  %v2932_v15 = vld [vmem:[%s6334_s6 + $0x80] sm:$0xff] }
 0x2d9   :  { %2596 = vmatprep.mubr.bf16.mxu0 %v4416_v1 }
 0x2e0   :  { %2597 = vmatmul.mubr.bf16.gmra.mrb[60].mxu0 %v5275_v37  ;;  %v2933_v37 = vld [vmem:[%s6334_s6 + $0x88] sm:$0xff] }
 0x2e1   :  { %2606 = vmatprep.mubr.bf16.mxu0 %v4416_v1 }
 0x2e8   :  { %2607 = vmatmul.mubr.bf16.gmra.mrb[64].mxu0 %v5369_v26  ;;  %v2916_v26 = vld [vmem:[%s6334_s6] sm:$0xff] }
 0x2e9   :  { %2616 = vmatprep.mubr.bf16.mxu0 %v4416_v1 }
 0x2ea   :  { %v5724_v51 = vpop.f32.mrb[68].mxu1 }
 0x2eb   :  { %v5726_v46 = vpop.f32.mrb[69].mxu1 }
 0x2ec   :  { %v5728_v38 = vpop.f32.mrb[70].mxu1 }
 0x2ed   :  { %v5730_v43 = vpop.f32.mrb[71].mxu1 }
 0x2f0   :  { %2617 = vmatmul.mubr.bf16.gmra.mrb[68].mxu0 %v5599_v10  ;;  %v3925_v10 = vpack.c.bf16 %v2933_v37, %v2932_v15  ;;  %v2930_v37 = vld [vmem:[%s6334_s6 + $0x70] sm:$0xff] }
 0x2f1   :  { %2626 = vmatprep.mubr.bf16.mxu0 %v4416_v1 }
 0x2f2   :  { %3926 = vmatprep.subr.bf16.mxu1 %v3925_v10 }
 0x2f8   :  { %2627 = vmatmul.mubr.bf16.gmra.mrb[72].mxu0 %v5647_v0  ;;  %v2917_v0 = vld [vmem:[%s6334_s6 + $0x8] sm:$0xff] }
 0x2f9   :  { %2636 = vmatprep.mubr.bf16.mxu0 %v4416_v1 }
 0x300   :  { %2637 = vmatmul.mubr.bf16.gmra.mrb[76].mxu0 %v5663_v20  ;;  %v3927_v20 = vpack.c.bf16 %v2917_v0, %v2916_v26  ;;  %v2931_v26 = vld [vmem:[%s6334_s6 + $0x78] sm:$0xff]  ;;  %v2964_v0 = vld [vmem:[%s6334_s6 + $0x180] sm:$0xff] }
 0x301   :  { %2646 = vmatprep.mubr.bf16.mxu0 %v4416_v1  ;;  %v2934_v1 = vld [vmem:[%s6334_s6 + $0x90] sm:$0xff]  ;;  %v3955_v10 = vpack.c.bf16 %v2931_v26, %v2930_v37 }
 0x302   :  { %3928 = vmatpush3.bf16.msra.mxu1 %v3927_v20  ;;  %v3929_v21 = vpack.c.bf16 %v2935_v5, %v2934_v1  ;;  %v2965_v20 = vld [vmem:[%s6334_s6 + $0x188] sm:$0xff] }
 0x303   :  { %v3957_v1 = vpack.c.bf16 %v2965_v20, %v2964_v0 }
 0x304   :  { %3930 = vmatprep.subr.bf16.mxu1 %v3929_v21 }
 0x306   :  { %3932 = vmatpush3.bf16.msra.mxu1 %v3931_v9 }
 0x307   :  { %3934 = vmatprep.subr.bf16.mxu1 %v3933_v23 }
 0x308   :  { %2647 = vmatmul.mubr.bf16.gmra.mrb[80].mxu0 %v1965_v49  ;;  %v2947_v49 = vld [vmem:[%s6334_s6 + $0xf8] sm:$0xff] }
 0x309   :  { %v3953_v15 = vpack.c.bf16 %v2947_v49, %v2946_v59 }
 0x30a   :  { %3936 = vmatpush3.bf16.msra.mxu1 %v3935_v35 }
 0x30b   :  { %3938 = vmatprep.subr.bf16.mxu1 %v3937_v62 }
 0x30e   :  { %3940 = vmatpush3.bf16.msra.mxu1 %v3939_v4 }
 0x30f   :  { %3942 = vmatprep.subr.bf16.mxu1 %v3941_v12 }
 0x312   :  { %3944 = vmatpush3.bf16.msra.mxu1 %v3943_v18 }
 0x313   :  { %3946 = vmatprep.subr.bf16.mxu1 %v3945_v44 }
 0x316   :  { %3948 = vmatpush3.bf16.msra.mxu1 %v3947_v33 }
 0x317   :  { %3950 = vmatprep.subr.bf16.mxu1 %v3949_v55 }
 0x31a   :  { %3952 = vmatpush3.bf16.msra.mxu1 %v3951_v13 }
 0x31b   :  { %3954 = vmatprep.subr.bf16.mxu1 %v3953_v15 }
 0x31e   :  { %3956 = vmatpush3.bf16.msra.mxu1 %v3955_v10 }
 0x31f   :  { %3958 = vmatprep.subr.bf16.mxu1 %v3957_v1 }
 0x32a   :  { %v5774_v36 = vpop.f32.mrb[72].mxu1 }
 0x32b   :  { %v5776_v40 = vpop.f32.mrb[73].mxu1 }
 0x32c   :  { %v5778_v39 = vpop.f32.mrb[74].mxu1 }
 0x32d   :  { %v5780_v52 = vpop.f32.mrb[75].mxu1 }
 0x36a   :  { %v2708_v5 = vpop.f32.mrb[76].mxu1 }
 0x36b   :  { %v2710_v6 = vpop.f32.mrb[77].mxu1 }
 0x36c   :  { %v2712_v21 = vpop.f32.mrb[78].mxu1 }
 0x36d   :  { %v2714_v56 = vpop.f32.mrb[79].mxu1 }
 0x372   :  { %v2718_v9 = vpop.f32.mrb[80].mxu1 }
 0x373   :  { %v2485_v42 = vpop.f32.mrb[84].mxu0  ;;  %v2720_v41 = vpop.f32.mrb[81].mxu1 }
 0x374   :  { %v5849_v23 = vadd.f32 %v5687_v25, %v2485_v42  ;;  %v2487_v19 = vpop.f32.mrb[85].mxu0  ;;  %v2722_v22 = vpop.f32.mrb[82].mxu1 }
 0x375   :  { %v5852_v35 = vadd.f32 %v5689_v50, %v2487_v19  ;;  %v2489_v54 = vpop.f32.mrb[86].mxu0  ;;  %v2724_v58 = vpop.f32.mrb[83].mxu1 }
 0x376   :  { %v5855_v62 = vadd.f32 %v5691_v8, %v2489_v54  ;;  %v2491_v34 = vpop.f32.mrb[87].mxu0 }
 0x377   :  { %v2665_v63 = vadd.f32 %v5694_v57, %v2491_v34 }
 0x37b   :  { %v2495_v4 = vpop.f32.mrb[88].mxu0 }
 0x37c   :  { %v5859_v7 = vadd.f32 %v5697_v28, %v2495_v4  ;;  %v2497_v11 = vpop.f32.mrb[89].mxu0 }
 0x37d   :  { %v5862_v25 = vadd.f32 %v5699_v16, %v2497_v11  ;;  %v2499_v12 = vpop.f32.mrb[90].mxu0 }
 0x37e   :  { %v5865_v50 = vadd.f32 %v5701_v60, %v2499_v12  ;;  %v2501_v14 = vpop.f32.mrb[91].mxu0 }
 0x37f   :  { %v5868_v17 = vadd.f32 %v5704_v29, %v2501_v14 }
 0x383   :  { %v2505_v8 = vpop.f32.mrb[92].mxu0 }
 0x384   :  { %v5871_v18 = vadd.f32 %v5707_v61, %v2505_v8  ;;  %v2507_v57 = vpop.f32.mrb[93].mxu0 }
 0x385   :  { %v5874_v28 = vadd.f32 %v5709_v2, %v2507_v57  ;;  %v2509_v31 = vpop.f32.mrb[94].mxu0 }
 0x386   :  { %v5877_v16 = vadd.f32 %v5711_v27, %v2509_v31  ;;  %v2511_v32 = vpop.f32.mrb[95].mxu0 }
 0x387   :  { %v5880_v60 = vadd.f32 %v5714_v3, %v2511_v32 }
 0x38b   :  { %v2515_v44 = vpop.f32.mrb[96].mxu0 }
 0x38c   :  { %v5883_v29 = vadd.f32 %v5724_v51, %v2515_v44  ;;  %v2517_v45 = vpop.f32.mrb[97].mxu0 }
 0x38d   :  { %v5886_v61 = vadd.f32 %v5726_v46, %v2517_v45  ;;  %v2519_v53 = vpop.f32.mrb[98].mxu0 }
 0x38e   :  { %v5889_v2 = vadd.f32 %v5728_v38, %v2519_v53  ;;  %v2521_v33 = vpop.f32.mrb[99].mxu0 }
 0x38f   :  { %v5892_v27 = vadd.f32 %v5730_v43, %v2521_v33 }
 0x393   :  { %v2525_v30 = vpop.f32.mrb[100].mxu0 }
 0x394   :  { %v5895_v3 = vadd.f32 %v5774_v36, %v2525_v30  ;;  %v2527_v24 = vpop.f32.mrb[101].mxu0 }
 0x395   :  { %v5898_v51 = vadd.f32 %v5776_v40, %v2527_v24  ;;  %v2529_v55 = vpop.f32.mrb[102].mxu0 }
 0x396   :  { %v5901_v46 = vadd.f32 %v5778_v39, %v2529_v55  ;;  %v2531_v48 = vpop.f32.mrb[103].mxu0 }
 0x397   :  { %v5904_v38 = vadd.f32 %v5780_v52, %v2531_v48 }
 0x39b   :  { %v2535_v47 = vpop.f32.mrb[104].mxu0 }
 0x39c   :  { %v5906_v13 = vadd.f32 %v2708_v5, %v2535_v47  ;;  %v2537_v43 = vpop.f32.mrb[105].mxu0 }
 0x39d   :  { %v5908_v59 = vadd.f32 %v2710_v6, %v2537_v43  ;;  %v2539_v36 = vpop.f32.mrb[106].mxu0 }
 0x39e   :  { %v5910_v49 = vadd.f32 %v2712_v21, %v2539_v36  ;;  %v2541_v15 = vpop.f32.mrb[107].mxu0 }
 0x39f   :  { %v5912_v40 = vadd.f32 %v2714_v56, %v2541_v15 }
 0x3a3   :  { %v2545_v37 = vpop.f32.mrb[108].mxu0 }
 0x3a4   :  { %v5914_v26 = vadd.f32 %v2718_v9, %v2545_v37  ;;  %v2547_v39 = vpop.f32.mrb[109].mxu0  ;;  %v5927_v9 = vld [vmem:[%s6335_s5] ss:$0 sm:$0xff] }
 0x3a5   :  { %v5916_v10 = vadd.f32 %v2720_v41, %v2547_v39  ;;  %v2549_v52 = vpop.f32.mrb[110].mxu0 }
 0x3a6   :  { %v5918_v0 = vadd.f32 %v2722_v22, %v2549_v52  ;;  %v2551_v20 = vpop.f32.mrb[111].mxu0 }
 0x3a7   :  { %v5920_v1 = vadd.f32 %v2724_v58, %v2551_v20 }
 0x3ab   :  { %v2588_v5 = vpop.f32.mrb[56].mxu0 }
 0x3ac   :  { %v2728_v6 = vmax.f32 %v2588_v5, %v5849_v23  ;;  %v2590_v21 = vpop.f32.mrb[57].mxu0 }
 0x3ad   :  { %v2729_v42 = vmax.f32 %v2590_v21, %v5852_v35  ;;  %v2592_v56 = vpop.f32.mrb[58].mxu0 }
 0x3ae   :  { %v2730_v41 = vmax.f32 %v2592_v56, %v5855_v62  ;;  %v2594_v19 = vpop.f32.mrb[59].mxu0 }
 0x3af   :  { %v2732_v22 = vmax.f32 %v2728_v6, %v2729_v42  ;;  %v2731_v54 = vmax.f32 %v2594_v19, %v2665_v63  ;;  %v2966_v42 = vld [vmem:[%s6334_s6 + $0x190] sm:$0xff] }
 0x3b1   :  { %v5931_v58 = vadd.f32 %v5927_v9, %v2732_v22  ;;  %v2733_v34 = vmax.f32 %v2730_v41, %v2731_v54 }
 0x3b3   :  { %v2744_v23 = vmul.f32 1.442695, %v5931_v58  ;;  %v5935_v4 = vadd.f32 %v5927_v9, %v2733_v34  ;;  %v2598_v35 = vpop.f32.mrb[60].mxu0  ;;  %vm2742_vm14 = vcmp.gt.f32.partialorder %v5931_v58, 0.0 }
 0x3b4   :  { %v2758_v11 = vmax.f32 %v2598_v35, %v5859_v7  ;;  %v2600_v12 = vpop.f32.mrb[61].mxu0 }
 0x3b5   :  { %v2746_v14 = vmul.f32 1.442695, %v5935_v4  ;;  %v2759_v62 = vmax.f32 %v2600_v12, %v5862_v25  ;;  %v2602_v8 = vpop.f32.mrb[62].mxu0  ;;  %4346 = vpow2.f32 %v2744_v23  ;;  %vm2743_vm0 = vcmp.gt.f32.partialorder %v5935_v4, 0.0 }
 0x3b6   :  { %v2760_v63 = vmax.f32 %v2602_v8, %v5865_v50  ;;  %v2604_v57 = vpop.f32.mrb[63].mxu0 }
 0x3b7   :  { %v2762_v31 = vmax.f32 %v2758_v11, %v2759_v62  ;;  %v2761_v32 = vmax.f32 %v2604_v57, %v5868_v17  ;;  %4348 = vpow2.f32 %v2746_v14 }
 0x3b9   :  { %v2764_v44 = vadd.f32 %v5927_v9, %v2762_v31  ;;  %v2763_v45 = vmax.f32 %v2760_v63, %v2761_v32 }
 0x3bb   :  { %v2768_v53 = vmul.f32 1.442695, %v2764_v44  ;;  %v2765_v7 = vadd.f32 %v5927_v9, %v2763_v45  ;;  %v2608_v33 = vpop.f32.mrb[64].mxu0  ;;  %vm2766_vm15 = vcmp.gt.f32.partialorder %v2764_v44, 0.0 }
 0x3bc   :  { %v2782_v30 = vmax.f32 %v2608_v33, %v5871_v18  ;;  %v2610_v24 = vpop.f32.mrb[65].mxu0 }
 0x3bd   :  { %4350 = vpow2.f32 %v2768_v53  ;;  %v2770_v25 = vmul.f32 1.442695, %v2765_v7  ;;  %v2783_v55 = vmax.f32 %v2610_v24, %v5874_v28  ;;  %v2612_v50 = vpop.f32.mrb[66].mxu0  ;;  %vm2767_vm1 = vcmp.gt.f32.partialorder %v2765_v7, 0.0 }
 0x3be   :  { %v2784_v48 = vmax.f32 %v2612_v50, %v5877_v16  ;;  %v2614_v47 = vpop.f32.mrb[67].mxu0  ;;  %v2948_v16 = vld [vmem:[%s6334_s6 + $0x100] sm:$0xff] }
 0x3bf   :  { %4352 = vpow2.f32 %v2770_v25  ;;  %v2786_v17 = vmax.f32 %v2782_v30, %v2783_v55  ;;  %v2785_v43 = vmax.f32 %v2614_v47, %v5880_v60  ;;  %v4347_v36 = vpop.eup %4346  ;;  %v2949_v60 = vld [vmem:[%s6334_s6 + $0x108] sm:$0xff] }
 0x3c0   :  { %v3687_v39 = vadd.f32 -1.0, %v4347_v36  ;;  %v3959_v35 = vpack.c.bf16 %v2949_v60, %v2948_v16 }
 0x3c1   :  { %v5948_v15 = vmax.f32 %v2784_v48, %v2785_v43  ;;  %v4349_v37 = vpop.eup %4348  ;;  %v5975_v53 = vadd.f32 %v5927_v9, %v2786_v17 }
 0x3c2   :  { %v2750_v41 = vmul.f32 1.6732632, %v3687_v39 }
 0x3c3   :  { %v2618_v52 = vpop.f32.mrb[68].mxu0  ;;  %v6002_v39 = vadd.f32 %v5927_v9, %v5948_v15  ;;  %v2970_v15 = vld [vmem:[%s6334_s6 + $0x1b0] sm:$0xff]  ;;  %vm2790_vm3 = vcmp.gt.f32.partialorder %v5975_v53, 0.0 }
 0x3c4   :  { %v2806_v18 = vmax.f32 %v2618_v52, %v5883_v29  ;;  %v2620_v20 = vpop.f32.mrb[69].mxu0  ;;  %v2967_v29 = vld [vmem:[%s6334_s6 + $0x198] sm:$0xff]  ;;  %v2752_v8 = vsel %vm2742_vm14, %v5931_v58, %v2750_v41  ;;  %vm3447_vm14 = vcmask 80896  }
 0x3c5   :  { %v2807_v5 = vmax.f32 %v2620_v20, %v5886_v61  ;;  %v2622_v28 = vpop.f32.mrb[70].mxu0  ;;  %v3688_v61 = vadd.f32 -1.0, %v4349_v37  ;;  %v3961_v11 = vpack.c.bf16 %v2967_v29, %v2966_v42  ;;  %v2754_v24 = vmul.f32 1.050701, %v2752_v8  ;;  %v2952_v20 = vld [vmem:[%s6334_s6 + $0x120] sm:$0xff] }
 0x3c6   :  { %v2808_v6 = vmax.f32 %v2622_v28, %v5889_v2  ;;  %v2624_v21 = vpop.f32.mrb[71].mxu0  ;;  %v2794_v41 = vmul.f32 1.442695, %v6002_v39  ;;  %vm2791_vm5 = vcmp.gt.f32.partialorder %v6002_v39, 0.0 }
 0x3c7   :  { %v4351_v56 = vpop.eup %4350  ;;  %v2810_v19 = vmax.f32 %v2806_v18, %v2807_v5  ;;  %v2809_v22 = vmax.f32 %v2624_v21, %v5892_v27  ;;  %v2751_v62 = vmul.f32 1.6732632, %v3688_v61  ;;  %v2953_v5 = vld [vmem:[%s6334_s6 + $0x128] sm:$0xff]  ;;  %v2971_v21 = vld [vmem:[%s6334_s6 + $0x1b8] sm:$0xff] }
 0x3c8   :  { %v3689_v2 = vadd.f32 -1.0, %v4351_v56  ;;  %v3967_v56 = vpack.c.bf16 %v2953_v5, %v2952_v20  ;;  %v2961_v20 = vld [vmem:[%s6334_s6 + $0x168] sm:$0xff] }
 0x3c9   :  { %v4353_v54 = vpop.eup %4352  ;;  %v5967_v34 = vadd.f32 %v5927_v9, %v2810_v19  ;;  %v2811_v23 = vmax.f32 %v2808_v6, %v2809_v22  ;;  %v2753_v48 = vsel %vm2743_vm0, %v5935_v4, %v2751_v62  ;;  %v2968_v4 = vld [vmem:[%s6334_s6 + $0x1a0] sm:$0xff] }
 0x3ca   :  { %v2774_v12 = vmul.f32 1.6732632, %v3689_v2  ;;  %v3690_v14 = vadd.f32 -1.0, %v4353_v54  ;;  %v2755_v52 = vmul.f32 1.050701, %v2753_v48  ;;  %v3969_v2 = vpack.c.bf16 %v2971_v21, %v2970_v15  ;;  %v2954_v54 = vld [vmem:[%s6334_s6 + $0x130] sm:$0xff] }
 0x3cb   :  { %v2816_v63 = vmul.f32 1.442695, %v5967_v34  ;;  %v2628_v57 = vpop.f32.mrb[72].mxu0  ;;  %v5987_v47 = vadd.f32 %v5927_v9, %v2811_v23  ;;  %vm2814_vm2 = vcmp.gt.f32.partialorder %v5967_v34, 0.0  ;;  %v2979_v15 = vld [vmem:[%s6334_s6 + $0x1f8] sm:$0xff] }
 0x3cc   :  { %v2830_v27 = vmax.f32 %v2628_v57, %v5895_v3  ;;  %v2630_v31 = vpop.f32.mrb[73].mxu0  ;;  %v2776_v32 = vsel %vm2766_vm15, %v2764_v44, %v2774_v12  ;;  %v2775_v45 = vmul.f32 1.6732632, %v3690_v14  ;;  %v2950_v3 = vld [vmem:[%s6334_s6 + $0x110] sm:$0xff]  ;;  %v2951_v44 = vld [vmem:[%s6334_s6 + $0x118] sm:$0xff] }
 0x3cd   :  { %4354 = vpow2.f32 %v2816_v63  ;;  %v2831_v33 = vmax.f32 %v2630_v31, %v5898_v51  ;;  %v2632_v30 = vpop.f32.mrb[74].mxu0  ;;  %v2778_v58 = vmul.f32 1.050701, %v2776_v32  ;;  %v3963_v37 = vpack.c.bf16 %v2951_v44, %v2950_v3 }
 0x3ce   :  { %v2832_v25 = vmax.f32 %v2632_v30, %v5901_v46  ;;  %v2634_v55 = vpop.f32.mrb[75].mxu0  ;;  %v2777_v50 = vsel %vm2767_vm1, %v2765_v7, %v2775_v45  ;;  %v2969_v7 = vld [vmem:[%s6334_s6 + $0x1a8] sm:$0xff]  ;;  %v2818_v28 = vmul.f32 1.442695, %v5987_v47  ;;  %v2975_v30 = vld [vmem:[%s6334_s6 + $0x1d8] sm:$0xff]  ;;  %vm2815_vm4 = vcmp.gt.f32.partialorder %v5987_v47, 0.0 }
 0x3cf   :  { %v2834_v51 = vmax.f32 %v2830_v27, %v2831_v33  ;;  %v2833_v17 = vmax.f32 %v2634_v55, %v5904_v38  ;;  %3099 = vmatprep.mubr.f32.mxu1 %v2778_v58  ;;  %v2779_v46 = vmul.f32 1.050701, %v2777_v50  ;;  %v2792_v38 = vmul.f32 1.442695, %v5975_v53  ;;  %v2957_v27 = vld [vmem:[%s6334_s6 + $0x148] sm:$0xff]  ;;  %v2974_v33 = vld [vmem:[%s6334_s6 + $0x1d0] sm:$0xff] }
 0x3d0   :  { %3100 = vmatmul.mubr.f32.vlgmr.msra.gmra.mrb[84].mxu1 %v2754_v24  ;;  %v3965_v18 = vpack.c.bf16 %v2969_v7, %v2968_v4  ;;  %v2976_v4 = vld [vmem:[%s6334_s6 + $0x1e0] sm:$0xff] }
 0x3d1   :  { %v5997_v43 = vadd.f32 %v5927_v9, %v2834_v51  ;;  %v2835_v36 = vmax.f32 %v2832_v25, %v2833_v17  ;;  %3960 = vmatpush3.bf16.msra.mxu1 %v3959_v35  ;;  %3104 = vmatprep.mubr.f32.mxu1 %v2779_v46  ;;  %4356 = vpow2.f32 %v2792_v38  ;;  %v3977_v17 = vpack.c.bf16 %v2975_v30, %v2974_v33  ;;  %v2958_v46 = vld [vmem:[%s6334_s6 + $0x150] sm:$0xff] }
 0x3d2   :  { %3962 = vmatprep.subr.bf16.mxu1 %v3961_v11  ;;  %4358 = vpow2.f32 %v2818_v28  ;;  %v2973_v11 = vld [vmem:[%s6334_s6 + $0x1c8] sm:$0xff] }
 0x3d3   :  { %v6012_v16 = vadd.f32 %v5927_v9, %v2835_v36  ;;  %v2638_v6 = vpop.f32.mrb[76].mxu0  ;;  %4360 = vpow2.f32 %v2794_v41  ;;  %vm2838_vm7 = vcmp.gt.f32.partialorder %v5997_v43, 0.0 }
 0x3d4   :  { %v2854_v60 = vmax.f32 %v2638_v6, %v5906_v13  ;;  %v2640_v42 = vpop.f32.mrb[77].mxu0  ;;  %3105 = vmatmul.mubr.f32.gmra.mrb[86].mxu1 %v2755_v52  ;;  %v2955_v13 = vld [vmem:[%s6334_s6 + $0x138] sm:$0xff]  ;;  %v2978_v6 = vld [vmem:[%s6334_s6 + $0x1f0] sm:$0xff] }
 0x3d5   :  { %v2855_v29 = vmax.f32 %v2640_v42, %v5908_v59  ;;  %3964 = vmatpush3.bf16.msra.mxu1 %v3963_v37  ;;  %v2642_v61 = vpop.f32.mrb[78].mxu0  ;;  %v3971_v8 = vpack.c.bf16 %v2955_v13, %v2954_v54  ;;  %vm2839_vm9 = vcmp.gt.f32.partialorder %v6012_v16, 0.0 }
 0x3d6   :  { %v2856_v19 = vmax.f32 %v2642_v61, %v5910_v49  ;;  %v2644_v22 = vpop.f32.mrb[79].mxu0  ;;  %3966 = vmatprep.subr.bf16.mxu1 %v3965_v18  ;;  %v2972_v49 = vld [vmem:[%s6334_s6 + $0x1c0] sm:$0xff]  ;;  %v2962_v61 = vld [vmem:[%s6334_s6 + $0x170] sm:$0xff] }
 0x3d7   :  { %v4355_v59 = vpop.eup %4354  ;;  %v2858_v23 = vmax.f32 %v2854_v60, %v2855_v29  ;;  %v2857_v35 = vmax.f32 %v2644_v22, %v5912_v40  ;;  %v3973_v63 = vpack.c.bf16 %v2973_v11, %v2972_v49  ;;  %v2956_v40 = vld [vmem:[%s6334_s6 + $0x140] sm:$0xff]  ;;  %v3985_v29 = vpack.c.bf16 %v2979_v15, %v2978_v6  ;;  %v2997_v22 = vld [vmem:[%s6334_s6 + $0x288] sm:$0xff] }
 0x3d8   :  { %v3693_v12 = vadd.f32 -1.0, %v4355_v59  ;;  %v3975_v3 = vpack.c.bf16 %v2957_v27, %v2956_v40  ;;  %v2981_v49 = vld [vmem:[%s6334_s6 + $0x208] sm:$0xff] }
 0x3d9   :  { %v6038_v14 = vadd.f32 %v5927_v9, %v2858_v23  ;;  %v2859_v62 = vmax.f32 %v2856_v19, %v2857_v35  ;;  %3968 = vmatpush3.bf16.msra.mxu1 %v3967_v56  ;;  %v2996_v19 = vld [vmem:[%s6334_s6 + $0x280] sm:$0xff] }
 0x3da   :  { %3970 = vmatprep.subr.bf16.mxu1 %v3969_v2  ;;  %v2822_v57 = vmul.f32 1.6732632, %v3693_v12  ;;  %v3989_v23 = vpack.c.bf16 %v2997_v22, %v2996_v19  ;;  %v2980_v35 = vld [vmem:[%s6334_s6 + $0x200] sm:$0xff]  ;;  %v2993_v22 = vld [vmem:[%s6334_s6 + $0x268] sm:$0xff] }
 0x3db   :  { %v2864_v31 = vmul.f32 1.442695, %v6038_v14  ;;  %v6048_v32 = vadd.f32 %v5927_v9, %v2859_v62  ;;  %v2648_v45 = vpop.f32.mrb[80].mxu0  ;;  %v4357_v7 = vpop.eup %4356  ;;  %v2998_v62 = vld [vmem:[%s6334_s6 + $0x290] sm:$0xff]  ;;  %v3991_v40 = vpack.c.bf16 %v2981_v49, %v2980_v35  ;;  %vm2862_vm6 = vcmp.gt.f32.partialorder %v6038_v14, 0.0  ;;  %v2992_v19 = vld [vmem:[%s6334_s6 + $0x260] sm:$0xff] }
 0x3dc   :  { %v2878_v58 = vmax.f32 %v2648_v45, %v5914_v26  ;;  %v2650_v24 = vpop.f32.mrb[81].mxu0  ;;  %v2824_v25 = vsel %vm2814_vm2, %v5967_v34, %v2822_v57  ;;  %v2959_v26 = vld [vmem:[%s6334_s6 + $0x158] sm:$0xff]  ;;  %v4359_v36 = vpop.eup %4358  ;;  %v3691_v5 = vadd.f32 -1.0, %v4357_v7  ;;  %v3004_v7 = vld [vmem:[%s6334_s6 + $0x2c0] sm:$0xff]  ;;  %v4015_v49 = vpack.c.bf16 %v2993_v22, %v2992_v19  ;;  %v3354_v19 = vld [vmem:[%s6336_s8 + $0x28] sm:$0xff] }
 0x3dd   :  { %4362 = vpow2.f32 %v2864_v31  ;;  %v2879_v55 = vmax.f32 %v2650_v24, %v5916_v10  ;;  %3972 = vmatpush3.bf16.msra.mxu1 %v3971_v8  ;;  %v2652_v50 = vpop.f32.mrb[82].mxu0  ;;  %v2826_v48 = vmul.f32 1.050701, %v2824_v25  ;;  %v3979_v52 = vpack.c.bf16 %v2959_v26, %v2958_v46  ;;  %v4361_v21 = vpop.eup %4360  ;;  %v2999_v8 = vld [vmem:[%s6334_s6 + $0x298] sm:$0xff]  ;;  %v2982_v31 = vld [vmem:[%s6334_s6 + $0x210] sm:$0xff] }
 0x3de   :  { %v2880_v44 = vmax.f32 %v2652_v50, %v5918_v0  ;;  %v2654_v51 = vpop.f32.mrb[83].mxu0  ;;  %3974 = vmatprep.subr.bf16.mxu1 %v3973_v63  ;;  %v2977_v0 = vld [vmem:[%s6334_s6 + $0x1e8] sm:$0xff]  ;;  %v3694_v60 = vadd.f32 -1.0, %v4359_v36  ;;  %v2798_v41 = vmul.f32 1.6732632, %v3691_v5  ;;  %v3692_v2 = vadd.f32 -1.0, %v4361_v21 }
 0x3df   :  { %v2882_v34 = vmax.f32 %v2878_v58, %v2879_v55  ;;  %v2881_v10 = vmax.f32 %v2654_v51, %v5920_v1  ;;  %3174 = vmatprep.mubr.f32.mxu1 %v2826_v48  ;;  %v3981_v18 = vpack.c.bf16 %v2977_v0, %v2976_v4  ;;  %v2960_v1 = vld [vmem:[%s6334_s6 + $0x160] sm:$0xff]  ;;  %v2983_v45 = vld [vmem:[%s6334_s6 + $0x218] sm:$0xff]  ;;  %v3001_v58 = vld [vmem:[%s6334_s6 + $0x2a8] sm:$0xff]  ;;  %v2840_v55 = vmul.f32 1.442695, %v5997_v43 }
 0x3e0   :  { %v3983_v42 = vpack.c.bf16 %v2961_v20, %v2960_v1  ;;  %v2823_v54 = vmul.f32 1.6732632, %v3694_v60  ;;  %v2800_v11 = vsel %vm2790_vm3, %v5975_v53, %v2798_v41  ;;  %v2799_v12 = vmul.f32 1.6732632, %v3692_v2  ;;  %v2984_v48 = vld [vmem:[%s6334_s6 + $0x220] sm:$0xff]  ;;  %v2987_v4 = vld [vmem:[%s6334_s6 + $0x238] sm:$0xff] }
 0x3e1   :  { %v6075_v37 = vadd.f32 %v5927_v9, %v2882_v34  ;;  %v2883_v38 = vmax.f32 %v2880_v44, %v2881_v10  ;;  %3976 = vmatpush3.bf16.msra.mxu1 %v3975_v3  ;;  %v2802_v27 = vmul.f32 1.050701, %v2800_v11  ;;  %v3993_v53 = vpack.c.bf16 %v2999_v8, %v2998_v62  ;;  %v2985_v3 = vld [vmem:[%s6334_s6 + $0x228] sm:$0xff]  ;;  %v2986_v10 = vld [vmem:[%s6334_s6 + $0x230] sm:$0xff]  ;;  %v3007_v5 = vld [vmem:[%s6334_s6 + $0x2d8] sm:$0xff] }
 0x3e2   :  { %3978 = vmatprep.subr.bf16.mxu1 %v3977_v17  ;;  %v2825_v63 = vsel %vm2815_vm4, %v5987_v47, %v2823_v54  ;;  %v2801_v30 = vsel %vm2791_vm5, %v6002_v39, %v2799_v12  ;;  %v3000_v47 = vld [vmem:[%s6334_s6 + $0x2a0] sm:$0xff]  ;;  %v3995_v25 = vpack.c.bf16 %v2983_v45, %v2982_v31  ;;  %v2866_v44 = vmul.f32 1.442695, %v6048_v32  ;;  %v3003_v17 = vld [vmem:[%s6334_s6 + $0x2b8] sm:$0xff]  ;;  %v3005_v36 = vld [vmem:[%s6334_s6 + $0x2c8] sm:$0xff] }
 0x3e3   :  { %v6084_v28 = vadd.f32 %v5927_v9, %v2883_v38  ;;  %v2963_v9 = vld [vmem:[%s6334_s6 + $0x178] sm:$0xff]  ;;  %v2827_v33 = vmul.f32 1.050701, %v2825_v63  ;;  %v2803_v50 = vmul.f32 1.050701, %v2801_v30  ;;  %v3997_v39 = vpack.c.bf16 %v3001_v58, %v3000_v47  ;;  %v2989_v1 = vld [vmem:[%s6334_s6 + $0x248] sm:$0xff] }
 0x3e4   :  { %v3987_v59 = vpack.c.bf16 %v2963_v9, %v2962_v61  ;;  %v3999_v46 = vpack.c.bf16 %v2985_v3, %v2984_v48  ;;  %4364 = vpow2.f32 %v2840_v55  ;;  %v2842_v26 = vmul.f32 1.442695, %v6012_v16  ;;  %v3006_v20 = vld [vmem:[%s6334_s6 + $0x2d0] sm:$0xff]  ;;  %v2991_v60 = vld [vmem:[%s6334_s6 + $0x258] sm:$0xff]  ;;  %v3012_v63 = vld [vmem:[%s6334_s6 + $0x300] sm:$0xff] }
 0x3e5   :  { %3980 = vmatpush3.bf16.msra.mxu1 %v3979_v52  ;;  %4366 = vpow2.f32 %v2866_v44  ;;  %v2888_v0 = vmul.f32 1.442695, %v6075_v37  ;;  %v4003_v38 = vpack.c.bf16 %v2987_v4, %v2986_v10  ;;  %v4005_v52 = vpack.c.bf16 %v3005_v36, %v3004_v7  ;;  %v2990_v21 = vld [vmem:[%s6334_s6 + $0x250] sm:$0xff]  ;;  %v2995_v62 = vld [vmem:[%s6334_s6 + $0x278] sm:$0xff]  ;;  %v3016_v48 = vld [vmem:[%s6334_s6 + $0x320] sm:$0xff] }
 0x3e6   :  { %3982 = vmatprep.subr.bf16.mxu1 %v3981_v18  ;;  %4368 = vpow2.f32 %v2842_v26  ;;  %v2988_v18 = vld [vmem:[%s6334_s6 + $0x240] sm:$0xff]  ;;  %v4009_v15 = vpack.c.bf16 %v3007_v5, %v3006_v20  ;;  %v3010_v54 = vld [vmem:[%s6334_s6 + $0x2f0] sm:$0xff]  ;;  %vm2863_vm8 = vcmp.gt.f32.partialorder %v6048_v32, 0.0  ;;  %v3015_v58 = vld [vmem:[%s6334_s6 + $0x318] sm:$0xff]  ;;  %vm2886_vm10 = vcmp.gt.f32.partialorder %v6075_v37, 0.0 }
 0x3e7   :  { %v4363_v56 = vpop.eup %4362  ;;  %4370 = vpow2.f32 %v2888_v0  ;;  %v4007_v6 = vpack.c.bf16 %v2989_v1, %v2988_v18  ;;  %v2994_v12 = vld [vmem:[%s6334_s6 + $0x270] sm:$0xff]  ;;  %v2890_v44 = vmul.f32 1.442695, %v6084_v28  ;;  %v3020_v26 = vld [vmem:[%s6334_s6 + $0x340] sm:$0xff]  ;;  %v3023_v0 = vld [vmem:[%s6334_s6 + $0x358] sm:$0xff]  ;;  %vm2887_vm11 = vcmp.gt.f32.partialorder %v6084_v28, 0.0 }
 0x3e8   :  { %v3697_v13 = vadd.f32 -1.0, %v4363_v56  ;;  %v4011_v56 = vpack.c.bf16 %v2991_v60, %v2990_v21  ;;  %v4019_v31 = vpack.c.bf16 %v2995_v62, %v2994_v12  ;;  %v3014_v47 = vld [vmem:[%s6334_s6 + $0x310] sm:$0xff]  ;;  %v3024_v36 = vld [vmem:[%s6334_s6 + $0x360] sm:$0xff]  ;;  %v3027_v5 = vld [vmem:[%s6334_s6 + $0x378] sm:$0xff] }
 0x3e9   :  { %3984 = vmatpush3.bf16.msra.mxu1 %v3983_v42  ;;  %v3008_v42 = vld [vmem:[%s6334_s6 + $0x2e0] sm:$0xff]  ;;  %4372 = vpow2.f32 %v2890_v44  ;;  %v3022_v4 = vld [vmem:[%s6334_s6 + $0x350] sm:$0xff] }
 0x3ea   :  { %3986 = vmatprep.subr.bf16.mxu1 %v3985_v29  ;;  %v2870_v57 = vmul.f32 1.6732632, %v3697_v13  ;;  %v3009_v29 = vld [vmem:[%s6334_s6 + $0x2e8] sm:$0xff]  ;;  %v3011_v13 = vld [vmem:[%s6334_s6 + $0x2f8] sm:$0xff]  ;;  %v4041_v7 = vpack.c.bf16 %v3023_v0, %v3022_v4  ;;  %v3026_v20 = vld [vmem:[%s6334_s6 + $0x370] sm:$0xff] }
 0x3eb   :  { %v4013_v41 = vpack.c.bf16 %v3009_v29, %v3008_v42  ;;  %v4017_v11 = vpack.c.bf16 %v3011_v13, %v3010_v54  ;;  %v3349_v42 = vld [vmem:[%s6336_s8] sm:$0xff]  ;;  %v3350_v29 = vld [vmem:[%s6336_s8 + $0x8] sm:$0xff]  ;;  %v3356_v54 = vld [vmem:[%s6336_s8 + $0x38] sm:$0xff] }
 0x3ec   :  { %v2872_v24 = vsel %vm2862_vm6, %v6038_v14, %v2870_v57  ;;  %v3002_v14 = vld [vmem:[%s6334_s6 + $0x2b0] sm:$0xff]  ;;  %v3013_v57 = vld [vmem:[%s6334_s6 + $0x308] sm:$0xff]  ;;  %v3361_v62 = vld [vmem:[%s6336_s8 + $0x60] sm:$0xff] }
 0x3ed   :  { %3988 = vmatpush3.bf16.msra.mxu1 %v3987_v59  ;;  %v2874_v51 = vmul.f32 1.050701, %v2872_v24  ;;  %v4001_v34 = vpack.c.bf16 %v3003_v17, %v3002_v14  ;;  %v4021_v45 = vpack.c.bf16 %v3013_v57, %v3012_v63  ;;  %v3018_v17 = vld [vmem:[%s6334_s6 + $0x330] sm:$0xff] }
 0x3ee   :  { %3990 = vmatprep.subr.bf16.mxu1 %v3989_v23  ;;  %v4365_v61 = vpop.eup %4364  ;;  %v3363_v57 = vld [vmem:[%s6336_s8 + $0x70] sm:$0xff] }
 0x3ef   :  { %v4367_v9 = vpop.eup %4366  ;;  %v3695_v2 = vadd.f32 -1.0, %v4365_v61  ;;  %v3351_v61 = vld [vmem:[%s6336_s8 + $0x10] sm:$0xff] }
 0x3f0   :  { %3175 = vmatmul.mubr.f32.vlgmr.msra.gmra.mrb[88].mxu1 %v2802_v27  ;;  %v4369_v59 = vpop.eup %4368  ;;  %v3698_v23 = vadd.f32 -1.0, %v4367_v9  ;;  %v4053_v9 = vpack.c.bf16 %v3350_v29, %v3349_v42  ;;  %v3704_v29 = vld [vmem:[%s6338_s9] ss:$0 sm:$0xff] }
 0x3f1   :  { %3179 = vmatprep.mubr.f32.mxu1 %v2827_v33  ;;  %3992 = vmatpush3.bf16.msra.mxu1 %v3991_v40  ;;  %v4371_v35 = vpop.eup %4370  ;;  %v2846_v8 = vmul.f32 1.6732632, %v3695_v2  ;;  %v3696_v40 = vadd.f32 -1.0, %v4369_v59  ;;  %v3355_v2 = vld [vmem:[%s6336_s8 + $0x30] sm:$0xff]  ;;  %v3357_v59 = vld [vmem:[%s6336_s8 + $0x40] sm:$0xff] }
 0x3f2   :  { %3994 = vmatprep.subr.bf16.mxu1 %v3993_v53  ;;  %v2871_v27 = vmul.f32 1.6732632, %v3698_v23  ;;  %v3699_v53 = vadd.f32 -1.0, %v4371_v35  ;;  %v4065_v13 = vpack.c.bf16 %v3356_v54, %v3355_v2  ;;  %v3358_v23 = vld [vmem:[%s6336_s8 + $0x48] sm:$0xff] }
 0x3f3   :  { %v2848_v33 = vsel %vm2838_vm7, %v5997_v43, %v2846_v8  ;;  %v2847_v30 = vmul.f32 1.6732632, %v3696_v40  ;;  %v4025_v43 = vpack.c.bf16 %v3015_v58, %v3014_v47  ;;  %v4069_v35 = vpack.c.bf16 %v3358_v23, %v3357_v59  ;;  %v3362_v8 = vld [vmem:[%s6336_s8 + $0x68] sm:$0xff]  ;;  %v3364_v40 = vld [vmem:[%s6336_s8 + $0x78] sm:$0xff]  ;;  %v3701_v58 = vld [vmem:[%s6337_s7] ss:$0 sm:$0xff] }
 0x3f4   :  { %3180 = vmatmul.mubr.f32.gmra.mrb[90].mxu1 %v2803_v50  ;;  %v2873_v24 = vsel %vm2863_vm8, %v6048_v32, %v2871_v27  ;;  %v2850_v55 = vmul.f32 1.050701, %v2848_v33  ;;  %v3017_v32 = vld [vmem:[%s6334_s6 + $0x328] sm:$0xff]  ;;  %v4077_v63 = vpack.c.bf16 %v3362_v8, %v3361_v62  ;;  %v4081_v27 = vpack.c.bf16 %v3364_v40, %v3363_v57 }
 0x3f5   :  { %3996 = vmatpush3.bf16.msra.mxu1 %v3995_v25  ;;  %3249 = vmatprep.mubr.f32.mxu1 %v2874_v51  ;;  %v2894_v25 = vmul.f32 1.6732632, %v3699_v53  ;;  %v2875_v50 = vmul.f32 1.050701, %v2873_v24 }
 0x3f6   :  { %3998 = vmatprep.subr.bf16.mxu1 %v3997_v39  ;;  %v2849_v39 = vsel %vm2839_vm9, %v6012_v16, %v2847_v30  ;;  %v4029_v16 = vpack.c.bf16 %v3017_v32, %v3016_v48 }
 0x3f7   :  { %v2896_v3 = vsel %vm2886_vm10, %v6075_v37, %v2894_v25  ;;  %v2851_v51 = vmul.f32 1.050701, %v2849_v39 }
 0x3f8   :  { %v2898_v14 = vmul.f32 1.050701, %v2896_v3 }
 0x3f9   :  { %4000 = vmatpush3.bf16.msra.mxu1 %v3999_v46  ;;  %v3019_v46 = vld [vmem:[%s6334_s6 + $0x338] sm:$0xff] }
 0x3fa   :  { %4002 = vmatprep.subr.bf16.mxu1 %v4001_v34  ;;  %v4033_v37 = vpack.c.bf16 %v3019_v46, %v3018_v17  ;;  %v3021_v34 = vld [vmem:[%s6334_s6 + $0x348] sm:$0xff] }
 0x3fb   :  { %v4037_v10 = vpack.c.bf16 %v3021_v34, %v3020_v26 }
 0x3fd   :  { %4004 = vmatpush3.bf16.msra.mxu1 %v4003_v38  ;;  %v3025_v38 = vld [vmem:[%s6334_s6 + $0x368] sm:$0xff] }
 0x3fe   :  { %4006 = vmatprep.subr.bf16.mxu1 %v4005_v52  ;;  %v4373_v52 = vpop.eup %4372  ;;  %v4045_v18 = vpack.c.bf16 %v3025_v38, %v3024_v36 }
 0x3ff   :  { %v3700_v1 = vadd.f32 -1.0, %v4373_v52 }
 0x401   :  { %4008 = vmatpush3.bf16.msra.mxu1 %v4007_v6  ;;  %v4049_v6 = vpack.c.bf16 %v3027_v5, %v3026_v20 }
 0x402   :  { %4010 = vmatprep.subr.bf16.mxu1 %v4009_v15  ;;  %v2895_v15 = vmul.f32 1.6732632, %v3700_v1 }
 0x404   :  { %v2897_v21 = vsel %vm2887_vm11, %v6084_v28, %v2895_v15  ;;  %v3352_v28 = vld [vmem:[%s6336_s8 + $0x18] sm:$0xff] }
 0x405   :  { %4012 = vmatpush3.bf16.msra.mxu1 %v4011_v56  ;;  %v2899_v60 = vmul.f32 1.050701, %v2897_v21  ;;  %v4057_v56 = vpack.c.bf16 %v3352_v28, %v3351_v61 }
 0x406   :  { %4014 = vmatprep.subr.bf16.mxu1 %v4013_v41  ;;  %v3353_v41 = vld [vmem:[%s6336_s8 + $0x20] sm:$0xff] }
 0x407   :  { %v4061_v22 = vpack.c.bf16 %v3354_v19, %v3353_v41 }
 0x409   :  { %4016 = vmatpush3.bf16.msra.mxu1 %v4015_v49  ;;  %v3359_v49 = vld [vmem:[%s6336_s8 + $0x50] sm:$0xff] }
 0x40a   :  { %4018 = vmatprep.subr.bf16.mxu1 %v4017_v11  ;;  %v3360_v11 = vld [vmem:[%s6336_s8 + $0x58] sm:$0xff] }
 0x40b   :  { %v4073_v12 = vpack.c.bf16 %v3360_v11, %v3359_v49 }
 0x40d   :  { %4020 = vmatpush3.bf16.msra.mxu1 %v4019_v31 }
 0x40e   :  { %4022 = vmatprep.subr.bf16.mxu1 %v4021_v45 }
 0x410   :  { %3250 = vmatmul.mubr.f32.vlgmr.msra.gmra.mrb[92].mxu1 %v2850_v55 }
 0x411   :  { %3254 = vmatprep.mubr.f32.mxu1 %v2875_v50  ;;  %4024 = vmatpush3.bf16.msra.mxu1 %v4021_v45 }
 0x412   :  { %4026 = vmatprep.subr.bf16.mxu1 %v4025_v43 }
 0x414   :  { %3255 = vmatmul.mubr.f32.gmra.mrb[94].mxu1 %v2851_v51 }
 0x415   :  { %4028 = vmatpush3.bf16.msra.mxu1 %v4025_v43  ;;  %3887 = vmatprep.mubr.f32.mxu1 %v2898_v14 }
 0x416   :  { %4030 = vmatprep.subr.bf16.mxu1 %v4029_v16 }
 0x419   :  { %4032 = vmatpush3.bf16.msra.mxu1 %v4029_v16 }
 0x41a   :  { %4034 = vmatprep.subr.bf16.mxu1 %v4033_v37 }
 0x41d   :  { %4036 = vmatpush3.bf16.msra.mxu1 %v4033_v37 }
 0x41e   :  { %4038 = vmatprep.subr.bf16.mxu1 %v4037_v10 }
 0x421   :  { %4040 = vmatpush3.bf16.msra.mxu1 %v4037_v10 }
 0x422   :  { %4042 = vmatprep.subr.bf16.mxu1 %v4041_v7 }
 0x425   :  { %4044 = vmatpush3.bf16.msra.mxu1 %v4041_v7 }
 0x426   :  { %4046 = vmatprep.subr.bf16.mxu1 %v4045_v18 }
 0x429   :  { %4048 = vmatpush3.bf16.msra.mxu1 %v4045_v18 }
 0x42a   :  { %4050 = vmatprep.subr.bf16.mxu1 %v4049_v6 }
 0x42d   :  { %4052 = vmatpush3.bf16.msra.mxu1 %v4049_v6 }
 0x42e   :  { %4054 = vmatprep.subr.bf16.mxu1 %v4053_v9 }
 0x430   :  { %3888 = vmatmul.mubr.f32.vlgmr.msra.gmra.mrb[96].mxu1 %v2899_v60 }
 0x431   :  { %4056 = vmatpush3.bf16.msra.mxu1 %v4053_v9 }
 0x432   :  { %4058 = vmatprep.subr.bf16.mxu1 %v4057_v56 }
 0x435   :  { %4060 = vmatpush3.bf16.msra.mxu1 %v4057_v56 }
 0x436   :  { %4062 = vmatprep.subr.bf16.mxu1 %v4061_v22 }
 0x439   :  { %4064 = vmatpush3.bf16.msra.mxu1 %v4061_v22 }
 0x43a   :  { %4066 = vmatprep.subr.bf16.mxu1 %v4065_v13 }
 0x43d   :  { %4068 = vmatpush3.bf16.msra.mxu1 %v4065_v13 }
 0x43e   :  { %4070 = vmatprep.subr.bf16.mxu1 %v4069_v35 }
 0x441   :  { %4072 = vmatpush3.bf16.msra.mxu1 %v4069_v35 }
 0x442   :  { %4074 = vmatprep.subr.bf16.mxu1 %v4073_v12 }
 0x445   :  { %4076 = vmatpush3.bf16.msra.mxu1 %v4073_v12 }
 0x446   :  { %4078 = vmatprep.subr.bf16.mxu1 %v4077_v63 }
 0x449   :  { %4080 = vmatpush3.bf16.msra.mxu1 %v4077_v63 }
 0x44a   :  { %4082 = vmatprep.subr.bf16.mxu1 %v4081_v27 }
 0x44d   :  { %4084 = vmatpush3.bf16.msra.mxu1 %v4081_v27 }
 0x4a3   :  { %v3737_v53 = vpop.f32.mrb[84].mxu1 }
 0x4a4   :  { %v3738_v31 = vpop.f32.mrb[85].mxu1 }
 0x4a5   :  { %v3739_v45 = vadd.f32 %v3738_v31, %v3737_v53 }
 0x4a7   :  { %v3740_v33 = vpop.f32.mrb[86].mxu1  ;;  %v3102_v55 = vadd.f32 %v3739_v45, %v3701_v58 }
 0x4a8   :  { %v3741_v30 = vpop.f32.mrb[87].mxu1 }
 0x4a9   :  { %v3742_v47 = vadd.f32 %v3741_v30, %v3740_v33 }
 0x4ab   :  { %v3107_v32 = vadd.f32 %v3742_v47, %v3701_v58 }
 0x4c3   :  { %v3775_v24 = vpop.f32.mrb[88].mxu1 }
 0x4c4   :  { %v3776_v25 = vpop.f32.mrb[89].mxu1 }
 0x4c5   :  { %v3777_v43 = vadd.f32 %v3776_v25, %v3775_v24 }
 0x4c7   :  { %v3177_v50 = vadd.f32 %v3777_v43, %v3102_v55  ;;  %v3778_v39 = vpop.f32.mrb[90].mxu1 }
 0x4c8   :  { %v3779_v48 = vpop.f32.mrb[91].mxu1 }
 0x4c9   :  { %v3780_v3 = vadd.f32 %v3779_v48, %v3778_v39 }
 0x4cb   :  { %v3182_v44 = vadd.f32 %v3780_v3, %v3107_v32 }
 0x4e3   :  { %v3813_v51 = vpop.f32.mrb[92].mxu1 }
 0x4e4   :  { %v3814_v16 = vpop.f32.mrb[93].mxu1 }
 0x4e5   :  { %v3815_v14 = vadd.f32 %v3814_v16, %v3813_v51 }
 0x4e7   :  { %v3816_v17 = vpop.f32.mrb[94].mxu1  ;;  %v3252_v46 = vadd.f32 %v3815_v14, %v3177_v50 }
 0x4e8   :  { %v3817_v37 = vpop.f32.mrb[95].mxu1 }
 0x4e9   :  { %v3818_v26 = vadd.f32 %v3817_v37, %v3816_v17 }
 0x4eb   :  { %v3257_v34 = vadd.f32 %v3818_v26, %v3182_v44 }
 0x503   :  { %v3889_v10 = vpop.f32.mrb[96].mxu1 }
 0x504   :  { %v3332_v4 = vadd.f32 %v3889_v10, %v3257_v34  ;;  %v3326_v0 = vpop.f32.mrb[97].mxu1 }
 0x505   :  { %v3327_v7 = vadd.f32 %v3326_v0, %v3252_v46 }
 0x506   :  { %v3339_v36 = vmul.f32 1.442695, %v3332_v4  ;;  %vm3336_vm12 = vcmp.gt.f32.partialorder %v3332_v4, 0.0 }
 0x507   :  { %v3337_v38 = vmul.f32 1.442695, %v3327_v7  ;;  %vm3335_vm13 = vcmp.gt.f32.partialorder %v3327_v7, 0.0 }
 0x508   :  { %4374 = vpow2.f32 %v3339_v36 }
 0x509   :  { %4376 = vpow2.f32 %v3337_v38 }
 0x512   :  { %v4375_v52 = vpop.eup %4374 }
 0x513   :  { %v4377_v18 = vpop.eup %4376  ;;  %v3703_v1 = vadd.f32 -1.0, %v4375_v52 }
 0x514   :  { %v3702_v20 = vadd.f32 -1.0, %v4377_v18 }
 0x515   :  { %v3344_v5 = vmul.f32 1.6732632, %v3703_v1 }
 0x516   :  { %v3343_v6 = vmul.f32 1.6732632, %v3702_v20 }
 0x517   :  { %v3346_v15 = vsel %vm3336_vm12, %v3332_v4, %v3344_v5 }
 0x518   :  { %v3345_v21 = vsel %vm3335_vm13, %v3327_v7, %v3343_v6  ;;  %v3348_v42 = vmul.f32 1.050701, %v3346_v15 }
 0x519   :  { %v3347_v60 = vmul.f32 1.050701, %v3345_v21 }
 0x51b   :  { %3922 = vmatprep.mubr.f32.mxu1 %v3347_v60 }
 0x51c   :  { %3923 = vmatmul.mubr.f32.vlgmr.msra.gmra.mrb[98].mxu1 %v3348_v42 }
 0x5ef   :  { %v3924_v61 = vpop.f32.mrb[98].mxu1 }
 0x5f0   :  { %v3438_v9 = vpop.f32.mrb[99].mxu1  ;;  %v3444_v56 = vadd.f32 %v3924_v61, %v3704_v29 }
 0x5f1   :  { %v3439_v28 = vadd.f32 %v3704_v29, %v3438_v9 }
 0x5f2   :  { %v3451_v19 = vsel %vm3447_vm14, %v3444_v56, -inf }
 0x5f3   :  { %v3448_v41 = vsel %vm3447_vm14, %v3439_v28, -inf }
 0x5f4   :  { %3449 = vmax.xlane.f32.xlu0 %v3448_v41 }
 0x5f8   :  { %3452 = vmax.xlane.f32.xlu0 %v3451_v19 }
 0x681   :  { %v3450_v22 = vpop.xlane.xlu0 %3449 }
 0x682   :  { %v3454_v2 = vsub.f32 %v3439_v28, %v3450_v22 }
 0x684   :  { %v3456_v54 = vmul.f32 1.442695, %v3454_v2 }
 0x685   :  { %v3453_v13 = vpop.xlane.xlu0 %3452 }
 0x686   :  { %4378 = vpow2.f32 %v3456_v54  ;;  %v3455_v59 = vsub.f32 %v3444_v56, %v3453_v13 }
 0x688   :  { %v3458_v23 = vmul.f32 1.442695, %v3455_v59 }
 0x68a   :  { %4380 = vpow2.f32 %v3458_v23 }
 0x690   :  { %v4379_v35 = vpop.eup %4378 }
 0x691   :  { %v3460_v49 = vsel %vm3447_vm14, %v4379_v35, 0.0 }
 0x692   :  { %3461 = vadd.xlane.f32.xlu1 %v3460_v49 }
 0x694   :  { %v4381_v11 = vpop.eup %4380 }
 0x695   :  { %v3463_v12 = vsel %vm3447_vm14, %v4381_v11, 0.0 }
 0x696   :  { %3464 = vadd.xlane.f32.xlu1 %v3463_v12 }
 0x71f   :  { %v3462_v62 = vpop.xlane.xlu1 %3461 }
 0x720   :  { %4382 = vlog2.f32 %v3462_v62 }
 0x723   :  { %v3465_v8 = vpop.xlane.xlu1 %3464 }
 0x724   :  { %4384 = vlog2.f32 %v3465_v8 }
 0x72a   :  { %v4383_v63 = vpop.eup %4382 }
 0x72b   :  { %v3467_v57 = vmul.f32 0.6931472, %v4383_v63 }
 0x72d   :  { %v3470_v40 = vadd.f32 %v3467_v57, %v3450_v22 }
 0x72e   :  { %v4385_v27 = vpop.eup %4384 }
 0x72f   :  { %v3472_v53 = vsub.f32 %v3439_v28, %v3470_v40  ;;  %v3469_v31 = vmul.f32 0.6931472, %v4385_v27 }
 0x731   :  { %3474 = vst [vmem:[%s6339_s10] sm:$0xff] %v3472_v53  ;;  %v3471_v45 = vadd.f32 %v3469_v31, %v3453_v13 }
 0x733   :  { %v3473_v33 = vsub.f32 %v3444_v56, %v3471_v45 }
 0x735   :  { %3475 = vst [vmem:[%s6339_s10 + $0x8] sm:$0xff] %v3473_v33 }

</bundles_post_ra>
